<compile_context>
chip_gen: v7x
topology: tpu7x:2x2x1
jax: 0.10.0
libtpu: 0.0.40
codegen_flags: <defaults>
</compile_context>

<pallas_src>
import jax
import jax.numpy as jnp
from jax.experimental import pallas as pl
from jax.experimental.pallas import tpu as pltpu

N_CHANNELS = 16
N_CLASSES = 10
BATCH = 4
FEAT = N_CHANNELS * (N_CHANNELS + 1) // 2          # 136
HIDDEN = (512, 256, 128, 64)
OUT_PAD = 128                                      # lane-dense padded logits width

# bias slab layout (f32, one row).  All segment starts are multiples of 128.
B1_OFF, B2_OFF, B3_OFF, B4_OFF, B5_OFF = 0, 512, 768, 896, 1024
BIAS_W = 1152                                      # 9 * 128

_VMEM = pl.BlockSpec(memory_space=pltpu.MemorySpace.VMEM)


# ---------------------------------------------------------------------------
# Kernel 1: basis transform  Y_b = W^T @ X_b @ W, whole batch in one invocation.
# First stage is a single stacked (B*N, N) @ (N, N) MXU matmul.
# ---------------------------------------------------------------------------
def _basis_kernel(w_ref, xs_ref, y_ref):
    W = w_ref[...]                                  # (N, N)
    Xs = xs_ref[...]                                # (B*N, N), stacked X_b
    n = W.shape[0]
    b_total = y_ref.shape[0]
    T = jnp.dot(Xs, W, preferred_element_type=jnp.float32)   # rows [b*N:(b+1)*N] = X_b @ W
    Wt = W.T
    for b in range(b_total):                        # B=4, unrolled at trace time
        Tb = T[b * n:(b + 1) * n, :]                # (N, N) = X_b @ W
        y_ref[b] = jnp.dot(Wt, Tb, preferred_element_type=jnp.float32)


def basis_transform(X, W):
    B, n, _ = X.shape
    Xs = X.reshape(B * n, n)                        # free row-major reshape in HBM
    return pl.pallas_call(
        _basis_kernel,
        out_shape=jax.ShapeDtypeStruct((B, n, n), jnp.float32),
        in_specs=[_VMEM, _VMEM],
        out_specs=_VMEM,
    )(W, Xs)


# ---------------------------------------------------------------------------
# Kernel 2 (fused): LogEig reconstruction + 5-layer MLP head.
#   M_b = V_b @ diag(log(clamp(lam_b, 1e-6))) @ V_b^T           (kept in vregs)
#   h1  = sum_i rows_i @ W1r[i]   with rows_i[b,:] = M_b[i,:]   (triu fold in W1r)
#   h2..h5 = dense layers (Dropout(0.5) is identity in eval/inference mode).
# Weights bf16, biases/accumulation/elementwise f32, (B,128) lane-dense output.
# ---------------------------------------------------------------------------
def _logeig_mlp_kernel(v_ref, lam_ref, w1_ref, w2_ref, w3_ref, w4_ref, w5_ref,
                       b_ref, o_ref):
    B = v_ref.shape[0]
    n = v_ref.shape[1]

    # --- LogEig reconstruction, one (16,16) matrix per batch, values stay in vregs.
    m_list = []
    for b in range(B):                              # B=4, unrolled
        Vb = v_ref[b]                               # (N, N) eigenvector columns
        lamb = lam_ref[b]                           # (1, N)
        loglam = jnp.log(jnp.maximum(lamb, 1e-6))   # f32 elementwise
        Vs = Vb * loglam                            # scale column k by log(lambda_k)
        m_list.append(jnp.dot(Vs, Vb.T, preferred_element_type=jnp.float32))

    # --- First FC:  h1[b,:] = sum_{i,j} M_b[i,j] * W1r[i,j,:]  (+ b1), no relayout.
    acc = jnp.zeros((B, HIDDEN[0]), jnp.float32)
    for i in range(n):                              # 16 small (B,16)@(16,512) matmuls
        rows = jnp.concatenate([m[i:i + 1, :] for m in m_list], axis=0)   # (B, N)
        acc = acc + jnp.dot(rows.astype(jnp.bfloat16), w1_ref[i],
                            preferred_element_type=jnp.float32)
    b1 = b_ref[:, B1_OFF:B1_OFF + HIDDEN[0]]
    h = jnp.maximum(acc + b1, 0.0)

    # --- Remaining dense layers.
    def layer(h, w_ref, bias, relu):
        y = jnp.dot(h.astype(jnp.bfloat16), w_ref[...],
                    preferred_element_type=jnp.float32) + bias
        return jnp.maximum(y, 0.0) if relu else y

    h = layer(h, w2_ref, b_ref[:, B2_OFF:B2_OFF + HIDDEN[1]], True)
    h = layer(h, w3_ref, b_ref[:, B3_OFF:B3_OFF + HIDDEN[2]], True)
    h = layer(h, w4_ref, b_ref[:, B4_OFF:B4_OFF + HIDDEN[3]], True)
    o_ref[...] = layer(h, w5_ref, b_ref[:, B5_OFF:B5_OFF + OUT_PAD], False)


def logeig_mlp(V, lam, packed):
    B, n, _ = V.shape
    w1r, w2, w3, w4, w5, bslab = packed
    out = pl.pallas_call(
        _logeig_mlp_kernel,
        out_shape=jax.ShapeDtypeStruct((B, OUT_PAD), jnp.float32),
        in_specs=[_VMEM] * 8,
        out_specs=_VMEM,
    )(V, lam.reshape(B, 1, n), w1r, w2, w3, w4, w5, bslab)
    return out[:, :N_CLASSES]                       # drop lane padding


# ---------------------------------------------------------------------------
# Full SPDNet forward
# ---------------------------------------------------------------------------
def spdnet_forward(X, W_orth, packed):
    Y = basis_transform(X, W_orth)
    # TODO(synk): eigh stays in XLA; no Pallas TPU symmetric-eigensolver primitive.
    lam, V = jnp.linalg.eigh(Y)
    return logeig_mlp(V, lam, packed)


# ---------------------------------------------------------------------------
# Deterministic parameter init (synthetic; mirrors __init__ shapes)
# ---------------------------------------------------------------------------
def init_params(key):
    keys = jax.random.split(key, 1 + 2 * 5)
    # geotorch.orthogonal(W): use a deterministic orthogonal matrix (QR of random normal).
    A = jax.random.normal(keys[0], (N_CHANNELS, N_CHANNELS), jnp.float32)
    W_orth, _ = jnp.linalg.qr(A)
    dims = (FEAT,) + HIDDEN + (N_CLASSES,)
    raw = []
    for i in range(5):
        fan_in = dims[i]
        bound = 1.0 / (fan_in ** 0.5)
        w = jax.random.uniform(keys[1 + 2 * i], (dims[i], dims[i + 1]),
                               jnp.float32, -bound, bound)
        b = jax.random.uniform(keys[2 + 2 * i], (1, dims[i + 1]),
                               jnp.float32, -bound, bound)
        raw.append((w, b))
    return W_orth, raw


def pack_fc_params(raw):
    """Fold the triu gather into W1 and reshape it to (16,16,512), pad the last layer
    to a lane-dense width, store weights as bf16, and pack the f32 biases into one
    lane-aligned slab."""
    iu = jnp.triu_indices(N_CHANNELS)
    w1, b1 = raw[0]
    w1_fold = jnp.zeros((N_CHANNELS * N_CHANNELS, HIDDEN[0]), jnp.float32)
    w1_fold = w1_fold.at[iu[0] * N_CHANNELS + iu[1], :].set(w1)          # (256, 512)
    w1r = w1_fold.reshape(N_CHANNELS, N_CHANNELS, HIDDEN[0]).astype(jnp.bfloat16)

    w2 = raw[1][0].astype(jnp.bfloat16)
    w3 = raw[2][0].astype(jnp.bfloat16)
    w4 = raw[3][0].astype(jnp.bfloat16)
    w5, b5 = raw[4]
    w5_pad = (jnp.zeros((HIDDEN[3], OUT_PAD), jnp.float32)
              .at[:, :N_CLASSES].set(w5).astype(jnp.bfloat16))

    bslab = jnp.zeros((1, BIAS_W), jnp.float32)
    bslab = bslab.at[:, B1_OFF:B1_OFF + HIDDEN[0]].set(raw[0][1])
    bslab = bslab.at[:, B2_OFF:B2_OFF + HIDDEN[1]].set(raw[1][1])
    bslab = bslab.at[:, B3_OFF:B3_OFF + HIDDEN[2]].set(raw[2][1])
    bslab = bslab.at[:, B4_OFF:B4_OFF + HIDDEN[3]].set(raw[3][1])
    bslab = bslab.at[:, B5_OFF:B5_OFF + N_CLASSES].set(b5)
    return (w1r, w2, w3, w4, w5_pad, bslab)


# ---------------------------------------------------------------------------
# Pure-JAX reference (mirrors the bf16 dot-input casts so the check validates
# the kernel structure, not the deliberate bf16 weight quantization).
# ---------------------------------------------------------------------------
def reference_forward(X, W, fc_params_raw):
    Y = jnp.einsum('ji,bjk,kl->bil', W, X, W)       # W^T @ X @ W
    lam, V = jnp.linalg.eigh(Y)
    loglam = jnp.log(jnp.maximum(lam, 1e-6))
    L = jnp.einsum('bij,bj,bkj->bik', V, loglam, V)
    iu = jnp.triu_indices(N_CHANNELS)
    h = L[:, iu[0], iu[1]]                          # (B, FEAT)
    for i, (w, b) in enumerate(fc_params_raw):
        h = jnp.dot(h.astype(jnp.bfloat16), w.astype(jnp.bfloat16),
                    preferred_element_type=jnp.float32) + b
        if i < 4:
            h = jnp.maximum(h, 0.0)
    return h


if __name__ == "__main__":
    key = jax.random.PRNGKey(0)
    k_param, k_data = jax.random.split(key)
    W_orth, fc_raw = init_params(k_param)
    fc_packed = pack_fc_params(fc_raw)

    # Build a batch of SPD input matrices: X = A A^T + eps*I
    A = jax.random.normal(k_data, (BATCH, N_CHANNELS, N_CHANNELS), jnp.float32)
    X = jnp.einsum('bij,bkj->bik', A, A) + 1e-3 * jnp.eye(N_CHANNELS, dtype=jnp.float32)

    fwd = jax.jit(spdnet_forward)
    out = jax.block_until_ready(fwd(X, W_orth, fc_packed))
    ref = jax.block_until_ready(reference_forward(X, W_orth, fc_raw))

    assert out.shape == (BATCH, N_CLASSES)
    assert jnp.allclose(out, ref, rtol=2e-2, atol=2e-2), "mismatch vs JAX reference"
    print("KERNEL_OK")
</pallas_src>

<mosaic_0001>
module attributes {stable_mosaic.version = 11 : i64} {
  func.func @_basis_kernel(%arg0: memref<16x16xf32, #tpu.memory_space<vmem>>, %arg1: memref<64x16xf32, #tpu.memory_space<vmem>>, %arg2: memref<4x16x16xf32, #tpu.memory_space<vmem>>) attributes {dimension_semantics = [], scalar_prefetch = 0 : i64, scratch_operands = 0 : i64, tpu.core_type = #tpu.core_type<tc>} {
    %c0 = arith.constant 0 : index
    %c0_0 = arith.constant 0 : index
    %0 = vector.load %arg0[%c0, %c0_0] : memref<16x16xf32, #tpu.memory_space<vmem>>, vector<16x16xf32>
    %c0_1 = arith.constant 0 : index
    %c0_2 = arith.constant 0 : index
    %1 = vector.load %arg1[%c0_1, %c0_2] : memref<64x16xf32, #tpu.memory_space<vmem>>, vector<64x16xf32>
    %cst = arith.constant dense<0.000000e+00> : vector<64x16xf32>
    %2 = tpu.matmul %1, %0, %cst {dimension_numbers = #tpu.dot_dimension_numbers<[1], [0], [0], [1], [0, 0, 1, 1], [], []>} : vector<64x16xf32>, vector<16x16xf32>, vector<64x16xf32> -> vector<64x16xf32>
    %3 = tpu.transpose %0, [1, 0] : vector<16x16xf32> -> vector<16x16xf32>
    %4 = vector.extract_strided_slice %2 {offsets = [0, 0], sizes = [16, 16], strides = [1, 1]} : vector<64x16xf32> to vector<16x16xf32>
    %cst_3 = arith.constant dense<0.000000e+00> : vector<16x16xf32>
    %5 = tpu.matmul %3, %4, %cst_3 {dimension_numbers = #tpu.dot_dimension_numbers<[1], [0], [0], [1], [0, 0, 1, 1], [], []>} : vector<16x16xf32>, vector<16x16xf32>, vector<16x16xf32> -> vector<16x16xf32>
    %c0_4 = arith.constant 0 : index
    %c0_5 = arith.constant 0 : index
    %c0_6 = arith.constant 0 : index
    %6 = vector.load %arg2[%c0_4, %c0_5, %c0_6] : memref<4x16x16xf32, #tpu.memory_space<vmem>>, vector<1x16x16xf32>
    %7 = vector.shape_cast %6 : vector<1x16x16xf32> to vector<16x16xf32>
    %8 = vector.shape_cast %5 : vector<16x16xf32> to vector<1x16x16xf32>
    tpu.vector_store %arg2[%c0_4, %c0_5, %c0_6], %8 {strides = array<i32>} : memref<4x16x16xf32, #tpu.memory_space<vmem>>, vector<1x16x16xf32>,
    %9 = vector.extract_strided_slice %2 {offsets = [16, 0], sizes = [16, 16], strides = [1, 1]} : vector<64x16xf32> to vector<16x16xf32>
    %cst_7 = arith.constant dense<0.000000e+00> : vector<16x16xf32>
    %10 = tpu.matmul %3, %9, %cst_7 {dimension_numbers = #tpu.dot_dimension_numbers<[1], [0], [0], [1], [0, 0, 1, 1], [], []>} : vector<16x16xf32>, vector<16x16xf32>, vector<16x16xf32> -> vector<16x16xf32>
    %c1 = arith.constant 1 : index
    %c0_8 = arith.constant 0 : index
    %c0_9 = arith.constant 0 : index
    %11 = vector.load %arg2[%c1, %c0_8, %c0_9] : memref<4x16x16xf32, #tpu.memory_space<vmem>>, vector<1x16x16xf32>
    %12 = vector.shape_cast %11 : vector<1x16x16xf32> to vector<16x16xf32>
    %13 = vector.shape_cast %10 : vector<16x16xf32> to vector<1x16x16xf32>
    tpu.vector_store %arg2[%c1, %c0_8, %c0_9], %13 {strides = array<i32>} : memref<4x16x16xf32, #tpu.memory_space<vmem>>, vector<1x16x16xf32>,
    %14 = vector.extract_strided_slice %2 {offsets = [32, 0], sizes = [16, 16], strides = [1, 1]} : vector<64x16xf32> to vector<16x16xf32>
    %cst_10 = arith.constant dense<0.000000e+00> : vector<16x16xf32>
    %15 = tpu.matmul %3, %14, %cst_10 {dimension_numbers = #tpu.dot_dimension_numbers<[1], [0], [0], [1], [0, 0, 1, 1], [], []>} : vector<16x16xf32>, vector<16x16xf32>, vector<16x16xf32> -> vector<16x16xf32>
    %c2 = arith.constant 2 : index
    %c0_11 = arith.constant 0 : index
    %c0_12 = arith.constant 0 : index
    %16 = vector.load %arg2[%c2, %c0_11, %c0_12] : memref<4x16x16xf32, #tpu.memory_space<vmem>>, vector<1x16x16xf32>
    %17 = vector.shape_cast %16 : vector<1x16x16xf32> to vector<16x16xf32>
    %18 = vector.shape_cast %15 : vector<16x16xf32> to vector<1x16x16xf32>
    tpu.vector_store %arg2[%c2, %c0_11, %c0_12], %18 {strides = array<i32>} : memref<4x16x16xf32, #tpu.memory_space<vmem>>, vector<1x16x16xf32>,
    %19 = vector.extract_strided_slice %2 {offsets = [48, 0], sizes = [16, 16], strides = [1, 1]} : vector<64x16xf32> to vector<16x16xf32>
    %cst_13 = arith.constant dense<0.000000e+00> : vector<16x16xf32>
    %20 = tpu.matmul %3, %19, %cst_13 {dimension_numbers = #tpu.dot_dimension_numbers<[1], [0], [0], [1], [0, 0, 1, 1], [], []>} : vector<16x16xf32>, vector<16x16xf32>, vector<16x16xf32> -> vector<16x16xf32>
    %c3 = arith.constant 3 : index
    %c0_14 = arith.constant 0 : index
    %c0_15 = arith.constant 0 : index
    %21 = vector.load %arg2[%c3, %c0_14, %c0_15] : memref<4x16x16xf32, #tpu.memory_space<vmem>>, vector<1x16x16xf32>
    %22 = vector.shape_cast %21 : vector<1x16x16xf32> to vector<16x16xf32>
    %23 = vector.shape_cast %20 : vector<16x16xf32> to vector<1x16x16xf32>
    tpu.vector_store %arg2[%c3, %c0_14, %c0_15], %23 {strides = array<i32>} : memref<4x16x16xf32, #tpu.memory_space<vmem>>, vector<1x16x16xf32>,
    return
  }
}

module attributes {stable_mosaic.version = 11 : i64} {
  func.func @_logeig_mlp_kernel(%arg0: memref<4x16x16xf32, #tpu.memory_space<vmem>>, %arg1: memref<4x1x16xf32, #tpu.memory_space<vmem>>, %arg2: memref<16x16x512xbf16, #tpu.memory_space<vmem>>, %arg3: memref<512x256xbf16, #tpu.memory_space<vmem>>, %arg4: memref<256x128xbf16, #tpu.memory_space<vmem>>, %arg5: memref<128x64xbf16, #tpu.memory_space<vmem>>, %arg6: memref<64x128xbf16, #tpu.memory_space<vmem>>, %arg7: memref<1x1152xf32, #tpu.memory_space<vmem>>, %arg8: memref<4x128xf32, #tpu.memory_space<vmem>>) attributes {dimension_semantics = [], scalar_prefetch = 0 : i64, scratch_operands = 0 : i64, tpu.core_type = #tpu.core_type<tc>} {
    %c0 = arith.constant 0 : index
    %c0_0 = arith.constant 0 : index
    %c0_1 = arith.constant 0 : index
    %0 = vector.load %arg0[%c0, %c0_0, %c0_1] : memref<4x16x16xf32, #tpu.memory_space<vmem>>, vector<1x16x16xf32>
    %1 = vector.shape_cast %0 : vector<1x16x16xf32> to vector<16x16xf32>
    %c0_2 = arith.constant 0 : index
    %c0_3 = arith.constant 0 : index
    %c0_4 = arith.constant 0 : index
    %2 = vector.load %arg1[%c0_2, %c0_3, %c0_4] : memref<4x1x16xf32, #tpu.memory_space<vmem>>, vector<1x1x16xf32>
    %3 = vector.shape_cast %2 : vector<1x1x16xf32> to vector<1x16xf32>
    %cst = arith.constant 9.99999997E-7 : f32
    %4 = vector.broadcast %cst : f32 to vector<1x16xf32>
    %5 = arith.maximumf %3, %4 : vector<1x16xf32>
    %6 = math.log %5 : vector<1x16xf32>
    %7 = vector.broadcast %6 : vector<1x16xf32> to vector<16x16xf32>
    %8 = arith.mulf %1, %7 : vector<16x16xf32>
    %9 = tpu.transpose %1, [1, 0] : vector<16x16xf32> -> vector<16x16xf32>
    %cst_5 = arith.constant dense<0.000000e+00> : vector<16x16xf32>
    %10 = tpu.matmul %8, %9, %cst_5 {dimension_numbers = #tpu.dot_dimension_numbers<[1], [0], [0], [1], [0, 0, 1, 1], [], []>} : vector<16x16xf32>, vector<16x16xf32>, vector<16x16xf32> -> vector<16x16xf32>
    %c1 = arith.constant 1 : index
    %c0_6 = arith.constant 0 : index
    %c0_7 = arith.constant 0 : index
    %11 = vector.load %arg0[%c1, %c0_6, %c0_7] : memref<4x16x16xf32, #tpu.memory_space<vmem>>, vector<1x16x16xf32>
    %12 = vector.shape_cast %11 : vector<1x16x16xf32> to vector<16x16xf32>
    %c1_8 = arith.constant 1 : index
    %c0_9 = arith.constant 0 : index
    %c0_10 = arith.constant 0 : index
    %13 = vector.load %arg1[%c1_8, %c0_9, %c0_10] : memref<4x1x16xf32, #tpu.memory_space<vmem>>, vector<1x1x16xf32>
    %14 = vector.shape_cast %13 : vector<1x1x16xf32> to vector<1x16xf32>
    %cst_11 = arith.constant 9.99999997E-7 : f32
    %15 = vector.broadcast %cst_11 : f32 to vector<1x16xf32>
    %16 = arith.maximumf %14, %15 : vector<1x16xf32>
    %17 = math.log %16 : vector<1x16xf32>
    %18 = vector.broadcast %17 : vector<1x16xf32> to vector<16x16xf32>
    %19 = arith.mulf %12, %18 : vector<16x16xf32>
    %20 = tpu.transpose %12, [1, 0] : vector<16x16xf32> -> vector<16x16xf32>
    %cst_12 = arith.constant dense<0.000000e+00> : vector<16x16xf32>
    %21 = tpu.matmul %19, %20, %cst_12 {dimension_numbers = #tpu.dot_dimension_numbers<[1], [0], [0], [1], [0, 0, 1, 1], [], []>} : vector<16x16xf32>, vector<16x16xf32>, vector<16x16xf32> -> vector<16x16xf32>
    %c2 = arith.constant 2 : index
    %c0_13 = arith.constant 0 : index
    %c0_14 = arith.constant 0 : index
    %22 = vector.load %arg0[%c2, %c0_13, %c0_14] : memref<4x16x16xf32, #tpu.memory_space<vmem>>, vector<1x16x16xf32>
    %23 = vector.shape_cast %22 : vector<1x16x16xf32> to vector<16x16xf32>
    %c2_15 = arith.constant 2 : index
    %c0_16 = arith.constant 0 : index
    %c0_17 = arith.constant 0 : index
    %24 = vector.load %arg1[%c2_15, %c0_16, %c0_17] : memref<4x1x16xf32, #tpu.memory_space<vmem>>, vector<1x1x16xf32>
    %25 = vector.shape_cast %24 : vector<1x1x16xf32> to vector<1x16xf32>
    %cst_18 = arith.constant 9.99999997E-7 : f32
    %26 = vector.broadcast %cst_18 : f32 to vector<1x16xf32>
    %27 = arith.maximumf %25, %26 : vector<1x16xf32>
    %28 = math.log %27 : vector<1x16xf32>
    %29 = vector.broadcast %28 : vector<1x16xf32> to vector<16x16xf32>
    %30 = arith.mulf %23, %29 : vector<16x16xf32>
    %31 = tpu.transpose %23, [1, 0] : vector<16x16xf32> -> vector<16x16xf32>
    %cst_19 = arith.constant dense<0.000000e+00> : vector<16x16xf32>
    %32 = tpu.matmul %30, %31, %cst_19 {dimension_numbers = #tpu.dot_dimension_numbers<[1], [0], [0], [1], [0, 0, 1, 1], [], []>} : vector<16x16xf32>, vector<16x16xf32>, vector<16x16xf32> -> vector<16x16xf32>
    %c3 = arith.constant 3 : index
    %c0_20 = arith.constant 0 : index
    %c0_21 = arith.constant 0 : index
    %33 = vector.load %arg0[%c3, %c0_20, %c0_21] : memref<4x16x16xf32, #tpu.memory_space<vmem>>, vector<1x16x16xf32>
    %34 = vector.shape_cast %33 : vector<1x16x16xf32> to vector<16x16xf32>
    %c3_22 = arith.constant 3 : index
    %c0_23 = arith.constant 0 : index
    %c0_24 = arith.constant 0 : index
    %35 = vector.load %arg1[%c3_22, %c0_23, %c0_24] : memref<4x1x16xf32, #tpu.memory_space<vmem>>, vector<1x1x16xf32>
    %36 = vector.shape_cast %35 : vector<1x1x16xf32> to vector<1x16xf32>
    %cst_25 = arith.constant 9.99999997E-7 : f32
    %37 = vector.broadcast %cst_25 : f32 to vector<1x16xf32>
    %38 = arith.maximumf %36, %37 : vector<1x16xf32>
    %39 = math.log %38 : vector<1x16xf32>
    %40 = vector.broadcast %39 : vector<1x16xf32> to vector<16x16xf32>
    %41 = arith.mulf %34, %40 : vector<16x16xf32>
    %42 = tpu.transpose %34, [1, 0] : vector<16x16xf32> -> vector<16x16xf32>
    %cst_26 = arith.constant dense<0.000000e+00> : vector<16x16xf32>
    %43 = tpu.matmul %41, %42, %cst_26 {dimension_numbers = #tpu.dot_dimension_numbers<[1], [0], [0], [1], [0, 0, 1, 1], [], []>} : vector<16x16xf32>, vector<16x16xf32>, vector<16x16xf32> -> vector<16x16xf32>
    %cst_27 = arith.constant 0.000000e+00 : f32
    %44 = vector.broadcast %cst_27 : f32 to vector<4x512xf32>
    %45 = vector.extract_strided_slice %10 {offsets = [0, 0], sizes = [1, 16], strides = [1, 1]} : vector<16x16xf32> to vector<1x16xf32>
    %46 = vector.extract_strided_slice %21 {offsets = [0, 0], sizes = [1, 16], strides = [1, 1]} : vector<16x16xf32> to vector<1x16xf32>
    %47 = vector.extract_strided_slice %32 {offsets = [0, 0], sizes = [1, 16], strides = [1, 1]} : vector<16x16xf32> to vector<1x16xf32>
    %48 = vector.extract_strided_slice %43 {offsets = [0, 0], sizes = [1, 16], strides = [1, 1]} : vector<16x16xf32> to vector<1x16xf32>
    %49 = tpu.concatenate %45, %46, %47, %48 in 0 : vector<1x16xf32>, vector<1x16xf32>, vector<1x16xf32>, vector<1x16xf32> -> vector<4x16xf32>
    %50 = arith.truncf %49 : vector<4x16xf32> to vector<4x16xbf16>
    %c0_28 = arith.constant 0 : index
    %c0_29 = arith.constant 0 : index
    %c0_30 = arith.constant 0 : index
    %51 = vector.load %arg2[%c0_28, %c0_29, %c0_30] : memref<16x16x512xbf16, #tpu.memory_space<vmem>>, vector<1x16x512xbf16>
    %52 = vector.shape_cast %51 : vector<1x16x512xbf16> to vector<16x512xbf16>
    %cst_31 = arith.constant dense<0.000000e+00> : vector<4x512xf32>
    %53 = tpu.matmul %50, %52, %cst_31 {dimension_numbers = #tpu.dot_dimension_numbers<[1], [0], [0], [1], [0, 0, 1, 1], [], []>} : vector<4x16xbf16>, vector<16x512xbf16>, vector<4x512xf32> -> vector<4x512xf32>
    %54 = arith.addf %44, %53 : vector<4x512xf32>
    %55 = vector.extract_strided_slice %10 {offsets = [1, 0], sizes = [1, 16], strides = [1, 1]} : vector<16x16xf32> to vector<1x16xf32>
    %56 = vector.extract_strided_slice %21 {offsets = [1, 0], sizes = [1, 16], strides = [1, 1]} : vector<16x16xf32> to vector<1x16xf32>
    %57 = vector.extract_strided_slice %32 {offsets = [1, 0], sizes = [1, 16], strides = [1, 1]} : vector<16x16xf32> to vector<1x16xf32>
    %58 = vector.extract_strided_slice %43 {offsets = [1, 0], sizes = [1, 16], strides = [1, 1]} : vector<16x16xf32> to vector<1x16xf32>
    %59 = tpu.concatenate %55, %56, %57, %58 in 0 : vector<1x16xf32>, vector<1x16xf32>, vector<1x16xf32>, vector<1x16xf32> -> vector<4x16xf32>
    %60 = arith.truncf %59 : vector<4x16xf32> to vector<4x16xbf16>
    %c1_32 = arith.constant 1 : index
    %c0_33 = arith.constant 0 : index
    %c0_34 = arith.constant 0 : index
    %61 = vector.load %arg2[%c1_32, %c0_33, %c0_34] : memref<16x16x512xbf16, #tpu.memory_space<vmem>>, vector<1x16x512xbf16>
    %62 = vector.shape_cast %61 : vector<1x16x512xbf16> to vector<16x512xbf16>
    %cst_35 = arith.constant dense<0.000000e+00> : vector<4x512xf32>
    %63 = tpu.matmul %60, %62, %cst_35 {dimension_numbers = #tpu.dot_dimension_numbers<[1], [0], [0], [1], [0, 0, 1, 1], [], []>} : vector<4x16xbf16>, vector<16x512xbf16>, vector<4x512xf32> -> vector<4x512xf32>
    %64 = arith.addf %54, %63 : vector<4x512xf32>
    %65 = vector.extract_strided_slice %10 {offsets = [2, 0], sizes = [1, 16], strides = [1, 1]} : vector<16x16xf32> to vector<1x16xf32>
    %66 = vector.extract_strided_slice %21 {offsets = [2, 0], sizes = [1, 16], strides = [1, 1]} : vector<16x16xf32> to vector<1x16xf32>
    %67 = vector.extract_strided_slice %32 {offsets = [2, 0], sizes = [1, 16], strides = [1, 1]} : vector<16x16xf32> to vector<1x16xf32>
    %68 = vector.extract_strided_slice %43 {offsets = [2, 0], sizes = [1, 16], strides = [1, 1]} : vector<16x16xf32> to vector<1x16xf32>
    %69 = tpu.concatenate %65, %66, %67, %68 in 0 : vector<1x16xf32>, vector<1x16xf32>, vector<1x16xf32>, vector<1x16xf32> -> vector<4x16xf32>
    %70 = arith.truncf %69 : vector<4x16xf32> to vector<4x16xbf16>
    %c2_36 = arith.constant 2 : index
    %c0_37 = arith.constant 0 : index
    %c0_38 = arith.constant 0 : index
    %71 = vector.load %arg2[%c2_36, %c0_37, %c0_38] : memref<16x16x512xbf16, #tpu.memory_space<vmem>>, vector<1x16x512xbf16>
    %72 = vector.shape_cast %71 : vector<1x16x512xbf16> to vector<16x512xbf16>
    %cst_39 = arith.constant dense<0.000000e+00> : vector<4x512xf32>
    %73 = tpu.matmul %70, %72, %cst_39 {dimension_numbers = #tpu.dot_dimension_numbers<[1], [0], [0], [1], [0, 0, 1, 1], [], []>} : vector<4x16xbf16>, vector<16x512xbf16>, vector<4x512xf32> -> vector<4x512xf32>
    %74 = arith.addf %64, %73 : vector<4x512xf32>
    %75 = vector.extract_strided_slice %10 {offsets = [3, 0], sizes = [1, 16], strides = [1, 1]} : vector<16x16xf32> to vector<1x16xf32>
    %76 = vector.extract_strided_slice %21 {offsets = [3, 0], sizes = [1, 16], strides = [1, 1]} : vector<16x16xf32> to vector<1x16xf32>
    %77 = vector.extract_strided_slice %32 {offsets = [3, 0], sizes = [1, 16], strides = [1, 1]} : vector<16x16xf32> to vector<1x16xf32>
    %78 = vector.extract_strided_slice %43 {offsets = [3, 0], sizes = [1, 16], strides = [1, 1]} : vector<16x16xf32> to vector<1x16xf32>
    %79 = tpu.concatenate %75, %76, %77, %78 in 0 : vector<1x16xf32>, vector<1x16xf32>, vector<1x16xf32>, vector<1x16xf32> -> vector<4x16xf32>
    %80 = arith.truncf %79 : vector<4x16xf32> to vector<4x16xbf16>
    %c3_40 = arith.constant 3 : index
    %c0_41 = arith.constant 0 : index
    %c0_42 = arith.constant 0 : index
    %81 = vector.load %arg2[%c3_40, %c0_41, %c0_42] : memref<16x16x512xbf16, #tpu.memory_space<vmem>>, vector<1x16x512xbf16>
    %82 = vector.shape_cast %81 : vector<1x16x512xbf16> to vector<16x512xbf16>
    %cst_43 = arith.constant dense<0.000000e+00> : vector<4x512xf32>
    %83 = tpu.matmul %80, %82, %cst_43 {dimension_numbers = #tpu.dot_dimension_numbers<[1], [0], [0], [1], [0, 0, 1, 1], [], []>} : vector<4x16xbf16>, vector<16x512xbf16>, vector<4x512xf32> -> vector<4x512xf32>
    %84 = arith.addf %74, %83 : vector<4x512xf32>
    %85 = vector.extract_strided_slice %10 {offsets = [4, 0], sizes = [1, 16], strides = [1, 1]} : vector<16x16xf32> to vector<1x16xf32>
    %86 = vector.extract_strided_slice %21 {offsets = [4, 0], sizes = [1, 16], strides = [1, 1]} : vector<16x16xf32> to vector<1x16xf32>
    %87 = vector.extract_strided_slice %32 {offsets = [4, 0], sizes = [1, 16], strides = [1, 1]} : vector<16x16xf32> to vector<1x16xf32>
    %88 = vector.extract_strided_slice %43 {offsets = [4, 0], sizes = [1, 16], strides = [1, 1]} : vector<16x16xf32> to vector<1x16xf32>
    %89 = tpu.concatenate %85, %86, %87, %88 in 0 : vector<1x16xf32>, vector<1x16xf32>, vector<1x16xf32>, vector<1x16xf32> -> vector<4x16xf32>
    %90 = arith.truncf %89 : vector<4x16xf32> to vector<4x16xbf16>
    %c4 = arith.constant 4 : index
    %c0_44 = arith.constant 0 : index
    %c0_45 = arith.constant 0 : index
    %91 = vector.load %arg2[%c4, %c0_44, %c0_45] : memref<16x16x512xbf16, #tpu.memory_space<vmem>>, vector<1x16x512xbf16>
    %92 = vector.shape_cast %91 : vector<1x16x512xbf16> to vector<16x512xbf16>
    %cst_46 = arith.constant dense<0.000000e+00> : vector<4x512xf32>
    %93 = tpu.matmul %90, %92, %cst_46 {dimension_numbers = #tpu.dot_dimension_numbers<[1], [0], [0], [1], [0, 0, 1, 1], [], []>} : vector<4x16xbf16>, vector<16x512xbf16>, vector<4x512xf32> -> vector<4x512xf32>
    %94 = arith.addf %84, %93 : vector<4x512xf32>
    %95 = vector.extract_strided_slice %10 {offsets = [5, 0], sizes = [1, 16], strides = [1, 1]} : vector<16x16xf32> to vector<1x16xf32>
    %96 = vector.extract_strided_slice %21 {offsets = [5, 0], sizes = [1, 16], strides = [1, 1]} : vector<16x16xf32> to vector<1x16xf32>
    %97 = vector.extract_strided_slice %32 {offsets = [5, 0], sizes = [1, 16], strides = [1, 1]} : vector<16x16xf32> to vector<1x16xf32>
    %98 = vector.extract_strided_slice %43 {offsets = [5, 0], sizes = [1, 16], strides = [1, 1]} : vector<16x16xf32> to vector<1x16xf32>
    %99 = tpu.concatenate %95, %96, %97, %98 in 0 : vector<1x16xf32>, vector<1x16xf32>, vector<1x16xf32>, vector<1x16xf32> -> vector<4x16xf32>
    %100 = arith.truncf %99 : vector<4x16xf32> to vector<4x16xbf16>
    %c5 = arith.constant 5 : index
    %c0_47 = arith.constant 0 : index
    %c0_48 = arith.constant 0 : index
    %101 = vector.load %arg2[%c5, %c0_47, %c0_48] : memref<16x16x512xbf16, #tpu.memory_space<vmem>>, vector<1x16x512xbf16>
    %102 = vector.shape_cast %101 : vector<1x16x512xbf16> to vector<16x512xbf16>
    %cst_49 = arith.constant dense<0.000000e+00> : vector<4x512xf32>
    %103 = tpu.matmul %100, %102, %cst_49 {dimension_numbers = #tpu.dot_dimension_numbers<[1], [0], [0], [1], [0, 0, 1, 1], [], []>} : vector<4x16xbf16>, vector<16x512xbf16>, vector<4x512xf32> -> vector<4x512xf32>
    %104 = arith.addf %94, %103 : vector<4x512xf32>
    %105 = vector.extract_strided_slice %10 {offsets = [6, 0], sizes = [1, 16], strides = [1, 1]} : vector<16x16xf32> to vector<1x16xf32>
    %106 = vector.extract_strided_slice %21 {offsets = [6, 0], sizes = [1, 16], strides = [1, 1]} : vector<16x16xf32> to vector<1x16xf32>
    %107 = vector.extract_strided_slice %32 {offsets = [6, 0], sizes = [1, 16], strides = [1, 1]} : vector<16x16xf32> to vector<1x16xf32>
    %108 = vector.extract_strided_slice %43 {offsets = [6, 0], sizes = [1, 16], strides = [1, 1]} : vector<16x16xf32> to vector<1x16xf32>
    %109 = tpu.concatenate %105, %106, %107, %108 in 0 : vector<1x16xf32>, vector<1x16xf32>, vector<1x16xf32>, vector<1x16xf32> -> vector<4x16xf32>
    %110 = arith.truncf %109 : vector<4x16xf32> to vector<4x16xbf16>
    %c6 = arith.constant 6 : index
    %c0_50 = arith.constant 0 : index
    %c0_51 = arith.constant 0 : index
    %111 = vector.load %arg2[%c6, %c0_50, %c0_51] : memref<16x16x512xbf16, #tpu.memory_space<vmem>>, vector<1x16x512xbf16>
    %112 = vector.shape_cast %111 : vector<1x16x512xbf16> to vector<16x512xbf16>
    %cst_52 = arith.constant dense<0.000000e+00> : vector<4x512xf32>
    %113 = tpu.matmul %110, %112, %cst_52 {dimension_numbers = #tpu.dot_dimension_numbers<[1], [0], [0], [1], [0, 0, 1, 1], [], []>} : vector<4x16xbf16>, vector<16x512xbf16>, vector<4x512xf32> -> vector<4x512xf32>
    %114 = arith.addf %104, %113 : vector<4x512xf32>
    %115 = vector.extract_strided_slice %10 {offsets = [7, 0], sizes = [1, 16], strides = [1, 1]} : vector<16x16xf32> to vector<1x16xf32>
    %116 = vector.extract_strided_slice %21 {offsets = [7, 0], sizes = [1, 16], strides = [1, 1]} : vector<16x16xf32> to vector<1x16xf32>
    %117 = vector.extract_strided_slice %32 {offsets = [7, 0], sizes = [1, 16], strides = [1, 1]} : vector<16x16xf32> to vector<1x16xf32>
    %118 = vector.extract_strided_slice %43 {offsets = [7, 0], sizes = [1, 16], strides = [1, 1]} : vector<16x16xf32> to vector<1x16xf32>
    %119 = tpu.concatenate %115, %116, %117, %118 in 0 : vector<1x16xf32>, vector<1x16xf32>, vector<1x16xf32>, vector<1x16xf32> -> vector<4x16xf32>
    %120 = arith.truncf %119 : vector<4x16xf32> to vector<4x16xbf16>
    %c7 = arith.constant 7 : index
    %c0_53 = arith.constant 0 : index
    %c0_54 = arith.constant 0 : index
    %121 = vector.load %arg2[%c7, %c0_53, %c0_54] : memref<16x16x512xbf16, #tpu.memory_space<vmem>>, vector<1x16x512xbf16>
    %122 = vector.shape_cast %121 : vector<1x16x512xbf16> to vector<16x512xbf16>
    %cst_55 = arith.constant dense<0.000000e+00> : vector<4x512xf32>
    %123 = tpu.matmul %120, %122, %cst_55 {dimension_numbers = #tpu.dot_dimension_numbers<[1], [0], [0], [1], [0, 0, 1, 1], [], []>} : vector<4x16xbf16>, vector<16x512xbf16>, vector<4x512xf32> -> vector<4x512xf32>
    %124 = arith.addf %114, %123 : vector<4x512xf32>
    %125 = vector.extract_strided_slice %10 {offsets = [8, 0], sizes = [1, 16], strides = [1, 1]} : vector<16x16xf32> to vector<1x16xf32>
    %126 = vector.extract_strided_slice %21 {offsets = [8, 0], sizes = [1, 16], strides = [1, 1]} : vector<16x16xf32> to vector<1x16xf32>
    %127 = vector.extract_strided_slice %32 {offsets = [8, 0], sizes = [1, 16], strides = [1, 1]} : vector<16x16xf32> to vector<1x16xf32>
    %128 = vector.extract_strided_slice %43 {offsets = [8, 0], sizes = [1, 16], strides = [1, 1]} : vector<16x16xf32> to vector<1x16xf32>
    %129 = tpu.concatenate %125, %126, %127, %128 in 0 : vector<1x16xf32>, vector<1x16xf32>, vector<1x16xf32>, vector<1x16xf32> -> vector<4x16xf32>
    %130 = arith.truncf %129 : vector<4x16xf32> to vector<4x16xbf16>
    %c8 = arith.constant 8 : index
    %c0_56 = arith.constant 0 : index
    %c0_57 = arith.constant 0 : index
    %131 = vector.load %arg2[%c8, %c0_56, %c0_57] : memref<16x16x512xbf16, #tpu.memory_space<vmem>>, vector<1x16x512xbf16>
    %132 = vector.shape_cast %131 : vector<1x16x512xbf16> to vector<16x512xbf16>
    %cst_58 = arith.constant dense<0.000000e+00> : vector<4x512xf32>
    %133 = tpu.matmul %130, %132, %cst_58 {dimension_numbers = #tpu.dot_dimension_numbers<[1], [0], [0], [1], [0, 0, 1, 1], [], []>} : vector<4x16xbf16>, vector<16x512xbf16>, vector<4x512xf32> -> vector<4x512xf32>
    %134 = arith.addf %124, %133 : vector<4x512xf32>
    %135 = vector.extract_strided_slice %10 {offsets = [9, 0], sizes = [1, 16], strides = [1, 1]} : vector<16x16xf32> to vector<1x16xf32>
    %136 = vector.extract_strided_slice %21 {offsets = [9, 0], sizes = [1, 16], strides = [1, 1]} : vector<16x16xf32> to vector<1x16xf32>
    %137 = vector.extract_strided_slice %32 {offsets = [9, 0], sizes = [1, 16], strides = [1, 1]} : vector<16x16xf32> to vector<1x16xf32>
    %138 = vector.extract_strided_slice %43 {offsets = [9, 0], sizes = [1, 16], strides = [1, 1]} : vector<16x16xf32> to vector<1x16xf32>
    %139 = tpu.concatenate %135, %136, %137, %138 in 0 : vector<1x16xf32>, vector<1x16xf32>, vector<1x16xf32>, vector<1x16xf32> -> vector<4x16xf32>
    %140 = arith.truncf %139 : vector<4x16xf32> to vector<4x16xbf16>
    %c9 = arith.constant 9 : index
    %c0_59 = arith.constant 0 : index
    %c0_60 = arith.constant 0 : index
    %141 = vector.load %arg2[%c9, %c0_59, %c0_60] : memref<16x16x512xbf16, #tpu.memory_space<vmem>>, vector<1x16x512xbf16>
    %142 = vector.shape_cast %141 : vector<1x16x512xbf16> to vector<16x512xbf16>
    %cst_61 = arith.constant dense<0.000000e+00> : vector<4x512xf32>
    %143 = tpu.matmul %140, %142, %cst_61 {dimension_numbers = #tpu.dot_dimension_numbers<[1], [0], [0], [1], [0, 0, 1, 1], [], []>} : vector<4x16xbf16>, vector<16x512xbf16>, vector<4x512xf32> -> vector<4x512xf32>
    %144 = arith.addf %134, %143 : vector<4x512xf32>
    %145 = vector.extract_strided_slice %10 {offsets = [10, 0], sizes = [1, 16], strides = [1, 1]} : vector<16x16xf32> to vector<1x16xf32>
    %146 = vector.extract_strided_slice %21 {offsets = [10, 0], sizes = [1, 16], strides = [1, 1]} : vector<16x16xf32> to vector<1x16xf32>
    %147 = vector.extract_strided_slice %32 {offsets = [10, 0], sizes = [1, 16], strides = [1, 1]} : vector<16x16xf32> to vector<1x16xf32>
    %148 = vector.extract_strided_slice %43 {offsets = [10, 0], sizes = [1, 16], strides = [1, 1]} : vector<16x16xf32> to vector<1x16xf32>
    %149 = tpu.concatenate %145, %146, %147, %148 in 0 : vector<1x16xf32>, vector<1x16xf32>, vector<1x16xf32>, vector<1x16xf32> -> vector<4x16xf32>
    %150 = arith.truncf %149 : vector<4x16xf32> to vector<4x16xbf16>
    %c10 = arith.constant 10 : index
    %c0_62 = arith.constant 0 : index
    %c0_63 = arith.constant 0 : index
    %151 = vector.load %arg2[%c10, %c0_62, %c0_63] : memref<16x16x512xbf16, #tpu.memory_space<vmem>>, vector<1x16x512xbf16>
    %152 = vector.shape_cast %151 : vector<1x16x512xbf16> to vector<16x512xbf16>
    %cst_64 = arith.constant dense<0.000000e+00> : vector<4x512xf32>
    %153 = tpu.matmul %150, %152, %cst_64 {dimension_numbers = #tpu.dot_dimension_numbers<[1], [0], [0], [1], [0, 0, 1, 1], [], []>} : vector<4x16xbf16>, vector<16x512xbf16>, vector<4x512xf32> -> vector<4x512xf32>
    %154 = arith.addf %144, %153 : vector<4x512xf32>
    %155 = vector.extract_strided_slice %10 {offsets = [11, 0], sizes = [1, 16], strides = [1, 1]} : vector<16x16xf32> to vector<1x16xf32>
    %156 = vector.extract_strided_slice %21 {offsets = [11, 0], sizes = [1, 16], strides = [1, 1]} : vector<16x16xf32> to vector<1x16xf32>
    %157 = vector.extract_strided_slice %32 {offsets = [11, 0], sizes = [1, 16], strides = [1, 1]} : vector<16x16xf32> to vector<1x16xf32>
    %158 = vector.extract_strided_slice %43 {offsets = [11, 0], sizes = [1, 16], strides = [1, 1]} : vector<16x16xf32> to vector<1x16xf32>
    %159 = tpu.concatenate %155, %156, %157, %158 in 0 : vector<1x16xf32>, vector<1x16xf32>, vector<1x16xf32>, vector<1x16xf32> -> vector<4x16xf32>
    %160 = arith.truncf %159 : vector<4x16xf32> to vector<4x16xbf16>
    %c11 = arith.constant 11 : index
    %c0_65 = arith.constant 0 : index
    %c0_66 = arith.constant 0 : index
    %161 = vector.load %arg2[%c11, %c0_65, %c0_66] : memref<16x16x512xbf16, #tpu.memory_space<vmem>>, vector<1x16x512xbf16>
    %162 = vector.shape_cast %161 : vector<1x16x512xbf16> to vector<16x512xbf16>
    %cst_67 = arith.constant dense<0.000000e+00> : vector<4x512xf32>
    %163 = tpu.matmul %160, %162, %cst_67 {dimension_numbers = #tpu.dot_dimension_numbers<[1], [0], [0], [1], [0, 0, 1, 1], [], []>} : vector<4x16xbf16>, vector<16x512xbf16>, vector<4x512xf32> -> vector<4x512xf32>
    %164 = arith.addf %154, %163 : vector<4x512xf32>
    %165 = vector.extract_strided_slice %10 {offsets = [12, 0], sizes = [1, 16], strides = [1, 1]} : vector<16x16xf32> to vector<1x16xf32>
    %166 = vector.extract_strided_slice %21 {offsets = [12, 0], sizes = [1, 16], strides = [1, 1]} : vector<16x16xf32> to vector<1x16xf32>
    %167 = vector.extract_strided_slice %32 {offsets = [12, 0], sizes = [1, 16], strides = [1, 1]} : vector<16x16xf32> to vector<1x16xf32>
    %168 = vector.extract_strided_slice %43 {offsets = [12, 0], sizes = [1, 16], strides = [1, 1]} : vector<16x16xf32> to vector<1x16xf32>
    %169 = tpu.concatenate %165, %166, %167, %168 in 0 : vector<1x16xf32>, vector<1x16xf32>, vector<1x16xf32>, vector<1x16xf32> -> vector<4x16xf32>
    %170 = arith.truncf %169 : vector<4x16xf32> to vector<4x16xbf16>
    %c12 = arith.constant 12 : index
    %c0_68 = arith.constant 0 : index
    %c0_69 = arith.constant 0 : index
    %171 = vector.load %arg2[%c12, %c0_68, %c0_69] : memref<16x16x512xbf16, #tpu.memory_space<vmem>>, vector<1x16x512xbf16>
    %172 = vector.shape_cast %171 : vector<1x16x512xbf16> to vector<16x512xbf16>
    %cst_70 = arith.constant dense<0.000000e+00> : vector<4x512xf32>
    %173 = tpu.matmul %170, %172, %cst_70 {dimension_numbers = #tpu.dot_dimension_numbers<[1], [0], [0], [1], [0, 0, 1, 1], [], []>} : vector<4x16xbf16>, vector<16x512xbf16>, vector<4x512xf32> -> vector<4x512xf32>
    %174 = arith.addf %164, %173 : vector<4x512xf32>
    %175 = vector.extract_strided_slice %10 {offsets = [13, 0], sizes = [1, 16], strides = [1, 1]} : vector<16x16xf32> to vector<1x16xf32>
    %176 = vector.extract_strided_slice %21 {offsets = [13, 0], sizes = [1, 16], strides = [1, 1]} : vector<16x16xf32> to vector<1x16xf32>
    %177 = vector.extract_strided_slice %32 {offsets = [13, 0], sizes = [1, 16], strides = [1, 1]} : vector<16x16xf32> to vector<1x16xf32>
    %178 = vector.extract_strided_slice %43 {offsets = [13, 0], sizes = [1, 16], strides = [1, 1]} : vector<16x16xf32> to vector<1x16xf32>
    %179 = tpu.concatenate %175, %176, %177, %178 in 0 : vector<1x16xf32>, vector<1x16xf32>, vector<1x16xf32>, vector<1x16xf32> -> vector<4x16xf32>
    %180 = arith.truncf %179 : vector<4x16xf32> to vector<4x16xbf16>
    %c13 = arith.constant 13 : index
    %c0_71 = arith.constant 0 : index
    %c0_72 = arith.constant 0 : index
    %181 = vector.load %arg2[%c13, %c0_71, %c0_72] : memref<16x16x512xbf16, #tpu.memory_space<vmem>>, vector<1x16x512xbf16>
    %182 = vector.shape_cast %181 : vector<1x16x512xbf16> to vector<16x512xbf16>
    %cst_73 = arith.constant dense<0.000000e+00> : vector<4x512xf32>
    %183 = tpu.matmul %180, %182, %cst_73 {dimension_numbers = #tpu.dot_dimension_numbers<[1], [0], [0], [1], [0, 0, 1, 1], [], []>} : vector<4x16xbf16>, vector<16x512xbf16>, vector<4x512xf32> -> vector<4x512xf32>
    %184 = arith.addf %174, %183 : vector<4x512xf32>
    %185 = vector.extract_strided_slice %10 {offsets = [14, 0], sizes = [1, 16], strides = [1, 1]} : vector<16x16xf32> to vector<1x16xf32>
    %186 = vector.extract_strided_slice %21 {offsets = [14, 0], sizes = [1, 16], strides = [1, 1]} : vector<16x16xf32> to vector<1x16xf32>
    %187 = vector.extract_strided_slice %32 {offsets = [14, 0], sizes = [1, 16], strides = [1, 1]} : vector<16x16xf32> to vector<1x16xf32>
    %188 = vector.extract_strided_slice %43 {offsets = [14, 0], sizes = [1, 16], strides = [1, 1]} : vector<16x16xf32> to vector<1x16xf32>
    %189 = tpu.concatenate %185, %186, %187, %188 in 0 : vector<1x16xf32>, vector<1x16xf32>, vector<1x16xf32>, vector<1x16xf32> -> vector<4x16xf32>
    %190 = arith.truncf %189 : vector<4x16xf32> to vector<4x16xbf16>
    %c14 = arith.constant 14 : index
    %c0_74 = arith.constant 0 : index
    %c0_75 = arith.constant 0 : index
    %191 = vector.load %arg2[%c14, %c0_74, %c0_75] : memref<16x16x512xbf16, #tpu.memory_space<vmem>>, vector<1x16x512xbf16>
    %192 = vector.shape_cast %191 : vector<1x16x512xbf16> to vector<16x512xbf16>
    %cst_76 = arith.constant dense<0.000000e+00> : vector<4x512xf32>
    %193 = tpu.matmul %190, %192, %cst_76 {dimension_numbers = #tpu.dot_dimension_numbers<[1], [0], [0], [1], [0, 0, 1, 1], [], []>} : vector<4x16xbf16>, vector<16x512xbf16>, vector<4x512xf32> -> vector<4x512xf32>
    %194 = arith.addf %184, %193 : vector<4x512xf32>
    %195 = vector.extract_strided_slice %10 {offsets = [15, 0], sizes = [1, 16], strides = [1, 1]} : vector<16x16xf32> to vector<1x16xf32>
    %196 = vector.extract_strided_slice %21 {offsets = [15, 0], sizes = [1, 16], strides = [1, 1]} : vector<16x16xf32> to vector<1x16xf32>
    %197 = vector.extract_strided_slice %32 {offsets = [15, 0], sizes = [1, 16], strides = [1, 1]} : vector<16x16xf32> to vector<1x16xf32>
    %198 = vector.extract_strided_slice %43 {offsets = [15, 0], sizes = [1, 16], strides = [1, 1]} : vector<16x16xf32> to vector<1x16xf32>
    %199 = tpu.concatenate %195, %196, %197, %198 in 0 : vector<1x16xf32>, vector<1x16xf32>, vector<1x16xf32>, vector<1x16xf32> -> vector<4x16xf32>
    %200 = arith.truncf %199 : vector<4x16xf32> to vector<4x16xbf16>
    %c15 = arith.constant 15 : index
    %c0_77 = arith.constant 0 : index
    %c0_78 = arith.constant 0 : index
    %201 = vector.load %arg2[%c15, %c0_77, %c0_78] : memref<16x16x512xbf16, #tpu.memory_space<vmem>>, vector<1x16x512xbf16>
    %202 = vector.shape_cast %201 : vector<1x16x512xbf16> to vector<16x512xbf16>
    %cst_79 = arith.constant dense<0.000000e+00> : vector<4x512xf32>
    %203 = tpu.matmul %200, %202, %cst_79 {dimension_numbers = #tpu.dot_dimension_numbers<[1], [0], [0], [1], [0, 0, 1, 1], [], []>} : vector<4x16xbf16>, vector<16x512xbf16>, vector<4x512xf32> -> vector<4x512xf32>
    %204 = arith.addf %194, %203 : vector<4x512xf32>
    %c0_80 = arith.constant 0 : index
    %c0_81 = arith.constant 0 : index
    %205 = vector.load %arg7[%c0_80, %c0_81] : memref<1x1152xf32, #tpu.memory_space<vmem>>, vector<1x512xf32>
    %206 = vector.broadcast %205 : vector<1x512xf32> to vector<4x512xf32>
    %207 = arith.addf %204, %206 : vector<4x512xf32>
    %cst_82 = arith.constant 0.000000e+00 : f32
    %208 = vector.broadcast %cst_82 : f32 to vector<4x512xf32>
    %209 = arith.maximumf %207, %208 : vector<4x512xf32>
    %c0_83 = arith.constant 0 : index
    %c512 = arith.constant 512 : index
    %210 = vector.load %arg7[%c0_83, %c512] : memref<1x1152xf32, #tpu.memory_space<vmem>>, vector<1x256xf32>
    %211 = arith.truncf %209 : vector<4x512xf32> to vector<4x512xbf16>
    %c0_84 = arith.constant 0 : index
    %c0_85 = arith.constant 0 : index
    %212 = vector.load %arg3[%c0_84, %c0_85] : memref<512x256xbf16, #tpu.memory_space<vmem>>, vector<512x256xbf16>
    %cst_86 = arith.constant dense<0.000000e+00> : vector<4x256xf32>
    %213 = tpu.matmul %211, %212, %cst_86 {dimension_numbers = #tpu.dot_dimension_numbers<[1], [0], [0], [1], [0, 0, 1, 1], [], []>} : vector<4x512xbf16>, vector<512x256xbf16>, vector<4x256xf32> -> vector<4x256xf32>
    %214 = vector.broadcast %210 : vector<1x256xf32> to vector<4x256xf32>
    %215 = arith.addf %213, %214 : vector<4x256xf32>
    %cst_87 = arith.constant 0.000000e+00 : f32
    %216 = vector.broadcast %cst_87 : f32 to vector<4x256xf32>
    %217 = arith.maximumf %215, %216 : vector<4x256xf32>
    %c0_88 = arith.constant 0 : index
    %c768 = arith.constant 768 : index
    %218 = vector.load %arg7[%c0_88, %c768] : memref<1x1152xf32, #tpu.memory_space<vmem>>, vector<1x128xf32>
    %219 = arith.truncf %217 : vector<4x256xf32> to vector<4x256xbf16>
    %c0_89 = arith.constant 0 : index
    %c0_90 = arith.constant 0 : index
    %220 = vector.load %arg4[%c0_89, %c0_90] : memref<256x128xbf16, #tpu.memory_space<vmem>>, vector<256x128xbf16>
    %cst_91 = arith.constant dense<0.000000e+00> : vector<4x128xf32>
    %221 = tpu.matmul %219, %220, %cst_91 {dimension_numbers = #tpu.dot_dimension_numbers<[1], [0], [0], [1], [0, 0, 1, 1], [], []>} : vector<4x256xbf16>, vector<256x128xbf16>, vector<4x128xf32> -> vector<4x128xf32>
    %222 = vector.broadcast %218 : vector<1x128xf32> to vector<4x128xf32>
    %223 = arith.addf %221, %222 : vector<4x128xf32>
    %cst_92 = arith.constant 0.000000e+00 : f32
    %224 = vector.broadcast %cst_92 : f32 to vector<4x128xf32>
    %225 = arith.maximumf %223, %224 : vector<4x128xf32>
    %c0_93 = arith.constant 0 : index
    %c896 = arith.constant 896 : index
    %226 = vector.load %arg7[%c0_93, %c896] : memref<1x1152xf32, #tpu.memory_space<vmem>>, vector<1x64xf32>
    %227 = arith.truncf %225 : vector<4x128xf32> to vector<4x128xbf16>
    %c0_94 = arith.constant 0 : index
    %c0_95 = arith.constant 0 : index
    %228 = vector.load %arg5[%c0_94, %c0_95] : memref<128x64xbf16, #tpu.memory_space<vmem>>, vector<128x64xbf16>
    %cst_96 = arith.constant dense<0.000000e+00> : vector<4x64xf32>
    %229 = tpu.matmul %227, %228, %cst_96 {dimension_numbers = #tpu.dot_dimension_numbers<[1], [0], [0], [1], [0, 0, 1, 1], [], []>} : vector<4x128xbf16>, vector<128x64xbf16>, vector<4x64xf32> -> vector<4x64xf32>
    %230 = vector.broadcast %226 : vector<1x64xf32> to vector<4x64xf32>
    %231 = arith.addf %229, %230 : vector<4x64xf32>
    %cst_97 = arith.constant 0.000000e+00 : f32
    %232 = vector.broadcast %cst_97 : f32 to vector<4x64xf32>
    %233 = arith.maximumf %231, %232 : vector<4x64xf32>
    %c0_98 = arith.constant 0 : index
    %c1024 = arith.constant 1024 : index
    %234 = vector.load %arg7[%c0_98, %c1024] : memref<1x1152xf32, #tpu.memory_space<vmem>>, vector<1x128xf32>
    %235 = arith.truncf %233 : vector<4x64xf32> to vector<4x64xbf16>
    %c0_99 = arith.constant 0 : index
    %c0_100 = arith.constant 0 : index
    %236 = vector.load %arg6[%c0_99, %c0_100] : memref<64x128xbf16, #tpu.memory_space<vmem>>, vector<64x128xbf16>
    %cst_101 = arith.constant dense<0.000000e+00> : vector<4x128xf32>
    %237 = tpu.matmul %235, %236, %cst_101 {dimension_numbers = #tpu.dot_dimension_numbers<[1], [0], [0], [1], [0, 0, 1, 1], [], []>} : vector<4x64xbf16>, vector<64x128xbf16>, vector<4x128xf32> -> vector<4x128xf32>
    %238 = vector.broadcast %234 : vector<1x128xf32> to vector<4x128xf32>
    %239 = arith.addf %237, %238 : vector<4x128xf32>
    %c0_102 = arith.constant 0 : index
    %c0_103 = arith.constant 0 : index
    %240 = vector.load %arg8[%c0_102, %c0_103] : memref<4x128xf32, #tpu.memory_space<vmem>>, vector<4x128xf32>
    tpu.vector_store %arg8[%c0_102, %c0_103], %239 {strides = array<i32>} : memref<4x128xf32, #tpu.memory_space<vmem>>, vector<4x128xf32>,
    return
  }
}

</mosaic_0001>

<bundles_post_ra>
// kernel: custom-call.2
= control target key start
LH: loop header
LB: loop body
LE: loop exit
PB: predicated region body
PF: predicated region fallthrough
CT: control target
= control target key end

     0   :  { %s1672_s30 = smov 0   ;;  %s1674_s10 = smov 0   ;;  %s1981_s0 = inlined_call_operand.vmem [shape: f32[4,8,8], index: 0, kind: input, shape index: {}]   ;;  %s1982_s1 = inlined_call_operand.vmem [shape: f32[4,8,8], index: 1, kind: input, shape index: {}]   ;;  %s1983_s2 = inlined_call_operand.vmem [shape: f32[4,8,8], index: 2, kind: input, shape index: {}]   ;;  %s1984_s3 = inlined_call_operand.vmem [shape: f32[4,8,8], index: 3, kind: input, shape index: {}]   ;;  %s1985_s4 = inlined_call_operand.vmem [shape: f32[4,8], index: 4, kind: output, shape index: {0}]   ;;  %s1986_s5 = inlined_call_operand.vmem [shape: f32[4,8], index: 5, kind: output, shape index: {1}]   ;;  %s1987_s6 = inlined_call_operand.vmem [shape: f32[4,8,8], index: 6, kind: output, shape index: {2}]   ;;  %s1988_s7 = inlined_call_operand.vmem [shape: f32[4,8,8], index: 7, kind: output, shape index: {3}]   ;;  %s1989_s8 = inlined_call_operand.vmem [shape: f32[4,8,8], index: 8, kind: output, shape index: {4}]   ;;  %s1990_s9 = inlined_call_operand.vmem [shape: f32[4,8,8], index: 9, kind: output, shape index: {5}]  }
   0x1   :  { %s1676_s11 = smov 0  }
   0x2 LB: > { %s1688_s12 = sadd.s32 4294967295, %s1609_s11   ;;  %s1691_s13 = sadd.s32 1, %s1609_s11   ;;  %s1609_s11 = sphi %s1676_s11, %s1999_s11   ;;  %s1605_s10 = sphi %s1674_s10, %s1998_s10   ;;  %s1601_s30 = sphi %s1672_s30, %s1997_s30  }
   0x3   : > { %s20_s14 = sshrl.u32 %s1609_s11, 3  ;;  %s21_s15 = sshrl.u32 %s1691_s13, 3 }
   0x4   : > { %s22_s16 = ssub.s32 %s20_s14, %s21_s15  ;;  %s25_s17 = sadd.s32 1, %s1605_s10 }
   0x5   : > { %p23_p0 = scmp.eq.s32.totalorder %s22_s16, 0  ;;  %p35_p1 = scmp.ne.s32.totalorder %s1605_s10, %s1601_s30 }
   0x6   : > { %p36_p2 = scmp.eq.s32.totalorder %s1688_s12, 3  ;;  %p1470_p4 = scmp.ge.s32.totalorder %s1609_s11, 4 }
   0x7   : > { %s1700_s18 = scalar_select %p23_p0, %s1605_s10, %s25_s17  }
   0x8   : > { %p1702_p3 = por %p36_p2, %p35_p1  ;;  %86 = sbr.rel (%p1470_p4) target bundleno = 17 (0x11), region = 16 }
   0x9   : > { %1991 = sst [smem:[#allocation25_spill]] %s1700_s18  ;;  %s88_s20 = sand.u32 (!%p1470_p4), 1, %s1609_s11  }
   0xa   : > { %s1472_s21 = sshll.u32 (!%p1470_p4), %s1609_s11, 3  ;;  %s1471_s22 = sshll.u32 (!%p1470_p4), %s88_s20, 3 }
   0xb   : > { %s92_s25 = scalar_lea.vmem (!%p1470_p4), %s1981_s0, %s1472_s21  ;;  %s90_s26 = scalar_lea.vmem (!%p1470_p4), [#allocation0], %s1471_s22 }
   0xc   : > { %v120_v0 = vld [vmem:[%s92_s25] sm:$0xff] (!%p1470_p4)  ;;  %s130_s29 = scalar_lea.vmem (!%p1470_p4), %s1982_s1, %s1472_s21  ;;  %s168_s16 = scalar_lea.vmem (!%p1470_p4), %s1983_s2, %s1472_s21 }
   0xd   : > { %121 = vst [vmem:[%s90_s26] sm:$0xff] (!%p1470_p4), %v120_v0  ;;  %v158_v1 = vld [vmem:[%s130_s29] sm:$0xff] (!%p1470_p4)  ;;  %s128_s17 = scalar_lea.vmem (!%p1470_p4), [#allocation1], %s1471_s22  ;;  %s206_s23 = scalar_lea.vmem (!%p1470_p4), %s1984_s3, %s1472_s21 }
   0xe   : > { %159 = vst [vmem:[%s128_s17] sm:$0xff] (!%p1470_p4), %v158_v1  ;;  %v196_v2 = vld [vmem:[%s168_s16] sm:$0xff] (!%p1470_p4)  ;;  %s166_s24 = scalar_lea.vmem (!%p1470_p4), [#allocation2], %s1471_s22  ;;  %s204_s25 = scalar_lea.vmem (!%p1470_p4), [#allocation3], %s1471_s22 }
   0xf   : > { %197 = vst [vmem:[%s166_s24] sm:$0xff] %v196_v2  ;;  %v234_v3 = vld [vmem:[%s206_s23] sm:$0xff] }
  0x10   : > { %235 = vst [vmem:[%s204_s25] sm:$0xff] %v234_v3 }
  0x11 PF: > { %p1479_p5 = scmp.ge.s32.totalorder %s1609_s11, 1  ;;  %p240_p6 = scmp.lt.s32.totalorder %s1609_s11, 5 }
  0x13   : > { %p241_p7 = pnand %p1479_p5, %p240_p6 }
  0x15   : > { %244 = sbr.rel (%p241_p7) target bundleno = 992 (0x3e0), region = 156 }
  0x1c   : > { %s247_s26 = sand.u32 1, %s1688_s12   ;;  %s281_s27 = sand.u32 1, %s1601_s30   ;;  %v325_v4 = vlaneseq  ;;  %v1619_v11 = vmov 0.0  }
  0x1d   : > { %s1480_s28 = sshll.u32 %s247_s26, 3  ;;  %s1725_s18 = sshll.u32 %s281_s27, 2 }
  0x1e   : > { %v1727_v5 = vand.u32 127, %v325_v4  ;;  %v1729_v6 = vshrl.u32 %v325_v4, 7  ;;  %s249_s21 = scalar_lea.vmem [#allocation0], %s1480_s28  ;;  %s253_s22 = scalar_lea.vmem [#allocation1], %s1480_s28 }
  0x1f   : > { %v309_v7 = vld [vmem:[%s249_s21] sm:$0xff]  ;;  %v312_v8 = vld [vmem:[%s253_s22] sm:$0xff]  ;;  %s257_s29 = scalar_lea.vmem [#allocation2], %s1480_s28  ;;  %s261_s11 = scalar_lea.vmem [#allocation3], %s1480_s28 }
  0x20   : > { %v315_v9 = vld [vmem:[%s257_s29] sm:$0xff]  ;;  %v318_v10 = vld [vmem:[%s261_s11] sm:$0xff]  ;;  %s1731_s14 = scalar_lea.vmem [#allocation8], %s1480_s28  ;;  %s1734_s30 = scalar_lea.vmem [#allocation9], %s1480_s28  ;;  %v327_v5 = vmov %v1727_v5  ;;  %v330_v6 = vmov %v1729_v6  ;;  %vm1359_vm2 = vcmp.lt.s32.totalorder %v1727_v5, 8 }
  0x21   : > { %320 = vst [vmem:[%s1731_s14] sm:$0xff] %v1619_v11  ;;  %321 = vst [vmem:[%s1734_s30] sm:$0xff] %v1619_v11  ;;  %s308_s15 = smov [#allocation12]  ;;  %s311_s16 = smov [#allocation13]  ;;  %v340_v5 = vmov %v1727_v5  ;;  %v343_v6 = vmov %v1729_v6  ;;  %vm334_vm0 = vcmp.eq.s32.totalorder %v330_v6, %v327_v5 }
  0x22   : > { %s1737_s17 = scalar_lea.vmem [#allocation10], %s1480_s28  ;;  %s1740_s20 = scalar_lea.vmem [#allocation11], %s1480_s28  ;;  %310 = vst [vmem:[%s308_s15] sm:$0xff] %v309_v7  ;;  %313 = vst [vmem:[%s311_s16] sm:$0xff] %v312_v8  ;;  %vm347_vm1 = vcmp.eq.s32.totalorder %v343_v6, %v340_v5  ;;  %v1351_v5 = vmov %v1727_v5  ;;  %v1354_v6 = vmov %v1729_v6 }
  0x23   : > { %322 = vst [vmem:[%s1737_s17] sm:$0xff] %v1619_v11  ;;  %323 = vst [vmem:[%s1740_s20] sm:$0xff] %v1619_v11  ;;  %s314_s23 = smov [#allocation14]  ;;  %s317_s24 = smov [#allocation15]  ;;  %vm1364_vm3 = vcmp.eq.s32.totalorder %v1354_v6, %v1351_v5  ;;  %v1402_v5 = vmov %v1727_v5  ;;  %v1371_v6 = vmov %v1729_v6 }
  0x24   : > { %316 = vst [vmem:[%s314_s23] sm:$0xff] %v315_v9  ;;  %319 = vst [vmem:[%s317_s24] sm:$0xff] %v318_v10  ;;  %s324_s14 = smov %s1731_s14  ;;  %s337_s20 = smov %s1740_s20  ;;  %v1368_v5 = vmov %v1727_v5  ;;  %v1405_v6 = vmov %v1729_v6 }
  0x25   : > { %s283_s25 = scalar_lea.vmem [#allocation5], %s1725_s18  ;;  %s1355_s27 = smov [#allocation12]  ;;  %v1385_v5 = vmov %v1727_v5  ;;  %v1388_v6 = vmov %v1729_v6  ;;  %vm1415_vm4 = vcmp.eq.s32.totalorder %v1405_v6, %v1402_v5 }
  0x26   : > { %s1372_s28 = smov [#allocation13]  ;;  %s1389_s21 = smov [#allocation14] }
  0x27   : > { %s1406_s22 = smov [#allocation15] }
  0x28   : > { %v331_v12 = vld [vmem:[%s324_s14] sm:$0xff] }
  0x29   : > { %v335_v13 = vsel %vm334_vm0, 1.0, %v331_v12  ;;  %v1361_v16 = vld [vmem:[%s1355_s27] sm:$0xff] }
  0x2a   : > { %v344_v14 = vld [vmem:[%s337_s20] sm:$0xff]  ;;  %336 = vst [vmem:[%s324_s14] sm:$0xff] %v335_v13  ;;  %v1362_v18 = vsel %vm1359_vm2, %v1361_v16, 0.0 }
  0x2b   : > { %v348_v15 = vsel %vm347_vm1, 1.0, %v344_v14  ;;  %v1378_v17 = vld [vmem:[%s1372_s28] sm:$0xff]  ;;  %v1363_v22 = vmul.f32 %v1362_v18, %v1362_v18 }
  0x2c   : > { %349 = vst [vmem:[%s337_s20] sm:$0xff] %v348_v15  ;;  %v1379_v19 = vsel %vm1359_vm2, %v1378_v17, 0.0  ;;  %v1395_v20 = vld [vmem:[%s1389_s21] sm:$0xff] }
  0x2d   : > { %v1412_v21 = vld [vmem:[%s1406_s22] sm:$0xff]  ;;  %v1380_v23 = vmul.f32 %v1379_v19, %v1379_v19  ;;  %v1396_v24 = vsel %vm1359_vm2, %v1395_v20, 0.0  ;;  %v1365_v29 = vsel %vm1364_vm3, 0.0, %v1363_v22 }
  0x2e   : > { %v1413_v25 = vsel %vm1359_vm2, %v1412_v21, 0.0  ;;  %v1397_v26 = vmul.f32 %v1396_v24, %v1396_v24 }
  0x2f   : > { %v1382_v27 = vadd.f32 %v1380_v23, %v1363_v22  ;;  %v1414_v28 = vmul.f32 %v1413_v25, %v1413_v25  ;;  %v1381_v30 = vadd.f32 %v1380_v23, %v1365_v29 }
  0x31   : > { %v1399_v31 = vadd.f32 %v1397_v26, %v1382_v27  ;;  %v1398_v32 = vadd.f32 %v1397_v26, %v1381_v30  ;;  %v1416_v33 = vsel %vm1415_vm4, 0.0, %v1414_v28 }
  0x33   : > { %v1418_v34 = vadd.f32 %v1414_v28, %v1399_v31  ;;  %v1417_v35 = vadd.f32 %v1416_v33, %v1398_v32 }
  0x35   : > { %1419 = vadd.xlane.f32.xlu0 %v1418_v34 }
  0x39   : > { %1427 = vadd.xlane.f32.xlu0 %v1417_v35 }
  0xc2   : > { %v1420_v36 = vpop.xlane.xlu0 %1419 }
  0xc3   : > { %v1421_v37 = vrot.slane %v1420_v36, 4 }
  0xc5   : > { %v1422_v38 = vadd.f32 %v1421_v37, %v1420_v36 }
  0xc6   : > { %v1428_v39 = vpop.xlane.xlu0 %1427 }
  0xc7   : > { %v1423_v40 = vrot.slane %v1422_v38, 2  ;;  %v1429_v41 = vrot.slane %v1428_v39, 4 }
  0xc9   : > { %v1430_v42 = vadd.f32 %v1429_v41, %v1428_v39  ;;  %v1424_v43 = vadd.f32 %v1423_v40, %v1422_v38 }
  0xcb   : > { %v1431_v44 = vrot.slane %v1430_v42, 2  ;;  %v1425_v46 = vrot.slane %v1424_v43, 1 }
  0xcd   : > { %v1432_v45 = vadd.f32 %v1431_v44, %v1430_v42  ;;  %v1426_v49 = vadd.f32 %v1425_v46, %v1424_v43 }
  0xcf   : > { %v1433_v47 = vrot.slane %v1432_v45, 1 }
  0xd1   : > { %v1434_v48 = vadd.f32 %v1433_v47, %v1432_v45 }
  0xd3   : > { %1520 = vpush %v1434_v48 }
  0xd4   : > { %1522 = vpush %v1426_v49 }
 0x104   : > { %s1521_s29 = spop %1520 }
 0x105   : > { %s1523_s11 = spop %1522 }
 0x106   : > { %s1437_s15 = smul.f32 1e-10, %s1523_s11 }
 0x108   : > { %p1438_p8 = scmp.le.f32.partialorder %s1521_s29, %s1437_s15 }
 0x109   : > { %s1769_s16 = smov (!%p1438_p8), 0  }
 0x10a   : > { %1441 = sbr.rel (%p1438_p8) target bundleno = 948 (0x3b4), region = 499 }
 0x111 LB: >> { %s1774_s23 = smov 0   ;;  %s1613_s16 = sphi %s1769_s16, %s1993_s16  }
 0x112 LB: >>> { %s454_s24 = smov [#allocation12]  ;;  %v458_v5 = vmov %v1727_v5  ;;  %v461_v6 = vmov %v1729_v6  ;;  %s474_s27 = smov [#allocation13]  ;;  %vm777_vm14 = vcmp.eq.s32.totalorder %v1729_v6, 0  ;;  %vm789_vm15 = vcmp.eq.s32.totalorder %v1729_v6, 7  ;;  %s1617_s23 = sphi %s1774_s23, %s453_s23  }
 0x113   : >>> { %v478_v5 = vmov %v1727_v5  ;;  %v481_v6 = vmov %v1729_v6  ;;  %v462_v50 = vld [vmem:[%s454_s24] sm:$0xff]  ;;  %vm465_vm5 = vcmp.eq.s32.totalorder %v461_v6, %v458_v5  ;;  %s494_s28 = smov [#allocation15]  ;;  %s455_s21 = smov [#allocation16] }
 0x114   : >>> { %vm485_vm6 = vcmp.eq.s32.totalorder %v481_v6, %v478_v5  ;;  %v498_v5 = vmov %v1727_v5  ;;  %v501_v6 = vmov %v1729_v6  ;;  %v466_v51 = vsel %vm465_vm5, %v462_v50, 0.0  ;;  %v482_v52 = vld [vmem:[%s474_s27] sm:$0xff]  ;;  %s475_s22 = smov [#allocation17]  ;;  %s495_s29 = smov [#allocation18] }
 0x115   : >>> { %vm505_vm7 = vcmp.eq.s32.totalorder %v501_v6, %v498_v5  ;;  %v467_v53 = vrot.slane %v466_v51, 4  ;;  %v486_v54 = vsel %vm485_vm6, %v482_v52, 0.0  ;;  %v502_v55 = vld [vmem:[%s494_s28] sm:$0xff]  ;;  %s518_s11 = smov [#allocation17]  ;;  %s516_s15 = smov [#allocation16]  ;;  %v567_v5 = vmov %v1727_v5 }
 0x116   : >>> { %v487_v56 = vrot.slane %v486_v54, 4  ;;  %v506_v57 = vsel %vm505_vm7, %v502_v55, 0.0  ;;  %s520_s24 = smov [#allocation18]  ;;  %s555_s27 = smov [#allocation19]  ;;  %v570_v6 = vmov %v1729_v6  ;;  %v582_v5 = vmov %v1727_v5 }
 0x117   : >>> { %v468_v58 = vadd.f32 %v467_v53, %v466_v51  ;;  %v507_v59 = vrot.slane %v506_v57, 4  ;;  %s557_s28 = smov [#allocation20]  ;;  %v585_v6 = vmov %v1729_v6  ;;  %vm572_vm12 = vcmp.eq.s32.totalorder %v570_v6, %v567_v5  ;;  %s1796_s14 = smov %s1731_s14 }
 0x118   : >>> { %v488_v60 = vadd.f32 %v487_v56, %v486_v54  ;;  %vm587_vm13 = vcmp.eq.s32.totalorder %v585_v6, %v582_v5  ;;  %s1799_s30 = smov %s1734_s30  ;;  %s1802_s17 = smov %s1737_s17  ;;  %v825_v52 = vld [vmem:[%s1796_s14] sm:$0xff]  ;;  %v680_v5 = vmov %v1727_v5  ;;  %v683_v6 = vmov %v1729_v6 }
 0x119   : >>> { %v469_v61 = vrot.slane %v468_v58, 2  ;;  %v508_v62 = vadd.f32 %v507_v59, %v506_v57  ;;  %s1806_s20 = smov %s1740_s20  ;;  %v826_v53 = vld [vmem:[%s1799_s30] sm:$0xff]  ;;  %s819_s26 = smov [#allocation24]  ;;  %v653_v5 = vmov %v1727_v5  ;;  %v656_v6 = vmov %v1729_v6 }
 0x11a   : >>> { %v489_v63 = vrot.slane %v488_v60, 2  ;;  %v827_v56 = vld [vmem:[%s1802_s17] sm:$0xff]  ;;  %v694_v5 = vmov %v1727_v5  ;;  %v697_v6 = vmov %v1729_v6  ;;  %vm687_vm0 = vcmp.eq.s32.totalorder %v683_v6, %v680_v5  ;;  %s453_s23 = sadd.s32 1, %s1617_s23  }
 0x11b   : >>> { %v470_v0 = vadd.f32 %v469_v61, %v468_v58  ;;  %v509_v1 = vrot.slane %v508_v62, 2  ;;  %v828_v57 = vld [vmem:[%s1806_s20] sm:$0xff]  ;;  %v667_v5 = vmov %v1727_v5  ;;  %v670_v6 = vmov %v1729_v6  ;;  %p450_p9 = scmp.ge.s32.totalorder %s453_s23, 15  }
 0x11c   : >>> { %v490_v2 = vadd.f32 %v489_v63, %v488_v60  ;;  %vm661_vm1 = vcmp.eq.s32.totalorder %v656_v6, %v653_v5  ;;  %vm702_vm3 = vcmp.eq.s32.totalorder %v697_v6, %v694_v5  ;;  %vm674_vm4 = vcmp.eq.s32.totalorder %v670_v6, %v667_v5 }
 0x11d   : >>> { %v471_v3 = vrot.slane %v470_v0, 1  ;;  %v510_v4 = vadd.f32 %v509_v1, %v508_v62  ;;  %vm716_vm5 = vcmp.eq.s32.totalorder %v1727_v5, 0  ;;  %vm720_vm6 = vcmp.eq.s32.totalorder %v1727_v5, 1 }
 0x11e   : >>> { %v491_v7 = vrot.slane %v490_v2, 1  ;;  %vm733_vm7 = vcmp.eq.s32.totalorder %v1727_v5, 7  ;;  %v354_v5 = vmov (%p450_p9), %v1727_v5  ;;  %v357_v6 = vmov (%p450_p9), %v1729_v6 }
 0x11f   : >>> { %v472_v8 = vadd.f32 %v471_v3, %v470_v0  ;;  %v511_v9 = vrot.slane %v510_v4, 1  ;;  %v407_v5 = vmov (%p450_p9), %v1727_v5 }
 0x120   : >>> { %v492_v10 = vadd.f32 %v491_v7, %v490_v2 }
 0x121   : >>> { %473 = vst [vmem:[%s455_s21] sm:$0x1] %v472_v8  ;;  %v512_v11 = vadd.f32 %v511_v9, %v510_v4  ;;  %s514_s21 = smov [#allocation21] }
 0x122   : >>> { %493 = vst [vmem:[%s475_s22] sm:$0x1] %v492_v10  ;;  %s515_s22 = smov [#allocation22]  ;;  %s559_s21 = smov %s514_s21 }
 0x123   : >>> { %513 = vst [vmem:[%s495_s29] sm:$0x1] %v512_v11  ;;  %s561_s22 = smov %s515_s22  ;;  %s563_s29 = smov [#allocation21] }
 0x128   : >>> { %v517_v14 = vld [vmem:[%s516_s15] sm:$0xff]  ;;  %s576_s15 = smov [#allocation23] }
 0x129   : >>> { %v519_v12 = vld [vmem:[%s518_s11] sm:$0xff]  ;;  %v540_v27 = vand.u32 2147483647, %v517_v14  ;;  %s578_s11 = smov [#allocation22] }
 0x12a   : >>> { %v523_v13 = vmul.f32 2.0, %v519_v12  ;;  %v521_v15 = vld [vmem:[%s520_s24] sm:$0xff]  ;;  %v541_v32 = vand.u32 2147483647, %v519_v12  ;;  %s593_s24 = smov [#allocation23] }
 0x12b   : >>> { %v522_v16 = vsub.f32 %v521_v15, %v517_v14  ;;  %v542_v28 = vand.u32 2147483647, %v521_v15 }
 0x12c   : >>> { %1571 = vrcp.f32 %v523_v13 }
 0x12d   : >>> { %v543_v31 = vmin.f32 %v540_v27, %v542_v28 }
 0x12f   : >>> { %v544_v33 = vmul.f32 1.1920929e-08, %v543_v31 }
 0x131   : >>> { %vm545_vm11 = vcmp.le.f32.partialorder %v541_v32, %v544_v33 }
 0x136   : >>> { %v1572_v17 = vpop.eup %1571 }
 0x137   : >>> { %v525_v18 = vmul.f32 %v1572_v17, %v522_v16 }
 0x139   : >>> { %v527_v19 = vmul.f32 %v525_v18, %v525_v18  ;;  %vm526_vm10 = vcmp.ge.f32.partialorder %v525_v18, 0.0 }
 0x13b   : >>> { %v528_v20 = vadd.f32 1.0, %v527_v19 }
 0x13d   : >>> { %1573 = vrsqrt.f32 %v528_v20  ;;  %vm531_vm8 = vcmp.eq.f32.partialorder %v528_v20, inf  ;;  %v534_v22 = vand.u32 2147483648, %v528_v20  ;;  %vm533_vm9 = vcmp.eq.f32.partialorder %v528_v20, 0.0 }
 0x147   : >>> { %v1574_v21 = vpop.eup %1573 }
 0x148   : >>> { %v530_v23 = vmul.f32 %v1574_v21, %v528_v20 }
 0x14a   : >>> { %v532_v24 = vsel %vm531_vm8, %v528_v20, %v530_v23  ;;  %vm369_vm8 = vcmp.eq.s32.totalorder (%p450_p9), %v357_v6, %v354_v5  ;;  %v410_v6 = vmov (%p450_p9), %v1729_v6  ;;  %v373_v5 = vmov (%p450_p9), %v1727_v5 }
 0x14b   : >>> { %v535_v25 = vsel %vm533_vm9, %v534_v22, %v532_v24  ;;  %v376_v6 = vmov (%p450_p9), %v1729_v6  ;;  %v390_v5 = vmov (%p450_p9), %v1727_v5  ;;  %vm422_vm9 = vcmp.eq.s32.totalorder (%p450_p9), %v410_v6, %v407_v5 }
 0x14c   : >>> { %v536_v26 = vxor.u32 2147483648, %v535_v25  ;;  %v393_v6 = vmov (%p450_p9), %v1729_v6 }
 0x14e   : >>> { %v537_v29 = vsel %vm526_vm10, %v535_v25, %v536_v26 }
 0x14f   : >>> { %v538_v30 = vadd.f32 %v537_v29, %v525_v18 }
 0x151   : >>> { %1575 = vrcp.f32 %v538_v30 }
 0x15b   : >>> { %v1576_v34 = vpop.eup %1575 }
 0x15c   : >>> { %v546_v35 = vsel %vm545_vm11, 0.0, %v1576_v34 }
 0x15d   : >>> { %v547_v36 = vmul.f32 %v546_v35, %v546_v35  ;;  %v551_v37 = vmul.f32 %v546_v35, %v519_v12 }
 0x15f   : >>> { %v548_v38 = vadd.f32 1.0, %v547_v36  ;;  %v552_v39 = vsub.f32 %v517_v14, %v551_v37  ;;  %v554_v40 = vadd.f32 %v551_v37, %v521_v15 }
 0x161   : >>> { %1577 = vrsqrt.f32 %v548_v38  ;;  %556 = vst [vmem:[%s555_s27] sm:$0xff] %v552_v39  ;;  %558 = vst [vmem:[%s557_s28] sm:$0xff] %v554_v40  ;;  %s1789_s27 = smov [#allocation12]  ;;  %s591_s28 = smov [#allocation24] }
 0x162   : >>> { %v601_v49 = vld [vmem:[%s1789_s27] sm:$0xff] }
 0x16b   : >>> { %v1578_v41 = vpop.eup %1577 }
 0x16c   : >>> { %560 = vst [vmem:[%s559_s21] sm:$0xff] %v1578_v41  ;;  %v550_v42 = vmul.f32 %v1578_v41, %v546_v35  ;;  %s1791_s21 = smov [#allocation13] }
 0x16d   : >>> { %v602_v50 = vld [vmem:[%s1791_s21] sm:$0xff] }
 0x16e   : >>> { %562 = vst [vmem:[%s561_s22] sm:$0xff] %v550_v42  ;;  %s1793_s22 = smov [#allocation15] }
 0x16f   : >>> { %v604_v51 = vld [vmem:[%s1793_s22] sm:$0xff] }
 0x173   : >>> { %v564_v43 = vld [vmem:[%s563_s29] ss:$0 sm:$0xff]  ;;  %s817_s29 = smov [#allocation23] }
 0x174   : >>> { %v573_v44 = vsel %vm572_vm12, %v564_v43, 0.0 }
 0x175   : >>> { %574 = vadd.xlane.f32.xlu0 %v573_v44  ;;  %v579_v45 = vld [vmem:[%s578_s11] ss:$0 sm:$0xff]  ;;  %s1808_s11 = smov [#allocation14] }
 0x176   : >>> { %v588_v46 = vsel %vm587_vm13, %v579_v45, 0.0  ;;  %v603_v58 = vld [vmem:[%s1808_s11] sm:$0xff] }
 0x179   : >>> { %589 = vadd.xlane.f32.xlu0 %v588_v46 }
 0x202   : >>> { %v575_v47 = vpop.xlane.xlu0 %574 }
 0x203   : >>> { %577 = vst [vmem:[%s576_s15] sm:$0xff] %v575_v47  ;;  %s595_s15 = smov [#allocation24] }
 0x206   : >>> { %v590_v48 = vpop.xlane.xlu0 %589 }
 0x207   : >>> { %592 = vst [vmem:[%s591_s28] sm:$0xff] %v590_v48  ;;  %s1835_s28 = smov [#allocation14] }
 0x20a   : >>> { %v594_v54 = vld [vmem:[%s593_s24] sm:$0xff]  ;;  %s623_s24 = smov [#allocation22] }
 0x20b   : >>> { %v818_v55 = vld [vmem:[%s817_s29] sm:$0xff]  ;;  %v605_v59 = vmul.f32 %v601_v49, %v594_v54  ;;  %v608_v60 = vmul.f32 %v602_v50, %v594_v54  ;;  %v615_v61 = vmul.f32 %v604_v51, %v594_v54  ;;  %v612_v4 = vmul.f32 %v603_v58, %v594_v54  ;;  %s650_s29 = smov [#allocation19] }
 0x20c   : >>> { %v829_v62 = vmul.f32 %v825_v52, %v818_v55  ;;  %v832_v63 = vmul.f32 %v826_v53, %v818_v55  ;;  %v836_v0 = vmul.f32 %v827_v56, %v818_v55  ;;  %v839_v1 = vmul.f32 %v828_v57, %v818_v55  ;;  %v624_v24 = vld [vmem:[%s623_s24] ss:$0 sm:$0xff]  ;;  %s690_s24 = smov [#allocation15] }
 0x20d   : >>> { %v657_v55 = vld [vmem:[%s650_s29] ss:$0 sm:$0xff]  ;;  %s706_s29 = smov [#allocation13] }
 0x20e   : >>> { %v596_v2 = vld [vmem:[%s595_s15] sm:$0xff]  ;;  %s677_s15 = smov [#allocation14] }
 0x20f   : >>> { %v820_v3 = vld [vmem:[%s819_s26] sm:$0xff]  ;;  %v609_v7 = vmul.f32 %v604_v51, %v596_v2  ;;  %v611_v8 = vmul.f32 %v601_v49, %v596_v2  ;;  %v614_v9 = vmul.f32 %v602_v50, %v596_v2  ;;  %v606_v14 = vmul.f32 %v603_v58, %v596_v2  ;;  %s621_s26 = smov [#allocation21] }
 0x210   : >>> { %v830_v10 = vmul.f32 %v827_v56, %v820_v3  ;;  %v833_v11 = vmul.f32 %v828_v57, %v820_v3  ;;  %v835_v12 = vmul.f32 %v825_v52, %v820_v3  ;;  %v838_v13 = vmul.f32 %v826_v53, %v820_v3  ;;  %v622_v23 = vld [vmem:[%s621_s26] ss:$0 sm:$0xff]  ;;  %s649_s26 = smov [#allocation12] }
 0x211   : >>> { %v610_v15 = vsub.f32 %v608_v60, %v609_v7  ;;  %v616_v16 = vadd.f32 %v615_v61, %v614_v9  ;;  %v613_v18 = vadd.f32 %v612_v4, %v611_v8  ;;  %v607_v22 = vsub.f32 %v605_v59, %v606_v14 }
 0x212   : >>> { %v831_v17 = vsub.f32 %v829_v62, %v830_v10  ;;  %v834_v19 = vsub.f32 %v832_v63, %v833_v11  ;;  %v837_v20 = vadd.f32 %v836_v0, %v835_v12  ;;  %v840_v21 = vadd.f32 %v839_v1, %v838_v13 }
 0x213   : >>> { %618 = vst [vmem:[%s1791_s21] sm:$0xff] %v610_v15  ;;  %620 = vst [vmem:[%s1793_s22] sm:$0xff] %v616_v16  ;;  %s1837_s21 = smov [#allocation15]  ;;  %s1841_s22 = smov [#allocation13] }
 0x214   : >>> { %841 = vst [vmem:[%s1796_s14] sm:$0xff] %v831_v17  ;;  %619 = vst [vmem:[%s1808_s11] sm:$0xff] %v613_v18  ;;  %s845_s14 = smov %s1731_s14  ;;  %s691_s11 = smov [#allocation20] }
 0x215   : >>> { %842 = vst [vmem:[%s1799_s30] sm:$0xff] %v834_v19  ;;  %843 = vst [vmem:[%s1802_s17] sm:$0xff] %v837_v20  ;;  %s846_s17 = smov %s1737_s17  ;;  %s1828_s30 = smov %s1734_s30  ;;  %v698_v56 = vld [vmem:[%s691_s11] ss:$0 sm:$0xff] }
 0x216   : >>> { %844 = vst [vmem:[%s1806_s20] sm:$0xff] %v840_v21  ;;  %617 = vst [vmem:[%s1789_s27] sm:$0xff] %v607_v22  ;;  %s1831_s20 = smov %s1740_s20  ;;  %s1839_s27 = smov [#allocation12] }
 0x217   : >>> { %s1621_s11 = smov 127  }
 0x21a   : >>> { %v632_v39 = vld [vmem:[%s1837_s21] sm:$0xff] }
 0x21b   : >>> { %v847_v25 = vld [vmem:[%s845_s14] ss:$0 sm:$0xff]  ;;  %v1499_v27 = vld [vmem:[%s845_s14 + $0x7] ss:$0 sm:$0xff]  ;;  %v640_v42 = vmul.f32 %v632_v39, %v624_v24  ;;  %v643_v46 = vmul.f32 %v632_v39, %v622_v23 }
 0x21c   : >>> { %v1498_v26 = vld [vmem:[%s845_s14 - $0x1] sm:$0xfe]  ;;  %v1503_v34 = vld [vmem:[%s1828_s30 + $0x7] ss:$0 sm:$0xff] }
 0x21d   : >>> { %v854_v28 = vsel %vm777_vm14, %v847_v25, %v1498_v26  ;;  %v858_v29 = vld [vmem:[%s846_s17] ss:$0 sm:$0xff]  ;;  %v1501_v30 = vld [vmem:[%s846_s17 + $0x1] sm:$0x7f] }
 0x21e   : >>> { %v871_v31 = vld [vmem:[%s1828_s30] ss:$0 sm:$0xff]  ;;  %857 = vst [vmem:[%s845_s14] sm:$0xff] %v854_v28  ;;  %v866_v32 = vsel %vm789_vm15, %v1499_v27, %v1501_v30  ;;  %v1505_v37 = vld [vmem:[%s1831_s20 + $0x1] sm:$0x7f] }
 0x21f   : >>> { %v1502_v33 = vld [vmem:[%s1828_s30 - $0x1] sm:$0xfe]  ;;  %1500 = vst [vmem:[%s845_s14 + $0x1] sm:$0x1] %v858_v29  ;;  %868 = vst [vmem:[%s846_s17] sm:$0xff] %v866_v32  ;;  %v890_v40 = vsel %vm789_vm15, %v1503_v34, %v1505_v37 }
 0x220   : >>> { %v882_v35 = vld [vmem:[%s1831_s20] ss:$0 sm:$0xff]  ;;  %v878_v36 = vsel %vm777_vm14, %v871_v31, %v1502_v33 }
 0x221   : >>> { %v631_v38 = vld [vmem:[%s1835_s28] sm:$0xff]  ;;  %881 = vst [vmem:[%s1828_s30] sm:$0xff] %v878_v36  ;;  %892 = vst [vmem:[%s1831_s20] sm:$0xff] %v890_v40 }
 0x222   : >>> { %v639_v41 = vmul.f32 %v631_v38, %v622_v23  ;;  %v642_v43 = vmul.f32 %v631_v38, %v624_v24  ;;  %v629_v44 = vld [vmem:[%s1839_s27] sm:$0xff]  ;;  %1504 = vst [vmem:[%s1828_s30 + $0x1] sm:$0x1] %v882_v35 }
 0x223   : >>> { %v630_v45 = vld [vmem:[%s1841_s22] sm:$0xff]  ;;  %v633_v47 = vmul.f32 %v629_v44, %v622_v23  ;;  %v636_v49 = vmul.f32 %v629_v44, %v624_v24 }
 0x224   : >>> { %v634_v48 = vmul.f32 %v630_v45, %v624_v24  ;;  %v641_v50 = vsub.f32 %v639_v41, %v640_v42  ;;  %v637_v51 = vmul.f32 %v630_v45, %v622_v23  ;;  %v644_v52 = vadd.f32 %v643_v46, %v642_v43 }
 0x226   : >>> { %v635_v53 = vsub.f32 %v633_v47, %v634_v48  ;;  %647 = vst [vmem:[%s1835_s28] sm:$0xff] %v641_v50  ;;  %v638_v54 = vadd.f32 %v637_v51, %v636_v49  ;;  %648 = vst [vmem:[%s1837_s21] sm:$0xff] %v644_v52  ;;  %s664_s28 = smov [#allocation13]  ;;  %s1875_s21 = smov [#allocation14] }
 0x228   : >>> { %645 = vst [vmem:[%s1839_s27] sm:$0xff] %v635_v53  ;;  %646 = vst [vmem:[%s1841_s22] sm:$0xff] %v638_v54  ;;  %s705_s27 = smov [#allocation12]  ;;  %s1620_s22 = smov 1  }
 0x22d   : >>> { %v684_v57 = vld [vmem:[%s677_s15] sm:$0xff] }
 0x22e   : >>> { %v688_v58 = vsel %vm687_vm0, 0.0, %v684_v57  ;;  %v699_v60 = vld [vmem:[%s690_s24] sm:$0xff] }
 0x22f   : >>> { %v658_v59 = vld [vmem:[%s649_s26] sm:$0xff]  ;;  %689 = vst [vmem:[%s677_s15] sm:$0xff] %v688_v58  ;;  %v703_v63 = vsel %vm702_vm3, %v698_v56, %v699_v60  ;;  %s1878_s15 = smov [#allocation15] }
 0x230   : >>> { %v662_v61 = vsel %vm661_vm1, %v657_v55, %v658_v59  ;;  %v671_v62 = vld [vmem:[%s664_s28] sm:$0xff]  ;;  %704 = vst [vmem:[%s690_s24] sm:$0xff] %v703_v63  ;;  %s793_s24 = smov [#allocation13] }
 0x231   : >>> { %663 = vst [vmem:[%s649_s26] sm:$0xff] %v662_v61  ;;  %v675_v0 = vsel %vm674_vm4, 0.0, %v671_v62  ;;  %s769_s26 = smov [#allocation12] }
 0x232   : >>> { %676 = vst [vmem:[%s664_s28] sm:$0xff] %v675_v0  ;;  %s770_s28 = smov [#allocation14] }
 0x236   : >>> { %v743_v1 = vld [vmem:[%s1875_s21] sm:$0xff] }
 0x237   : >>> { %744 = vrot.lane.b32.xlu0 %v743_v1, %s1620_s22  ;;  %v739_v4 = vld [vmem:[%s1878_s15] sm:$0xff] }
 0x238   : >>> { %v711_v2 = vld [vmem:[%s705_s27] sm:$0xff] }
 0x239   : >>> { %712 = vrot.lane.b32.xlu1 %v711_v2, %s1620_s22  ;;  %v707_v3 = vld [vmem:[%s706_s29] sm:$0xff] }
 0x23d   : >>> { %708 = vrot.lane.b32.xlu1 %v707_v3, %s1620_s22 }
 0x241   : >>> { %729 = vrot.lane.b32.xlu1 %v707_v3, %s1621_s11 }
 0x245   : >>> { %740 = vrot.lane.b32.xlu1 %v739_v4, %s1620_s22  ;;  %s358_s22 = smov (%p450_p9), [#allocation12] }
 0x249   : >>> { %761 = vrot.lane.b32.xlu1 %v739_v4, %s1621_s11  ;;  %s394_s11 = smov (%p450_p9), [#allocation14] }
 0x2a9   : >>> { %v745_v13 = vpop.permute.xlu0 %744 }
 0x2aa   : >>> { %v749_v15 = vsel %vm716_vm5, %v743_v1, %v745_v13 }
 0x2ab   : >>> { %v713_v7 = vpop.permute.xlu1 %712 }
 0x2ac   : >>> { %v717_v8 = vsel %vm716_vm5, %v711_v2, %v713_v7 }
 0x2af   : >>> { %v709_v9 = vpop.permute.xlu1 %708 }
 0x2b0   : >>> { %v721_v10 = vsel %vm720_vm6, %v709_v9, %v717_v8 }
 0x2b1   : >>> { %v727_v11 = vsel %vm1359_vm2, %v721_v10, 0.0 }
 0x2b2   : >>> { %735 = vst [vmem:[%s705_s27] sm:$0xff] %v727_v11  ;;  %s794_s27 = smov [#allocation15] }
 0x2b3   : >>> { %v730_v12 = vpop.permute.xlu1 %729 }
 0x2b4   : >>> { %v734_v14 = vsel %vm733_vm7, %v711_v2, %v730_v12 }
 0x2b5   : >>> { %736 = vst [vmem:[%s706_s29] sm:$0xff] %v734_v14  ;;  %s377_s29 = smov (%p450_p9), [#allocation13] }
 0x2b7   : >>> { %v741_v16 = vpop.permute.xlu1 %740 }
 0x2b8   : >>> { %v753_v17 = vsel %vm720_vm6, %v741_v16, %v749_v15 }
 0x2b9   : >>> { %v771_v18 = vld [vmem:[%s769_s26] ss:$0 sm:$0xff]  ;;  %v1491_v20 = vld [vmem:[%s769_s26 + $0x7] ss:$0 sm:$0xff]  ;;  %v759_v22 = vsel %vm1359_vm2, %v753_v17, 0.0 }
 0x2ba   : >>> { %v1490_v19 = vld [vmem:[%s769_s26 - $0x1] sm:$0xfe]  ;;  %767 = vst [vmem:[%s1875_s21] sm:$0xff] %v759_v22  ;;  %s893_s21 = sadd.s32 (%p450_p9), 1, %s1613_s16  }
 0x2bb   : >>> { %v778_v21 = vsel %vm777_vm14, %v771_v18, %v1490_v19  ;;  %v762_v23 = vpop.permute.xlu1 %761  ;;  %p446_p10 = scmp.ge.s32.totalorder (%p450_p9), %s893_s21, 15  ;;  %s1993_s16 = smov (%p450_p9), %s893_s21 }
 0x2bc   : >>> { %781 = vst [vmem:[%s769_s26] sm:$0xff] %v778_v21  ;;  %v795_v24 = vld [vmem:[%s793_s24] ss:$0 sm:$0xff]  ;;  %v1495_v26 = vld [vmem:[%s793_s24 + $0x7] ss:$0 sm:$0xff]  ;;  %v766_v27 = vsel %vm733_vm7, %v743_v1, %v762_v23 }
 0x2bd   : >>> { %v1494_v25 = vld [vmem:[%s793_s24 - $0x1] sm:$0xfe]  ;;  %768 = vst [vmem:[%s1878_s15] sm:$0xff] %v766_v27  ;;  %s411_s15 = smov (%p450_p9), [#allocation15] }
 0x2be   : >>> { %v802_v28 = vsel %vm777_vm14, %v795_v24, %v1494_v25 }
 0x2bf   : >>> { %805 = vst [vmem:[%s793_s24] sm:$0xff] %v802_v28 }
 0x2c1   : >>> { %v782_v29 = vld [vmem:[%s770_s28] ss:$0 sm:$0xff]  ;;  %v1493_v30 = vld [vmem:[%s770_s28 + $0x1] sm:$0x7f] }
 0x2c2   : >>> { %1492 = vst [vmem:[%s769_s26 + $0x1] sm:$0x1] %v782_v29  ;;  %v790_v31 = vsel %vm789_vm15, %v1491_v20, %v1493_v30  ;;  %452 = sbr.rel (!%p450_p9) target bundleno = 274 (0x112), region = 494 }
 0x2c3   : >>> { %792 = vst [vmem:[%s770_s28] sm:$0xff] %v790_v31 }
 0x2c4   : >>> { %v806_v32 = vld [vmem:[%s794_s27] ss:$0 sm:$0xff]  ;;  %v1497_v33 = vld [vmem:[%s794_s27 + $0x1] sm:$0x7f] }
 0x2c5   : >>> { %1496 = vst [vmem:[%s793_s24 + $0x1] sm:$0x1] %v806_v32  ;;  %v814_v34 = vsel %vm789_vm15, %v1495_v26, %v1497_v33 }
 0x2c6   : >>> { %816 = vst [vmem:[%s794_s27] sm:$0xff] %v814_v34 }
 0x2c9   : >> { %v364_v35 = vld [vmem:[%s358_s22] sm:$0xff] }
 0x2ca   : >> { %v365_v37 = vsel %vm1359_vm2, %v364_v35, 0.0  ;;  %v400_v39 = vld [vmem:[%s394_s11] sm:$0xff] }
 0x2cb   : >> { %v366_v41 = vmul.f32 %v365_v37, %v365_v37  ;;  %v401_v43 = vsel %vm1359_vm2, %v400_v39, 0.0 }
 0x2cc   : >> { %v383_v36 = vld [vmem:[%s377_s29] sm:$0xff]  ;;  %v402_v45 = vmul.f32 %v401_v43, %v401_v43 }
 0x2cd   : >> { %v384_v38 = vsel %vm1359_vm2, %v383_v36, 0.0  ;;  %v417_v40 = vld [vmem:[%s411_s15] sm:$0xff]  ;;  %v370_v48 = vsel %vm369_vm8, 0.0, %v366_v41 }
 0x2ce   : >> { %v385_v42 = vmul.f32 %v384_v38, %v384_v38  ;;  %v418_v44 = vsel %vm1359_vm2, %v417_v40, 0.0 }
 0x2cf   : >> { %v419_v47 = vmul.f32 %v418_v44, %v418_v44 }
 0x2d0   : >> { %v387_v46 = vadd.f32 %v385_v42, %v366_v41  ;;  %v386_v49 = vadd.f32 %v385_v42, %v370_v48 }
 0x2d1   : >> { %v423_v52 = vsel %vm422_vm9, 0.0, %v419_v47 }
 0x2d2   : >> { %v404_v50 = vadd.f32 %v402_v45, %v387_v46  ;;  %v403_v51 = vadd.f32 %v402_v45, %v386_v49 }
 0x2d4   : >> { %v425_v53 = vadd.f32 %v419_v47, %v404_v50  ;;  %v424_v54 = vadd.f32 %v423_v52, %v403_v51 }
 0x2d6   : >> { %426 = vadd.xlane.f32.xlu0 %v425_v53 }
 0x2da   : >> { %434 = vadd.xlane.f32.xlu0 %v424_v54 }
 0x363   : >> { %v427_v55 = vpop.xlane.xlu0 %426 }
 0x364   : >> { %v428_v56 = vrot.slane %v427_v55, 4 }
 0x366   : >> { %v429_v57 = vadd.f32 %v428_v56, %v427_v55 }
 0x367   : >> { %v435_v58 = vpop.xlane.xlu0 %434 }
 0x368   : >> { %v430_v59 = vrot.slane %v429_v57, 2  ;;  %v436_v60 = vrot.slane %v435_v58, 4 }
 0x36a   : >> { %v437_v61 = vadd.f32 %v436_v60, %v435_v58  ;;  %v431_v62 = vadd.f32 %v430_v59, %v429_v57 }
 0x36c   : >> { %v438_v63 = vrot.slane %v437_v61, 2  ;;  %v432_v1 = vrot.slane %v431_v62, 1 }
 0x36e   : >> { %v439_v0 = vadd.f32 %v438_v63, %v437_v61  ;;  %v433_v4 = vadd.f32 %v432_v1, %v431_v62 }
 0x370   : >> { %v440_v2 = vrot.slane %v439_v0, 1 }
 0x372   : >> { %v441_v3 = vadd.f32 %v440_v2, %v439_v0 }
 0x374   : >> { %1524 = vpush %v441_v3 }
 0x375   : >> { %1526 = vpush %v433_v4 }
 0x3a5   : >> { %s1525_s23 = spop %1524 }
 0x3a6   : >> { %s1527_s26 = spop %1526 }
 0x3a7   : >> { %s444_s24 = smul.f32 1e-10, %s1527_s26 }
 0x3a9   : >> { %p445_p11 = scmp.le.f32.partialorder %s1525_s23, %s444_s24 }
 0x3ab   : >> { %p447_p12 = por %p446_p10, %p445_p11 }
 0x3ad   : > { %895 = sbr.rel (!%p447_p12) target bundleno = 273 (0x111), region = 505 }
 0x3b4 PF: > { %s900_s28 = smov [#allocation12]  ;;  %v904_v5 = vmov %v1727_v5  ;;  %v907_v6 = vmov %v1729_v6  ;;  %s920_s27 = smov [#allocation15] }
 0x3b5   : > { %v924_v5 = vmov %v1727_v5  ;;  %v927_v6 = vmov %v1729_v6  ;;  %v908_v7 = vld [vmem:[%s900_s28] sm:$0xff]  ;;  %vm911_vm10 = vcmp.eq.s32.totalorder %v907_v6, %v904_v5  ;;  %s896_s16 = sand.u32 7, %s1688_s12   ;;  %s1994_s29 = scalar_lea.vmem [#allocation7], %s1725_s18 }
 0x3b6   : > { %vm931_vm11 = vcmp.eq.s32.totalorder %v927_v6, %v924_v5  ;;  %v912_v8 = vsel %vm911_vm10, %v908_v7, 0.0  ;;  %v928_v10 = vld [vmem:[%s920_s27] sm:$0xff]  ;;  %s897_s21 = scalar_lea.vmem [#allocation4], %s896_s16  ;;  %s899_s22 = scalar_lea.vmem [#allocation6], %s896_s16 }
 0x3b7   : > { %v913_v9 = vrot.slane %v912_v8, 4  ;;  %v932_v11 = vsel %vm931_vm11, %v928_v10, 0.0  ;;  %s901_s21 = smov %s897_s21  ;;  %s921_s22 = smov %s899_s22 }
 0x3b8   : > { %v933_v13 = vrot.slane %v932_v11, 4  ;;  %s979_s11 = sshrl.u32 (%p1702_p3), %s1688_s12, 3 }
 0x3b9   : > { %v914_v12 = vadd.f32 %v913_v9, %v912_v8  ;;  %s1512_s15 = sshll.u32 (%p1702_p3), %s979_s11, 2 }
 0x3ba   : > { %v934_v15 = vadd.f32 %v933_v13, %v932_v11  ;;  %s981_s24 = scalar_lea.vmem (%p1702_p3), %s1985_s4, %s1512_s15 }
 0x3bb   : > { %v915_v14 = vrot.slane %v914_v12, 2 }
 0x3bc   : > { %v935_v17 = vrot.slane %v934_v15, 2 }
 0x3bd   : > { %v916_v16 = vadd.f32 %v915_v14, %v914_v12 }
 0x3be   : > { %v936_v19 = vadd.f32 %v935_v17, %v934_v15 }
 0x3bf   : > { %v917_v18 = vrot.slane %v916_v16, 1 }
 0x3c0   : > { %v937_v5 = vrot.slane %v936_v19, 1 }
 0x3c1   : > { %v918_v20 = vadd.f32 %v917_v18, %v916_v16 }
 0x3c2   : > { %v938_v6 = vadd.f32 %v937_v5, %v936_v19 }
 0x3c3   : > { %919 = vst [vmem:[%s901_s21] sm:$0x1] %v918_v20 }
 0x3c4   : > { %939 = vst [vmem:[%s921_s22] sm:$0x1] %v938_v6 }
 0x3c6   : > { %978 = sbr.rel (!%p1702_p3) target bundleno = 980 (0x3d4), region = 174 }
 0x3ca   : > { %v943_v21 = vld [vmem:[#allocation4] sm:$0xf] }
 0x3cb   : > { %945 = vst [vmem:[%s283_s25] sm:$0xf] %v943_v21  ;;  %v949_v22 = vld [vmem:[#allocation6] sm:$0xf] }
 0x3cc   : > { %951 = vst [vmem:[%s1994_s29] sm:$0xf] %v949_v22 }
 0x3d2   : > { %v997_v23 = vld [vmem:[%s283_s25] sm:$0xf] }
 0x3d3   : > { %998 = vst [vmem:[%s981_s24] sm:$0xf] %v997_v23 }
 0x3d4 PF: > { %1015 = sbr.rel (!%p1702_p3) target bundleno = 988 (0x3dc), region = 208  ;;  %s1016_s28 = sshrl.u32 (%p1702_p3), %s1688_s12, 3 }
 0x3d5   : > { %s1995_s27 = scalar_lea.vmem (%p1702_p3), [#allocation7], %s1725_s18  ;;  %s1513_s16 = sshll.u32 (%p1702_p3), %s1016_s28, 2 }
 0x3d6   : > { %s1018_s25 = scalar_lea.vmem (%p1702_p3), %s1986_s5, %s1513_s16 }
 0x3da   : > { %v1034_v24 = vld [vmem:[%s1995_s27] sm:$0xf] (%p1702_p3) }
 0x3db   : > { %1035 = vst [vmem:[%s1018_s25] sm:$0xf] %v1034_v24 }
 0x3dc PF: > { %s1514_s29 = sshll.u32 %s1688_s12, 3  ;;  %v1079_v25 = vld [vmem:[%s1731_s14] sm:$0xff]  ;;  %v1113_v26 = vld [vmem:[%s1734_s30] sm:$0xff] }
 0x3dd   : > { %v1147_v27 = vld [vmem:[%s1737_s17] sm:$0xff]  ;;  %s1051_s18 = scalar_lea.vmem %s1987_s6, %s1514_s29  ;;  %s1085_s26 = scalar_lea.vmem %s1988_s7, %s1514_s29  ;;  %v1181_v28 = vld [vmem:[%s1740_s20] sm:$0xff] }
 0x3de   : > { %1080 = vst [vmem:[%s1051_s18] sm:$0xff] %v1079_v25  ;;  %1114 = vst [vmem:[%s1085_s26] sm:$0xff] %v1113_v26  ;;  %s1119_s27 = scalar_lea.vmem %s1989_s8, %s1514_s29  ;;  %s1153_s14 = scalar_lea.vmem %s1990_s9, %s1514_s29 }
 0x3df   : > { %1148 = vst [vmem:[%s1119_s27] sm:$0xff] %v1147_v27  ;;  %1182 = vst [vmem:[%s1153_s14] sm:$0xff] %v1181_v28 }
 0x3e0 PF: > { %s1996_s17 = sld [smem:[#allocation25_spill]]  ;;  %p13_p13 = scmp.ge.s32.totalorder %s1691_s13, 6  }
 0x3e1   : > { %s1997_s30 = smov %s1605_s10  ;;  %s1999_s11 = smov %s1691_s13 }
 0x3e2   :  { %15 = sbr.rel (!%p13_p13) target bundleno = 2 (0x2), region = 516 }
 0x3e6   : > { %s1998_s10 = smov %s1996_s17 }

// kernel: spdnet_forward.2
= control target key start
LH: loop header
LB: loop body
LE: loop exit
PB: predicated region body
PF: predicated region fallthrough
CT: control target
= control target key end

     0   :  { %7 = vsyncpa [#allocation3], 0  ;;  %s659_s9 = smov [#allocation2]   ;;  %s743_s0 = inlined_call_operand.vmem [shape: f32[16,16], index: 0, kind: input, shape index: {}]   ;;  %s744_s1 = inlined_call_operand.hbm [shape: f32[64,16], index: 1, kind: input, shape index: {}]   ;;  %s745_s2 = inlined_call_operand.vmem [shape: f32[4,16,16], index: 2, kind: output, shape index: {}]  }
   0x1   :  { %s15_s10 = sshll.u32 %s659_s9, 4  ;;  %s635_s13 = scalar_lea.hbm %s744_s1, 1024  ;;  %s16_s10 = int_to_ptr.vmem [resolvable:$true] %s15_s10 }
   0x2   :  { %p636_p0 = scmp.ne.s32.totalorder %s744_s1, %s635_s13  ;;  %p639_p1 = scmp.lt.u32.totalorder %s635_s13, %s744_s1 }
   0x4   :  { %p641_p2 = pnand %p639_p1, %p636_p0 }
   0x6   :  { %644 = shalt.err (!%p641_p2)
}
   0x7   :  { %s645_s18 = scalar_lea.vmem %s16_s10, 1024  ;;  %p650_p4 = scmp.lt.s32.totalorder %s16_s10, %s16_s10 }
   0x8   :  { %p646_p3 = scmp.ne.s32.totalorder %s16_s10, %s645_s18  ;;  %p651_p5 = scmp.lt.s32.totalorder %s645_s18, %s645_s18 }
   0xa   :  { %p652_p6 = por %p651_p5, %p650_p4 }
   0xc   :  { %p653_p7 = pnand %p652_p6, %p646_p3 }
   0xe   :  { %656 = shalt.err (!%p653_p7)
}
   0xf   :  { %s660_s19 = smov 128   ;;  %s661_s20 = smov 8  }
  0x10   :  { %21 = dma.hbm_to_vmem [thread:$0]  %s744_s1, 1024, %s16_s10, [#allocation3], %s660_s19, %s660_s19, %s661_s20  }
  0x11   :  { %657 = dma.done.wait [#allocation3], 1024  }
  0x12   :  { %658 = vsyncadd [#allocation3], 4294966272  ;;  %vm35_vm0 = vcmask 130048   ;;  %v25_v0 = vld [vmem:[%s743_s0] sm:$0xff]  ;;  %v26_v1 = vld [vmem:[%s743_s0 + $0x8] sm:$0xff] }
  0x13   :  { %v27_v2 = vld [vmem:[#allocation2] sm:$0xff]  ;;  %v611_v3 = vpack.c.bf16 %v26_v1, %v25_v0  ;;  %165 = vxpose.xlu0.b32.start [1/2] (short) (narrow) %v25_v0, 16  ;;  %v28_v4 = vld [vmem:[#allocation2 + $0x8] sm:$0xff]  ;;  %v29_v5 = vld [vmem:[#allocation2 + $0x10] sm:$0xff] }
  0x14   :  { %571 = vmatprep.mubr.msk.f32.mxu0 %vm35_vm0, %v27_v2  ;;  %v30_v6 = vld [vmem:[#allocation2 + $0x18] sm:$0xff]  ;;  %v31_v7 = vld [vmem:[#allocation2 + $0x20] sm:$0xff]  ;;  %v32_v8 = vld [vmem:[#allocation2 + $0x28] sm:$0xff] }
  0x15   :  { %612 = vmatprep.subr.bf16.mxu0 %v611_v3  ;;  %v33_v9 = vld [vmem:[#allocation2 + $0x30] sm:$0xff]  ;;  %v34_v10 = vld [vmem:[#allocation2 + $0x38] sm:$0xff] }
  0x16   :  { %614 = vmatpush3.bf16.msra.mxu0 %v611_v3 }
  0x17   :  { %166 = vxpose.xlu0.b32.end [2/2] (short) (narrow) %v26_v1, 16 }
  0x19   :  { %572 = vmatmul.mubr.msk.f32.vlgmr.msra.gmra.mrb[0].mxu0 %vm35_vm0, %v28_v4 }
  0x1a   :  { %574 = vmatprep.mubr.msk.f32.mxu0 %vm35_vm0, %v29_v5 }
  0x1d   :  { %575 = vmatmul.mubr.msk.f32.gmra.mrb[2].mxu0 %vm35_vm0, %v30_v6 }
  0x1e   :  { %577 = vmatprep.mubr.msk.f32.mxu0 %vm35_vm0, %v31_v7 }
  0x21   :  { %578 = vmatmul.mubr.msk.f32.gmra.mrb[4].mxu0 %vm35_vm0, %v32_v8 }
  0x22   :  { %580 = vmatprep.mubr.msk.f32.mxu0 %vm35_vm0, %v33_v9 }
  0x25   :  { %581 = vmatmul.mubr.msk.f32.gmra.mrb[6].mxu0 %vm35_vm0, %v34_v10 }
  0x93   :  { %v181_v11 = vpop.trf.xlu0 }
  0x94   :  { %587 = vmatprep.mubr.msk.f32.mxu1 %vm35_vm0, %v181_v11 }
  0x97   :  { %v182_v17 = vpop.trf.xlu0 }
  0xec   :  { %v573_v12 = vpop.f32.mrb[0].mxu0 }
  0xed   :  { %v126_v13 = vpop.f32.mrb[1].mxu0 }
  0xee   :  { %v615_v14 = vpack.c.bf16 %v573_v12, %v126_v13 }
  0xf0   :  { %v576_v15 = vpop.f32.mrb[2].mxu0  ;;  %616 = vmatprep.subr.bf16.mxu1 %v615_v14 }
  0xf1   :  { %v136_v16 = vpop.f32.mrb[3].mxu0  ;;  %618 = vmatpush3.bf16.msra.mxu1 %v615_v14 }
  0xf2   :  { %v619_v18 = vpack.c.bf16 %v576_v15, %v136_v16 }
  0xf4   :  { %v579_v19 = vpop.f32.mrb[4].mxu0  ;;  %588 = vmatmul.mubr.msk.f32.vlgmr.msra.gmra.mrb[0].mxu1 %vm35_vm0, %v182_v17  ;;  %620 = vmatprep.subr.bf16.mxu1 %v619_v18 }
  0xf5   :  { %v146_v20 = vpop.f32.mrb[5].mxu0  ;;  %622 = vmatpush3.bf16.msra.mxu1 %v619_v18  ;;  %594 = vmatprep.mubr.msk.f32.mxu1 %vm35_vm0, %v181_v11 }
  0xf6   :  { %v623_v21 = vpack.c.bf16 %v579_v19, %v146_v20 }
  0xf8   :  { %v582_v22 = vpop.f32.mrb[6].mxu0  ;;  %595 = vmatmul.mubr.msk.f32.vlgmr.msra.gmra.mrb[2].mxu1 %vm35_vm0, %v182_v17  ;;  %624 = vmatprep.subr.bf16.mxu1 %v623_v21 }
  0xf9   :  { %v156_v23 = vpop.f32.mrb[7].mxu0  ;;  %626 = vmatpush3.bf16.msra.mxu1 %v623_v21  ;;  %601 = vmatprep.mubr.msk.f32.mxu1 %vm35_vm0, %v181_v11 }
  0xfa   :  { %v627_v24 = vpack.c.bf16 %v582_v22, %v156_v23 }
  0xfc   :  { %602 = vmatmul.mubr.msk.f32.vlgmr.msra.gmra.mrb[4].mxu1 %vm35_vm0, %v182_v17  ;;  %628 = vmatprep.subr.bf16.mxu1 %v627_v24 }
  0xfd   :  { %630 = vmatpush3.bf16.msra.mxu1 %v627_v24  ;;  %608 = vmatprep.mubr.msk.f32.mxu1 %vm35_vm0, %v181_v11 }
 0x100   :  { %609 = vmatmul.mubr.msk.f32.vlgmr.msra.gmra.mrb[6].mxu1 %vm35_vm0, %v182_v17 }
 0x1c7   :  { %v589_v25 = vpop.f32.mrb[0].mxu1 }
 0x1c8   :  { %279 = vst.msk [vmem:[%s745_s2 + $0x8] sm:$0xff] %vm35_vm0, %v589_v25  ;;  %v269_v26 = vpop.f32.mrb[1].mxu1 }
 0x1c9   :  { %278 = vst.msk [vmem:[%s745_s2] sm:$0xff] %vm35_vm0, %v269_v26 }
 0x1cb   :  { %v596_v27 = vpop.f32.mrb[2].mxu1 }
 0x1cc   :  { %532 = vst.msk [vmem:[%s745_s2 + $0x18] sm:$0xff] %vm35_vm0, %v596_v27  ;;  %v346_v28 = vpop.f32.mrb[3].mxu1 }
 0x1cd   :  { %531 = vst.msk [vmem:[%s745_s2 + $0x10] sm:$0xff] %vm35_vm0, %v346_v28 }
 0x1cf   :  { %v603_v29 = vpop.f32.mrb[4].mxu1 }
 0x1d0   :  { %536 = vst.msk [vmem:[%s745_s2 + $0x28] sm:$0xff] %vm35_vm0, %v603_v29  ;;  %v424_v30 = vpop.f32.mrb[5].mxu1 }
 0x1d1   :  { %535 = vst.msk [vmem:[%s745_s2 + $0x20] sm:$0xff] %vm35_vm0, %v424_v30 }
 0x1d3   :  { %v610_v31 = vpop.f32.mrb[6].mxu1 }
 0x1d4   :  { %540 = vst.msk [vmem:[%s745_s2 + $0x38] sm:$0xff] %vm35_vm0, %v610_v31  ;;  %v502_v32 = vpop.f32.mrb[7].mxu1 }
 0x1d5   :  { %539 = vst.msk [vmem:[%s745_s2 + $0x30] sm:$0xff] %vm35_vm0, %v502_v32 }
 0x1d6   :  { %518 = vsyncpa [#allocation3], 1 }

// kernel: spdnet_forward.3
= control target key start
LH: loop header
LB: loop body
LE: loop exit
PB: predicated region body
PF: predicated region fallthrough
CT: control target
= control target key end

     0   :  { %vm45_vm0 = vcmask 130048   ;;  %v38_v12 = vlaneseq  ;;  %s4825_s0 = inlined_call_operand.vmem [shape: f32[4,16,16], index: 0, kind: input, shape index: {}]   ;;  %s4826_s1 = inlined_call_operand.vmem [shape: f32[4,1,16], index: 1, kind: input, shape index: {}]   ;;  %s4827_s2 = inlined_call_operand.vmem [shape: bf16[16,16,512], index: 2, kind: input, shape index: {}]   ;;  %s4828_s3 = inlined_call_operand.vmem [shape: bf16[512,256], index: 3, kind: input, shape index: {}]   ;;  %s4829_s4 = inlined_call_operand.vmem [shape: bf16[256,128], index: 4, kind: input, shape index: {}]   ;;  %s4830_s5 = inlined_call_operand.vmem [shape: bf16[128,64], index: 5, kind: input, shape index: {}]   ;;  %s4831_s6 = inlined_call_operand.vmem [shape: bf16[64,128], index: 6, kind: input, shape index: {}]   ;;  %s4832_s7 = inlined_call_operand.vmem [shape: f32[1,1152], index: 7, kind: input, shape index: {}]   ;;  %s4833_s8 = inlined_call_operand.hbm [shape: f32[4,128], index: 8, kind: output, shape index: {}]  }
   0x1   :  { %v31_v0 = vld [vmem:[%s4825_s0] sm:$0xff]  ;;  %v32_v1 = vld [vmem:[%s4825_s0 + $0x8] sm:$0xff]  ;;  %vm4083_vm1 = vmpackc.low %vm45_vm0, %vm45_vm0 }
   0x2   :  { %v33_v2 = vld [vmem:[%s4826_s1] sm:$0x1]  ;;  %v3737_v4 = vpack.c.bf16 %v32_v1, %v31_v0  ;;  %v3352_v6 = vld [vmem:[%s4825_s0 + $0x10] sm:$0xff]  ;;  %v3353_v7 = vld [vmem:[%s4825_s0 + $0x18] sm:$0xff]  ;;  %v4108_v15 = vshrl.u32 %v38_v12, 7 }
   0x3   :  { %v34_v3 = vmax.f32 %v33_v2, 1e-06  ;;  %v3354_v8 = vld [vmem:[%s4826_s1 + $0x1] sm:$0x1]  ;;  %v3743_v9 = vpack.c.bf16 %v3353_v7, %v3352_v6  ;;  %v3361_v11 = vld [vmem:[%s4826_s1 + $0x2] sm:$0x1] }
   0x4   :  { %3739 = vmatprep.subr.msk.bf16.mxu1 %vm4083_vm1, %v3737_v4  ;;  %v138_v10 = vmax.f32 %v3354_v8, 1e-06  ;;  %v241_v13 = vmax.f32 %v3361_v11, 1e-06  ;;  %v3368_v14 = vld [vmem:[%s4826_s1 + $0x3] sm:$0x1] }
   0x5   :  { %3991 = vlog2.f32 %v34_v3  ;;  %3742 = vmatpush3.bf16.xpose.msk.msra.mxu1 %vm4083_vm1, %v3737_v4  ;;  %v344_v16 = vmax.f32 %v3368_v14, 1e-06  ;;  %v4111_v17 = vsub.s32 0, %v4108_v15  ;;  %v3359_v20 = vld [vmem:[%s4825_s0 + $0x20] sm:$0xff]  ;;  %v3360_v21 = vld [vmem:[%s4825_s0 + $0x28] sm:$0xff]  ;;  %v3366_v33 = vld [vmem:[%s4825_s0 + $0x30] sm:$0xff] }
   0x6   :  { %3993 = vlog2.f32 %v138_v10  ;;  %3745 = vmatprep.subr.msk.bf16.mxu1 %vm4083_vm1, %v3743_v9  ;;  %v3749_v30 = vpack.c.bf16 %v3360_v21, %v3359_v20  ;;  %v3367_v34 = vld [vmem:[%s4825_s0 + $0x38] sm:$0xff] }
   0x7   :  { %3995 = vlog2.f32 %v241_v13  ;;  %v3755_v39 = vpack.c.bf16 %v3367_v34, %v3366_v33 }
   0x8   :  { %3997 = vlog2.f32 %v344_v16 }
   0xf   :  { %v3992_v18 = vpop.eup %3991 }
  0x10   :  { %v36_v19 = vmul.f32 0.6931472, %v3992_v18  ;;  %v3994_v22 = vpop.eup %3993 }
  0x11   :  { %v3996_v23 = vpop.eup %3995  ;;  %v140_v25 = vmul.f32 0.6931472, %v3994_v22 }
  0x12   :  { %v41_v24 = vrot.slane %v36_v19, %v4111_v17  ;;  %v243_v29 = vmul.f32 0.6931472, %v3996_v23  ;;  %v3998_v35 = vpop.eup %3997 }
  0x13   :  { %v145_v28 = vrot.slane %v140_v25, %v4111_v17  ;;  %v346_v38 = vmul.f32 0.6931472, %v3998_v35 }
  0x14   :  { %v44_v26 = vmul.f32 %v41_v24, %v32_v1  ;;  %v43_v27 = vmul.f32 %v41_v24, %v31_v0  ;;  %v248_v32 = vrot.slane %v243_v29, %v4111_v17 }
  0x15   :  { %v147_v31 = vmul.f32 %v3352_v6, %v145_v28  ;;  %v148_v36 = vmul.f32 %v3353_v7, %v145_v28  ;;  %v351_v40 = vrot.slane %v346_v38, %v4111_v17 }
  0x16   :  { %3681 = vmatprep.mubr.msk.f32.mxu1 %vm45_vm0, %v43_v27  ;;  %v250_v37 = vmul.f32 %v3359_v20, %v248_v32  ;;  %v251_v41 = vmul.f32 %v3360_v21, %v248_v32 }
  0x17   :  { %3682 = vmatmul.mubr.msk.f32.vlgmr.msra.gmra.mrb[0].mxu1 %vm45_vm0, %v44_v26  ;;  %v353_v42 = vmul.f32 %v3366_v33, %v351_v40  ;;  %v354_v43 = vmul.f32 %v3367_v34, %v351_v40 }
  0x18   :  { %3748 = vmatpush3.bf16.xpose.msk.msra.mxu1 %vm4083_vm1, %v3743_v9  ;;  %3688 = vmatprep.mubr.msk.f32.mxu1 %vm45_vm0, %v147_v31 }
  0x19   :  { %3751 = vmatprep.subr.msk.bf16.mxu1 %vm4083_vm1, %v3749_v30 }
  0x1f   :  { %3689 = vmatmul.mubr.msk.f32.vlgmr.msra.gmra.mrb[2].mxu1 %vm45_vm0, %v148_v36 }
  0x20   :  { %3754 = vmatpush3.bf16.xpose.msk.msra.mxu1 %vm4083_vm1, %v3749_v30  ;;  %3695 = vmatprep.mubr.msk.f32.mxu1 %vm45_vm0, %v250_v37 }
  0x21   :  { %3757 = vmatprep.subr.msk.bf16.mxu1 %vm4083_vm1, %v3755_v39 }
  0x27   :  { %3696 = vmatmul.mubr.msk.f32.vlgmr.msra.gmra.mrb[4].mxu1 %vm45_vm0, %v251_v41 }
  0x28   :  { %3760 = vmatpush3.bf16.xpose.msk.msra.mxu1 %vm4083_vm1, %v3755_v39  ;;  %3702 = vmatprep.mubr.msk.f32.mxu1 %vm45_vm0, %v353_v42 }
  0x2f   :  { %3703 = vmatmul.mubr.msk.f32.vlgmr.msra.gmra.mrb[6].mxu1 %vm45_vm0, %v354_v43 }
  0x30   :  { %13 = vsyncpa [#allocation3], 0  ;;  %v3771_v44 = vld [vmem:[%s4827_s2 + $0x4] ss:$16 sps:$4 sm:$0xff]   ;;  %v3773_v45 = vld [vmem:[%s4827_s2 + $0x20] ss:$16 sps:$4 sm:$0xff]  }
  0x31   :  { %v3775_v46 = vld [vmem:[%s4827_s2 + $0x24] ss:$16 sps:$4 sm:$0xff]   ;;  %v3776_v47 = vld [vmem:[%s4827_s2] ss:$16 sps:$4 sm:$0xff]   ;;  %606 = vmatprep.subr.bf16.mxu0 %v3771_v44  ;;  %v4023_v49 = vmov 0   ;;  %vm451_vm2 = vcmask 1040384  }
  0x32   :  { %501 = vmatprep.subr.bf16.mxu1 %v3775_v46  ;;  %v3779_v48 = vld [vmem:[%s4827_s2 + $0x44] ss:$16 sps:$4 sm:$0xff]   ;;  %607 = vmatpush1.bf16.msra.mxu0 %v3776_v47  ;;  %v3782_v50 = vld [vmem:[%s4827_s2 + $0x2c] ss:$16 sps:$4 sm:$0xff]   ;;  %vm453_vm3 = vcmask 1041408   ;;  %vm455_vm4 = vcmask 1042432  }
  0x33   :  { %502 = vmatpush1.bf16.msra.mxu1 %v3773_v45  ;;  %533 = vmatprep.mubr.bf16.mxu1 %v4023_v49  ;;  %vm4025_vm5 = vmmov 0   ;;  %vm3289_vm6 = vcmask 523264  }
  0x34   :  { %638 = vmatprep.mubr.bf16.mxu0 %v4023_v49  ;;  %726 = vmatprep.subr.bf16.mxu0 %v3779_v48 }
  0x35   :  { %542 = vmatprep.subr.bf16.mxu1 %v3782_v50 }
  0xea   :  { %v3683_v51 = vpop.f32.mrb[0].mxu1 }
  0xeb   :  { %v124_v52 = vpop.f32.mrb[1].mxu1  ;;  %v1568_v53 = vrot.slane %v3683_v51, 1  ;;  %v1692_v54 = vrot.slane %v3683_v51, 2  ;;  %v1816_v55 = vrot.slane %v3683_v51, 3  ;;  %v1940_v56 = vrot.slane %v3683_v51, 4 }
  0xec   :  { %v2066_v57 = vrot.slane %v3683_v51, 5  ;;  %v2192_v58 = vrot.slane %v3683_v51, 6  ;;  %v2318_v59 = vrot.slane %v3683_v51, 7  ;;  %v463_v60 = vrot.slane %v124_v52, 1 }
  0xed   :  { %v688_v61 = vrot.slane %v124_v52, 2  ;;  %v812_v62 = vrot.slane %v124_v52, 3  ;;  %v936_v63 = vrot.slane %v124_v52, 4  ;;  %v1062_v0 = vrot.slane %v124_v52, 5 }
  0xee   :  { %v1188_v1 = vrot.slane %v124_v52, 6  ;;  %v1314_v2 = vrot.slane %v124_v52, 7 }
  0xf2   :  { %v3690_v3 = vpop.f32.mrb[2].mxu1 }
  0xf3   :  { %v1441_v4 = vrot.slane %v3690_v3, 7  ;;  %v1694_v5 = vrot.slane %v3690_v3, 1  ;;  %v1818_v6 = vrot.slane %v3690_v3, 2  ;;  %v1942_v7 = vrot.slane %v3690_v3, 3  ;;  %v227_v8 = vpop.f32.mrb[3].mxu1 }
  0xf4   :  { %v2068_v9 = vrot.slane %v3690_v3, 4  ;;  %v2194_v10 = vrot.slane %v3690_v3, 5  ;;  %v2320_v11 = vrot.slane %v3690_v3, 6  ;;  %v690_v12 = vrot.slane %v227_v8, 1 }
  0xf5   :  { %v814_v13 = vrot.slane %v227_v8, 2  ;;  %v938_v14 = vrot.slane %v227_v8, 3  ;;  %v1064_v16 = vrot.slane %v227_v8, 4  ;;  %v1190_v18 = vrot.slane %v227_v8, 5 }
  0xf6   :  { %v1316_v19 = vrot.slane %v227_v8, 6  ;;  %v469_v20 = vsel %vm451_vm2, %v463_v60, %v227_v8  ;;  %v443_v21 = vrot.slane %v227_v8, 7  ;;  %v694_v22 = vsel %vm451_vm2, %v688_v61, %v690_v12 }
  0xf7   :  { %v818_v23 = vsel %vm451_vm2, %v812_v62, %v814_v13  ;;  %v944_v24 = vsel %vm451_vm2, %v936_v63, %v938_v14  ;;  %v1070_v25 = vsel %vm451_vm2, %v1062_v0, %v1064_v16  ;;  %v1196_v26 = vsel %vm451_vm2, %v1188_v1, %v1190_v18  ;;  %v3777_v16 = vld [vmem:[%s4827_s2 + $0x40] ss:$16 sps:$4 sm:$0xff]  }
  0xf8   :  { %v452_v27 = vsel %vm451_vm2, %v124_v52, %v443_v21  ;;  %v1322_v28 = vsel %vm451_vm2, %v1314_v2, %v1316_v19  ;;  %v1449_v29 = vsel %vm451_vm2, %v3683_v51, %v1441_v4  ;;  %v1574_v30 = vsel %vm451_vm2, %v1568_v53, %v3690_v3 }
  0xf9   :  { %v1698_v31 = vsel %vm451_vm2, %v1692_v54, %v1694_v5  ;;  %v1822_v32 = vsel %vm451_vm2, %v1816_v55, %v1818_v6  ;;  %v1948_v33 = vsel %vm451_vm2, %v1940_v56, %v1942_v7  ;;  %v2074_v34 = vsel %vm451_vm2, %v2066_v57, %v2068_v9 }
  0xfa   :  { %v4181_v35 = vpop.f32.mrb[4].mxu1  ;;  %v4184_v36 = vsel %vm451_vm2, %v2192_v58, %v2194_v10  ;;  %v4187_v37 = vsel %vm451_vm2, %v2318_v59, %v2320_v11 }
  0xfb   :  { %v330_v38 = vpop.f32.mrb[5].mxu1  ;;  %v1444_v39 = vrot.slane %v4181_v35, 6  ;;  %v1570_v40 = vrot.slane %v4181_v35, 7  ;;  %v1699_v41 = vsel %vm453_vm3, %v1698_v31, %v4181_v35  ;;  %v1820_v42 = vrot.slane %v4181_v35, 1 }
  0xfc   :  { %v465_v43 = vrot.slane %v330_v38, 7  ;;  %v446_v44 = vrot.slane %v330_v38, 6  ;;  %v695_v45 = vsel %vm453_vm3, %v694_v22, %v330_v38  ;;  %v816_v46 = vrot.slane %v330_v38, 1 }
  0xfd   :  { %v940_v47 = vrot.slane %v330_v38, 2  ;;  %v1066_v48 = vrot.slane %v330_v38, 3  ;;  %v1192_v50 = vrot.slane %v330_v38, 4  ;;  %v1318_v51 = vrot.slane %v330_v38, 5 }
  0xfe   :  { %v470_v52 = vsel %vm453_vm3, %v469_v20, %v465_v43  ;;  %v454_v53 = vsel %vm453_vm3, %v452_v27, %v446_v44  ;;  %v819_v54 = vsel %vm453_vm3, %v818_v23, %v816_v46  ;;  %v1450_v55 = vsel %vm453_vm3, %v1449_v29, %v1444_v39  ;;  %v3780_v20 = vld [vmem:[%s4827_s2 + $0x28] ss:$16 sps:$4 sm:$0xff]   ;;  %v3788_v27 = vld [vmem:[%s4827_s2 + $0xc] ss:$16 sps:$4 sm:$0xff]   ;;  %v3783_v46 = vld [vmem:[%s4827_s2 + $0x60] ss:$16 sps:$4 sm:$0xff]  }
  0xff   :  { %v945_v56 = vsel %vm453_vm3, %v944_v24, %v940_v47  ;;  %v1071_v57 = vsel %vm453_vm3, %v1070_v25, %v1066_v48  ;;  %v1197_v58 = vsel %vm453_vm3, %v1196_v26, %v1192_v50  ;;  %v1323_v59 = vsel %vm453_vm3, %v1322_v28, %v1318_v51  ;;  %v3785_v26 = vld [vmem:[%s4827_s2 + $0x64] ss:$16 sps:$4 sm:$0xff]   ;;  %v3786_v47 = vld [vmem:[%s4827_s2 + $0x8] ss:$16 sps:$4 sm:$0xff]  }
 0x100   :  { %v1575_v60 = vsel %vm453_vm3, %v1574_v30, %v1570_v40  ;;  %v1823_v61 = vsel %vm453_vm3, %v1822_v32, %v1820_v42  ;;  %v1944_v62 = vrot.slane %v4181_v35, 2  ;;  %v2070_v63 = vrot.slane %v4181_v35, 3 }
 0x101   :  { %v2196_v32 = vrot.slane %v4181_v35, 4 }
 0x102   :  { %v3704_v0 = vpop.f32.mrb[6].mxu1  ;;  %v1949_v1 = vsel %vm453_vm3, %v1948_v33, %v1944_v62  ;;  %v2075_v2 = vsel %vm453_vm3, %v2074_v34, %v2070_v63  ;;  %v2322_v33 = vrot.slane %v4181_v35, 5  ;;  %v3801_v62 = vld [vmem:[%s4827_s2 + $0xc0] ss:$16 sps:$4 sm:$0xff]   ;;  %v3804_v63 = vld [vmem:[%s4827_s2 + $0x88] ss:$16 sps:$4 sm:$0xff]  }
 0x103   :  { %v433_v3 = vpop.f32.mrb[7].mxu1  ;;  %v1447_v4 = vrot.slane %v3704_v0, 5  ;;  %v1572_v5 = vrot.slane %v3704_v0, 6  ;;  %v4210_v6 = vsel %vm455_vm4, %v1823_v61, %v3704_v0  ;;  %v1696_v14 = vrot.slane %v3704_v0, 7  ;;  %v3806_v61 = vld [vmem:[%s4827_s2 + $0x8c] ss:$16 sps:$4 sm:$0xff]  }
 0x104   :  { %v467_v7 = vrot.slane %v433_v3, 6  ;;  %v449_v8 = vrot.slane %v433_v3, 5  ;;  %v692_v9 = vrot.slane %v433_v3, 7  ;;  %v820_v10 = vsel %vm455_vm4, %v819_v54, %v433_v3 }
 0x105   :  { %v942_v11 = vrot.slane %v433_v3, 1  ;;  %v1068_v12 = vrot.slane %v433_v3, 2  ;;  %v1194_v13 = vrot.slane %v433_v3, 3  ;;  %v1320_v22 = vrot.slane %v433_v3, 4  ;;  %v3807_v3 = vld [vmem:[%s4827_s2 + $0xe0] ss:$16 sps:$4 sm:$0xff]  }
 0x106   :  { %v471_v18 = vsel %vm455_vm4, %v470_v52, %v467_v7  ;;  %v456_v19 = vsel %vm455_vm4, %v454_v53, %v449_v8  ;;  %v696_v21 = vsel %vm455_vm4, %v695_v45, %v692_v9  ;;  %v1946_v31 = vrot.slane %v3704_v0, 1  ;;  %v3789_v52 = vld [vmem:[%s4827_s2 + $0x80] ss:$16 sps:$4 sm:$0xff]   ;;  %v3792_v53 = vld [vmem:[%s4827_s2 + $0x48] ss:$16 sps:$4 sm:$0xff]  }
 0x107   :  { %v472_v23 = vpack.c.bf16 %v471_v18, %v471_v18  ;;  %v457_v24 = vpack.c.bf16 %v456_v19, %v456_v19  ;;  %v946_v25 = vsel %vm455_vm4, %v945_v56, %v942_v11  ;;  %v4230_v28 = vsel %vm455_vm4, %v1071_v57, %v1068_v12  ;;  %v3800_v56 = vld [vmem:[%s4827_s2 + $0x6c] ss:$16 sps:$4 sm:$0xff]   ;;  %v3795_v57 = vld [vmem:[%s4827_s2 + $0xa0] ss:$16 sps:$4 sm:$0xff]   ;;  %v3815_v7 = vld [vmem:[%s4827_s2 + $0x104] ss:$16 sps:$4 sm:$0xff]  }
 0x108   :  { %v4233_v29 = vsel %vm455_vm4, %v1197_v58, %v1194_v13  ;;  %v4236_v30 = vsel %vm455_vm4, %v1323_v59, %v1320_v22  ;;  %v4243_v34 = vsel %vm455_vm4, %v1450_v55, %v1447_v4  ;;  %v4246_v38 = vsel %vm455_vm4, %v1575_v60, %v1572_v5  ;;  %v3797_v55 = vld [vmem:[%s4827_s2 + $0xa4] ss:$16 sps:$4 sm:$0xff]   ;;  %v3798_v58 = vld [vmem:[%s4827_s2 + $0x68] ss:$16 sps:$4 sm:$0xff]   ;;  %v3818_v8 = vld [vmem:[%s4827_s2 + $0xcc] ss:$16 sps:$4 sm:$0xff]  }
 0x109   :  { %3381 = vmatmul.mubr.msk.bf16.vlgmr.msra.gmra.mrb[8].mxu1 %vm45_vm0, %v472_v23  ;;  %3387 = vmatmul.mubr.msk.bf16.vlgmr.msra.gmra.mrb[0].mxu0 %vm45_vm0, %v457_v24  ;;  %v4249_v39 = vsel %vm455_vm4, %v1699_v41, %v1696_v14  ;;  %v2072_v40 = vrot.slane %v3704_v0, 2  ;;  %v2198_v42 = vrot.slane %v3704_v0, 3  ;;  %v4254_v35 = vsel %vm455_vm4, %v1949_v1, %v1946_v31  ;;  %v3803_v60 = vld [vmem:[%s4827_s2 + $0xc4] ss:$16 sps:$4 sm:$0xff]   ;;  %v3810_v4 = vld [vmem:[%s4827_s2 + $0xa8] ss:$16 sps:$4 sm:$0xff]  }
 0x10a   :  { %727 = vmatpush1.bf16.msra.mxu0 %v3777_v16  ;;  %543 = vmatpush1.bf16.msra.mxu1 %v3780_v20  ;;  %v2324_v44 = vrot.slane %v3704_v0, 4  ;;  %v2201_v45 = vsel %vm453_vm3, %v4184_v36, %v2196_v32  ;;  %v2327_v41 = vsel %vm453_vm3, %v4187_v37, %v2322_v33  ;;  %v697_v51 = vpack.c.bf16 %v696_v21, %v696_v21  ;;  %v3791_v36 = vld [vmem:[%s4827_s2 + $0x84] ss:$16 sps:$4 sm:$0xff]   ;;  %v3794_v37 = vld [vmem:[%s4827_s2 + $0x4c] ss:$16 sps:$4 sm:$0xff]  }
 0x10b   :  { %574 = vmatprep.mubr.bf16.mxu1 %v4023_v49  ;;  %758 = vmatprep.mubr.bf16.mxu0 %v4023_v49  ;;  %v4257_v43 = vsel %vm455_vm4, %v2075_v2, %v2072_v40  ;;  %v4270_v48 = vsel %vm455_vm4, %v2201_v45, %v2198_v42  ;;  %v821_v54 = vpack.c.bf16 %v820_v10, %v820_v10  ;;  %v3809_v1 = vld [vmem:[%s4827_s2 + $0xe4] ss:$16 sps:$4 sm:$0xff]   ;;  %v3812_v2 = vld [vmem:[%s4827_s2 + $0xac] ss:$16 sps:$4 sm:$0xff]   ;;  %v3813_v9 = vld [vmem:[%s4827_s2 + $0x100] ss:$16 sps:$4 sm:$0xff]  }
 0x10c   :  { %850 = vmatprep.subr.bf16.mxu0 %v3785_v26  ;;  %647 = vmatprep.subr.bf16.mxu1 %v3788_v27  ;;  %v4273_v50 = vsel %vm455_vm4, %v2327_v41, %v2324_v44  ;;  %v947_v59 = vpack.c.bf16 %v946_v25, %v946_v25  ;;  %v1073_v0 = vpack.c.bf16 %v4230_v28, %v4230_v28  ;;  %v3816_v10 = vld [vmem:[%s4827_s2 + $0xc8] ss:$16 sps:$4 sm:$0xff]   ;;  %v3821_v12 = vld [vmem:[%s4827_s2 + $0x124] ss:$16 sps:$4 sm:$0xff]   ;;  %v3824_v13 = vld [vmem:[%s4827_s2 + $0xec] ss:$16 sps:$4 sm:$0xff]  }
 0x10d   :  { %v1199_v5 = vpack.c.bf16 %v4233_v29, %v4233_v29  ;;  %v1325_v11 = vpack.c.bf16 %v4236_v30, %v4236_v30  ;;  %v3819_v14 = vld [vmem:[%s4827_s2 + $0x120] ss:$16 sps:$4 sm:$0xff]   ;;  %v3822_v16 = vld [vmem:[%s4827_s2 + $0xe8] ss:$16 sps:$4 sm:$0xff]   ;;  %v1452_v18 = vpack.c.bf16 %v4243_v34, %v4243_v34  ;;  %v3827_v19 = vld [vmem:[%s4827_s2 + $0x144] ss:$16 sps:$4 sm:$0xff]   ;;  %v1701_v28 = vpack.c.bf16 %v4249_v39, %v4249_v39 }
 0x10e   :  { %v3830_v20 = vld [vmem:[%s4827_s2 + $0x10c] ss:$16 sps:$4 sm:$0xff]   ;;  %v3825_v21 = vld [vmem:[%s4827_s2 + $0x140] ss:$16 sps:$4 sm:$0xff]   ;;  %v3828_v22 = vld [vmem:[%s4827_s2 + $0x108] ss:$16 sps:$4 sm:$0xff]   ;;  %v1825_v33 = vpack.c.bf16 %v4210_v6, %v4210_v6  ;;  %v1951_v40 = vpack.c.bf16 %v4254_v35, %v4254_v35  ;;  %v2077_v41 = vpack.c.bf16 %v4257_v43, %v4257_v43 }
 0x10f   :  { %v3836_v25 = vld [vmem:[%s4827_s2 + $0x12c] ss:$16 sps:$4 sm:$0xff]   ;;  %v3831_v26 = vld [vmem:[%s4827_s2 + $0x160] ss:$16 sps:$4 sm:$0xff]   ;;  %v3834_v27 = vld [vmem:[%s4827_s2 + $0x128] ss:$16 sps:$4 sm:$0xff]  }
 0x110   :  { %v3839_v29 = vld [vmem:[%s4827_s2 + $0x184] ss:$16 sps:$4 sm:$0xff]   ;;  %v3842_v30 = vld [vmem:[%s4827_s2 + $0x14c] ss:$16 sps:$4 sm:$0xff]   ;;  %v3837_v31 = vld [vmem:[%s4827_s2 + $0x180] ss:$16 sps:$4 sm:$0xff]  }
 0x111   :  { %3382 = vmatmul.mubr.msk.bf16.vlgmr.msra.gmra.mrb[12].mxu1 %vm45_vm0, %v472_v23  ;;  %3397 = vmatmul.mubr.msk.bf16.vlgmr.msra.gmra.mrb[4].mxu0 %vm45_vm0, %v697_v51  ;;  %v1577_v23 = vpack.c.bf16 %v4246_v38, %v4246_v38  ;;  %v3840_v32 = vld [vmem:[%s4827_s2 + $0x148] ss:$16 sps:$4 sm:$0xff]   ;;  %v3845_v34 = vld [vmem:[%s4827_s2 + $0x1a4] ss:$16 sps:$4 sm:$0xff]   ;;  %v3848_v38 = vld [vmem:[%s4827_s2 + $0x16c] ss:$16 sps:$4 sm:$0xff]  }
 0x112   :  { %851 = vmatpush1.bf16.msra.mxu0 %v3783_v46  ;;  %648 = vmatpush1.bf16.msra.mxu1 %v3786_v47  ;;  %v3843_v6 = vld [vmem:[%s4827_s2 + $0x1a0] ss:$16 sps:$4 sm:$0xff]   ;;  %v3846_v39 = vld [vmem:[%s4827_s2 + $0x168] ss:$16 sps:$4 sm:$0xff]   ;;  %v3851_v42 = vld [vmem:[%s4827_s2 + $0x1c4] ss:$16 sps:$4 sm:$0xff]  }
 0x113   :  { %679 = vmatprep.mubr.bf16.mxu1 %v4023_v49  ;;  %882 = vmatprep.mubr.bf16.mxu0 %v4023_v49  ;;  %v3854_v44 = vld [vmem:[%s4827_s2 + $0x18c] ss:$16 sps:$4 sm:$0xff]   ;;  %v3849_v35 = vld [vmem:[%s4827_s2 + $0x1c0] ss:$16 sps:$4 sm:$0xff]   ;;  %v3852_v45 = vld [vmem:[%s4827_s2 + $0x188] ss:$16 sps:$4 sm:$0xff]  }
 0x114   :  { %976 = vmatprep.subr.bf16.mxu0 %v3791_v36  ;;  %767 = vmatprep.subr.bf16.mxu1 %v3794_v37  ;;  %v3857_v46 = vld [vmem:[%s4827_s2 + $0x1e4] ss:$16 sps:$4 sm:$0xff]   ;;  %v3860_v47 = vld [vmem:[%s4827_s2 + $0x1ac] ss:$16 sps:$4 sm:$0xff]   ;;  %v3855_v43 = vld [vmem:[%s4827_s2 + $0x1e0] ss:$16 sps:$4 sm:$0xff]   ;;  %v2203_v36 = vpack.c.bf16 %v4270_v48, %v4270_v48  ;;  %v2329_v48 = vpack.c.bf16 %v4273_v50, %v4273_v50 }
 0x115   :  { %v3863_v37 = vld [vmem:[%s4827_s2 + $0x1cc] ss:$16 sps:$4 sm:$0xff]   ;;  %v3867_v50 = vld [vmem:[%s4828_s3] ss:$8 sps:$4 sm:$0xff]  }
 0x119   :  { %3388 = vmatmul.mubr.msk.bf16.vlgmr.msra.gmra.mrb[16].mxu1 %vm45_vm0, %v457_v24  ;;  %3407 = vmatmul.mubr.msk.bf16.vlgmr.msra.gmra.mrb[8].mxu0 %vm45_vm0, %v821_v54  ;;  %v3833_v24 = vld [vmem:[%s4827_s2 + $0x164] ss:$16 sps:$4 sm:$0xff]  }
 0x11a   :  { %977 = vmatpush1.bf16.msra.mxu0 %v3789_v52  ;;  %768 = vmatpush1.bf16.msra.mxu1 %v3792_v53  ;;  %v3861_v52 = vld [vmem:[%s4827_s2 + $0x1c8] ss:$16 sps:$4 sm:$0xff]   ;;  %v3866_v53 = vld [vmem:[%s4827_s2 + $0x1ec] ss:$16 sps:$4 sm:$0xff]  }
 0x11b   :  { %799 = vmatprep.mubr.bf16.mxu1 %v4023_v49  ;;  %1008 = vmatprep.mubr.bf16.mxu0 %v4023_v49 }
 0x11c   :  { %1102 = vmatprep.subr.bf16.mxu0 %v3797_v55  ;;  %891 = vmatprep.subr.bf16.mxu1 %v3800_v56  ;;  %v3869_v55 = vld [vmem:[%s4828_s3 + $0x4] ss:$8 sps:$4 sm:$0xff]   ;;  %v3872_v56 = vld [vmem:[%s4828_s3 + $0x14] ss:$8 sps:$4 sm:$0xff]  }
 0x121   :  { %3398 = vmatmul.mubr.msk.bf16.vlgmr.msra.gmra.mrb[20].mxu1 %vm45_vm0, %v697_v51  ;;  %3417 = vmatmul.mubr.msk.bf16.vlgmr.msra.gmra.mrb[12].mxu0 %vm45_vm0, %v947_v59  ;;  %v3858_v51 = vld [vmem:[%s4827_s2 + $0x1a8] ss:$16 sps:$4 sm:$0xff]  }
 0x122   :  { %1103 = vmatpush1.bf16.msra.mxu0 %v3795_v57  ;;  %892 = vmatpush1.bf16.msra.mxu1 %v3798_v58  ;;  %v3873_v57 = vld [vmem:[%s4828_s3 + $0x20] ss:$8 sps:$4 sm:$0xff]   ;;  %v3875_v58 = vld [vmem:[%s4828_s3 + $0x24] ss:$8 sps:$4 sm:$0xff]  }
 0x123   :  { %923 = vmatprep.mubr.bf16.mxu1 %v4023_v49  ;;  %1134 = vmatprep.mubr.bf16.mxu0 %v4023_v49 }
 0x124   :  { %1228 = vmatprep.subr.bf16.mxu0 %v3803_v60  ;;  %1017 = vmatprep.subr.bf16.mxu1 %v3806_v61  ;;  %v3876_v60 = vld [vmem:[%s4828_s3 + $0x30] ss:$8 sps:$4 sm:$0xff]   ;;  %v3879_v61 = vld [vmem:[%s4828_s3 + $0x40] ss:$8 sps:$4 sm:$0xff]  }
 0x129   :  { %3408 = vmatmul.mubr.msk.bf16.vlgmr.msra.gmra.mrb[24].mxu1 %vm45_vm0, %v821_v54  ;;  %3427 = vmatmul.mubr.msk.bf16.vlgmr.msra.gmra.mrb[16].mxu0 %vm45_vm0, %v1073_v0  ;;  %v3864_v54 = vld [vmem:[%s4827_s2 + $0x1e8] ss:$16 sps:$4 sm:$0xff]  }
 0x12a   :  { %1229 = vmatpush1.bf16.msra.mxu0 %v3801_v62  ;;  %1018 = vmatpush1.bf16.msra.mxu1 %v3804_v63  ;;  %v3881_v62 = vld [vmem:[%s4828_s3 + $0x44] ss:$8 sps:$4 sm:$0xff]   ;;  %v3884_v63 = vld [vmem:[%s4828_s3 + $0x54] ss:$8 sps:$4 sm:$0xff]  }
 0x12b   :  { %1049 = vmatprep.mubr.bf16.mxu1 %v4023_v49  ;;  %1260 = vmatprep.mubr.bf16.mxu0 %v4023_v49 }
 0x12c   :  { %1354 = vmatprep.subr.bf16.mxu0 %v3809_v1  ;;  %1143 = vmatprep.subr.bf16.mxu1 %v3812_v2  ;;  %v3885_v1 = vld [vmem:[%s4828_s3 + $0x60] ss:$8 sps:$4 sm:$0xff]   ;;  %v3887_v2 = vld [vmem:[%s4828_s3 + $0x64] ss:$8 sps:$4 sm:$0xff]  }
 0x131   :  { %3418 = vmatmul.mubr.msk.bf16.vlgmr.msra.gmra.mrb[28].mxu1 %vm45_vm0, %v947_v59  ;;  %3437 = vmatmul.mubr.msk.bf16.vlgmr.msra.gmra.mrb[20].mxu0 %vm45_vm0, %v1199_v5  ;;  %v3878_v59 = vld [vmem:[%s4828_s3 + $0x34] ss:$8 sps:$4 sm:$0xff]  }
 0x132   :  { %1355 = vmatpush1.bf16.msra.mxu0 %v3807_v3  ;;  %1144 = vmatpush1.bf16.msra.mxu1 %v3810_v4  ;;  %v3890_v3 = vld [vmem:[%s4828_s3 + $0x74] ss:$8 sps:$4 sm:$0xff]   ;;  %v3888_v4 = vld [vmem:[%s4828_s3 + $0x70] ss:$8 sps:$4 sm:$0xff]  }
 0x133   :  { %1175 = vmatprep.mubr.bf16.mxu1 %v4023_v49  ;;  %1386 = vmatprep.mubr.bf16.mxu0 %v4023_v49 }
 0x134   :  { %1481 = vmatprep.subr.bf16.mxu0 %v3815_v7  ;;  %1269 = vmatprep.subr.bf16.mxu1 %v3818_v8  ;;  %v3893_v7 = vld [vmem:[%s4828_s3 + $0x84] ss:$8 sps:$4 sm:$0xff]   ;;  %v3896_v8 = vld [vmem:[%s4828_s3 + $0x94] ss:$8 sps:$4 sm:$0xff]  }
 0x139   :  { %3428 = vmatmul.mubr.msk.bf16.vlgmr.msra.gmra.mrb[32].mxu1 %vm45_vm0, %v1073_v0  ;;  %3447 = vmatmul.mubr.msk.bf16.vlgmr.msra.gmra.mrb[24].mxu0 %vm45_vm0, %v1325_v11  ;;  %v3882_v0 = vld [vmem:[%s4828_s3 + $0x50] ss:$8 sps:$4 sm:$0xff]  }
 0x13a   :  { %1482 = vmatpush1.bf16.msra.mxu0 %v3813_v9  ;;  %1270 = vmatpush1.bf16.msra.mxu1 %v3816_v10  ;;  %v3894_v9 = vld [vmem:[%s4828_s3 + $0x90] ss:$8 sps:$4 sm:$0xff]   ;;  %v3897_v10 = vld [vmem:[%s4828_s3 + $0xa0] ss:$8 sps:$4 sm:$0xff]  }
 0x13b   :  { %1301 = vmatprep.mubr.bf16.mxu1 %v4023_v49  ;;  %1513 = vmatprep.mubr.bf16.mxu0 %v4023_v49 }
 0x13c   :  { %1606 = vmatprep.subr.bf16.mxu0 %v3821_v12  ;;  %1395 = vmatprep.subr.bf16.mxu1 %v3824_v13  ;;  %v3902_v12 = vld [vmem:[%s4828_s3 + $0xb4] ss:$8 sps:$4 sm:$0xff]   ;;  %v3900_v13 = vld [vmem:[%s4828_s3 + $0xb0] ss:$8 sps:$4 sm:$0xff]  }
 0x141   :  { %3438 = vmatmul.mubr.msk.bf16.vlgmr.msra.gmra.mrb[36].mxu1 %vm45_vm0, %v1199_v5  ;;  %3457 = vmatmul.mubr.msk.bf16.vlgmr.msra.gmra.mrb[28].mxu0 %vm45_vm0, %v1452_v18  ;;  %v3891_v5 = vld [vmem:[%s4828_s3 + $0x80] ss:$8 sps:$4 sm:$0xff]  }
 0x142   :  { %1607 = vmatpush1.bf16.msra.mxu0 %v3819_v14  ;;  %1396 = vmatpush1.bf16.msra.mxu1 %v3822_v16  ;;  %v3903_v14 = vld [vmem:[%s4828_s3 + $0xc0] ss:$8 sps:$4 sm:$0xff]   ;;  %v3905_v16 = vld [vmem:[%s4828_s3 + $0xc4] ss:$8 sps:$4 sm:$0xff]  }
 0x143   :  { %1427 = vmatprep.mubr.bf16.mxu1 %v4023_v49  ;;  %1638 = vmatprep.mubr.bf16.mxu0 %v4023_v49 }
 0x144   :  { %1730 = vmatprep.subr.bf16.mxu0 %v3827_v19  ;;  %1522 = vmatprep.subr.bf16.mxu1 %v3830_v20  ;;  %v3906_v19 = vld [vmem:[%s4828_s3 + $0xd0] ss:$8 sps:$4 sm:$0xff]   ;;  %v3909_v20 = vld [vmem:[%s4828_s3 + $0xe0] ss:$8 sps:$4 sm:$0xff]  }
 0x149   :  { %3448 = vmatmul.mubr.msk.bf16.vlgmr.msra.gmra.mrb[40].mxu1 %vm45_vm0, %v1325_v11  ;;  %3467 = vmatmul.mubr.msk.bf16.vlgmr.msra.gmra.mrb[32].mxu0 %vm45_vm0, %v1577_v23  ;;  %v3899_v11 = vld [vmem:[%s4828_s3 + $0xa4] ss:$8 sps:$4 sm:$0xff]  }
 0x14a   :  { %1731 = vmatpush1.bf16.msra.mxu0 %v3825_v21  ;;  %1523 = vmatpush1.bf16.msra.mxu1 %v3828_v22  ;;  %v3911_v21 = vld [vmem:[%s4828_s3 + $0xe4] ss:$8 sps:$4 sm:$0xff]   ;;  %v3914_v22 = vld [vmem:[%s4828_s3 + $0xf4] ss:$8 sps:$4 sm:$0xff]  }
 0x14b   :  { %1554 = vmatprep.mubr.bf16.mxu1 %v4023_v49  ;;  %1762 = vmatprep.mubr.bf16.mxu0 %v4023_v49 }
 0x14c   :  { %1854 = vmatprep.subr.bf16.mxu0 %v3833_v24  ;;  %1647 = vmatprep.subr.bf16.mxu1 %v3836_v25  ;;  %v3917_v24 = vld [vmem:[%s4828_s3 + $0x104] ss:$8 sps:$4 sm:$0xff]  }
 0x151   :  { %3458 = vmatmul.mubr.msk.bf16.vlgmr.msra.gmra.mrb[44].mxu1 %vm45_vm0, %v1452_v18  ;;  %3477 = vmatmul.mubr.msk.bf16.vlgmr.msra.gmra.mrb[36].mxu0 %vm45_vm0, %v1701_v28  ;;  %v3908_v18 = vld [vmem:[%s4828_s3 + $0xd4] ss:$8 sps:$4 sm:$0xff]  }
 0x152   :  { %1855 = vmatpush1.bf16.msra.mxu0 %v3831_v26  ;;  %1648 = vmatpush1.bf16.msra.mxu1 %v3834_v27 }
 0x153   :  { %1679 = vmatprep.mubr.bf16.mxu1 %v4023_v49  ;;  %1886 = vmatprep.mubr.bf16.mxu0 %v4023_v49 }
 0x154   :  { %1980 = vmatprep.subr.bf16.mxu0 %v3839_v29  ;;  %1771 = vmatprep.subr.bf16.mxu1 %v3842_v30 }
 0x159   :  { %3468 = vmatmul.mubr.msk.bf16.vlgmr.msra.gmra.mrb[48].mxu1 %vm45_vm0, %v1577_v23  ;;  %3487 = vmatmul.mubr.msk.bf16.vlgmr.msra.gmra.mrb[40].mxu0 %vm45_vm0, %v1825_v33  ;;  %v3912_v23 = vld [vmem:[%s4828_s3 + $0xf0] ss:$8 sps:$4 sm:$0xff]  }
 0x15a   :  { %1981 = vmatpush1.bf16.msra.mxu0 %v3837_v31  ;;  %1772 = vmatpush1.bf16.msra.mxu1 %v3840_v32 }
 0x15b   :  { %1803 = vmatprep.mubr.bf16.mxu1 %v4023_v49  ;;  %2012 = vmatprep.mubr.bf16.mxu0 %v4023_v49 }
 0x15c   :  { %2106 = vmatprep.subr.bf16.mxu0 %v3845_v34  ;;  %1895 = vmatprep.subr.bf16.mxu1 %v3848_v38 }
 0x161   :  { %3478 = vmatmul.mubr.msk.bf16.vlgmr.msra.gmra.mrb[52].mxu1 %vm45_vm0, %v1701_v28  ;;  %3497 = vmatmul.mubr.msk.bf16.vlgmr.msra.gmra.mrb[44].mxu0 %vm45_vm0, %v1951_v40 }
 0x162   :  { %2107 = vmatpush1.bf16.msra.mxu0 %v3843_v6  ;;  %1896 = vmatpush1.bf16.msra.mxu1 %v3846_v39 }
 0x163   :  { %1927 = vmatprep.mubr.bf16.mxu1 %v4023_v49  ;;  %2138 = vmatprep.mubr.bf16.mxu0 %v4023_v49 }
 0x164   :  { %2232 = vmatprep.subr.bf16.mxu0 %v3851_v42  ;;  %2021 = vmatprep.subr.bf16.mxu1 %v3854_v44 }
 0x169   :  { %3488 = vmatmul.mubr.msk.bf16.vlgmr.msra.gmra.mrb[56].mxu1 %vm45_vm0, %v1825_v33  ;;  %3507 = vmatmul.mubr.msk.bf16.vlgmr.msra.gmra.mrb[48].mxu0 %vm45_vm0, %v2077_v41 }
 0x16a   :  { %2233 = vmatpush1.bf16.msra.mxu0 %v3849_v35  ;;  %2022 = vmatpush1.bf16.msra.mxu1 %v3852_v45 }
 0x16b   :  { %2053 = vmatprep.mubr.bf16.mxu1 %v4023_v49  ;;  %2264 = vmatprep.mubr.bf16.mxu0 %v4023_v49 }
 0x16c   :  { %2358 = vmatprep.subr.bf16.mxu0 %v3857_v46  ;;  %2147 = vmatprep.subr.bf16.mxu1 %v3860_v47 }
 0x171   :  { %3498 = vmatmul.mubr.msk.bf16.vlgmr.msra.gmra.mrb[60].mxu1 %vm45_vm0, %v1951_v40  ;;  %3517 = vmatmul.mubr.msk.bf16.vlgmr.msra.gmra.mrb[52].mxu0 %vm45_vm0, %v2203_v36 }
 0x172   :  { %2359 = vmatpush1.bf16.msra.mxu0 %v3855_v43  ;;  %2148 = vmatpush1.bf16.msra.mxu1 %v3858_v51 }
 0x173   :  { %2179 = vmatprep.mubr.bf16.mxu1 %v4023_v49  ;;  %2390 = vmatprep.mubr.bf16.mxu0 %v4023_v49 }
 0x174   :  { %2273 = vmatprep.subr.bf16.mxu1 %v3863_v37  ;;  %2874 = vmatprep.subr.bf16.mxu0 %v3869_v55 }
 0x179   :  { %3508 = vmatmul.mubr.msk.bf16.vlgmr.msra.gmra.mrb[64].mxu1 %vm45_vm0, %v2077_v41  ;;  %3527 = vmatmul.mubr.msk.bf16.vlgmr.msra.gmra.mrb[56].mxu0 %vm45_vm0, %v2329_v48 }
 0x17a   :  { %2274 = vmatpush1.bf16.msra.mxu1 %v3861_v52  ;;  %2305 = vmatprep.mubr.bf16.mxu1 %v4023_v49 }
 0x17b   :  { %2399 = vmatprep.subr.bf16.mxu1 %v3866_v53  ;;  %2875 = vmatpush1.bf16.msra.mxu0 %v3867_v50 }
 0x17c   :  { %2876 = vmatprep.subr.bf16.mxu0 %v3872_v56 }
 0x181   :  { %3518 = vmatmul.mubr.msk.bf16.vlgmr.msra.gmra.mrb[68].mxu1 %vm45_vm0, %v2203_v36 }
 0x182   :  { %2400 = vmatpush1.bf16.msra.mxu1 %v3864_v54  ;;  %2431 = vmatprep.mubr.bf16.mxu1 %v4023_v49  ;;  %v3870_v49 = vld [vmem:[%s4828_s3 + $0x10] ss:$8 sps:$4 sm:$0xff]  }
 0x183   :  { %2877 = vmatpush1.bf16.msra.mxu0 %v3870_v49 }
 0x184   :  { %2878 = vmatprep.subr.bf16.mxu0 %v3875_v58 }
 0x187   :  { %2879 = vmatpush1.bf16.msra.mxu0 %v3873_v57 }
 0x188   :  { %2880 = vmatprep.subr.bf16.mxu0 %v3878_v59 }
 0x189   :  { %3528 = vmatmul.mubr.msk.bf16.vlgmr.msra.gmra.mrb[72].mxu1 %vm45_vm0, %v2329_v48 }
 0x18b   :  { %2881 = vmatpush1.bf16.msra.mxu0 %v3876_v60 }
 0x18c   :  { %2882 = vmatprep.subr.bf16.mxu0 %v3881_v62 }
 0x18f   :  { %2883 = vmatpush1.bf16.msra.mxu0 %v3879_v61 }
 0x190   :  { %2884 = vmatprep.subr.bf16.mxu0 %v3884_v63 }
 0x193   :  { %2885 = vmatpush1.bf16.msra.mxu0 %v3882_v0 }
 0x194   :  { %2886 = vmatprep.subr.bf16.mxu0 %v3887_v2 }
 0x197   :  { %2887 = vmatpush1.bf16.msra.mxu0 %v3885_v1 }
 0x198   :  { %2888 = vmatprep.subr.bf16.mxu0 %v3890_v3 }
 0x19b   :  { %2889 = vmatpush1.bf16.msra.mxu0 %v3888_v4 }
 0x19c   :  { %2890 = vmatprep.subr.bf16.mxu0 %v3893_v7 }
 0x19f   :  { %2891 = vmatpush1.bf16.msra.mxu0 %v3891_v5 }
 0x1a0   :  { %2892 = vmatprep.subr.bf16.mxu0 %v3896_v8 }
 0x1a3   :  { %2893 = vmatpush1.bf16.msra.mxu0 %v3894_v9 }
 0x1a4   :  { %2894 = vmatprep.subr.bf16.mxu0 %v3899_v11 }
 0x1a7   :  { %2895 = vmatpush1.bf16.msra.mxu0 %v3897_v10 }
 0x1a8   :  { %2896 = vmatprep.subr.bf16.mxu0 %v3902_v12 }
 0x1ab   :  { %2897 = vmatpush1.bf16.msra.mxu0 %v3900_v13 }
 0x1ac   :  { %2898 = vmatprep.subr.bf16.mxu0 %v3905_v16 }
 0x1af   :  { %2899 = vmatpush1.bf16.msra.mxu0 %v3903_v14 }
 0x1b0   :  { %2900 = vmatprep.subr.bf16.mxu0 %v3908_v18 }
 0x1b3   :  { %2901 = vmatpush1.bf16.msra.mxu0 %v3906_v19 }
 0x1b4   :  { %2902 = vmatprep.subr.bf16.mxu0 %v3911_v21 }
 0x1b7   :  { %2903 = vmatpush1.bf16.msra.mxu0 %v3909_v20 }
 0x1b8   :  { %2904 = vmatprep.subr.bf16.mxu0 %v3914_v22 }
 0x1bb   :  { %2905 = vmatpush1.bf16.msra.mxu0 %v3912_v23 }
 0x1bc   :  { %2915 = vmatprep.subr.bf16.mxu0 %v3917_v24 }
 0x1dc   :  { %v535_v25 = vpop.f32.mrb[8].mxu1  ;;  %v640_v26 = vpop.f32.mrb[0].mxu0 }
 0x1dd   :  { %v641_v27 = vadd.f32 %v640_v26, %v535_v25  ;;  %v537_v28 = vpop.f32.mrb[9].mxu1  ;;  %v642_v29 = vpop.f32.mrb[1].mxu0 }
 0x1de   :  { %v643_v30 = vadd.f32 %v642_v29, %v537_v28  ;;  %v539_v31 = vpop.f32.mrb[10].mxu1  ;;  %v644_v32 = vpop.f32.mrb[2].mxu0 }
 0x1df   :  { %v540_v33 = vpop.f32.mrb[11].mxu1  ;;  %v645_v34 = vpop.f32.mrb[3].mxu0 }
 0x1e4   :  { %v576_v38 = vpop.f32.mrb[12].mxu1  ;;  %v760_v6 = vpop.f32.mrb[4].mxu0 }
 0x1e5   :  { %v808_v39 = vadd.f32 %v760_v6, %v641_v27  ;;  %v578_v40 = vpop.f32.mrb[13].mxu1  ;;  %v762_v42 = vpop.f32.mrb[5].mxu0 }
 0x1e6   :  { %v809_v44 = vadd.f32 %v762_v42, %v643_v30  ;;  %v580_v35 = vpop.f32.mrb[14].mxu1  ;;  %v764_v45 = vpop.f32.mrb[6].mxu0 }
 0x1e7   :  { %v581_v41 = vpop.f32.mrb[15].mxu1  ;;  %v765_v46 = vpop.f32.mrb[7].mxu0 }
 0x1ec   :  { %v681_v47 = vpop.f32.mrb[16].mxu1  ;;  %v884_v43 = vpop.f32.mrb[8].mxu0 }
 0x1ed   :  { %v682_v51 = vadd.f32 %v681_v47, %v576_v38  ;;  %v932_v36 = vadd.f32 %v884_v43, %v808_v39  ;;  %v683_v37 = vpop.f32.mrb[17].mxu1  ;;  %v886_v52 = vpop.f32.mrb[9].mxu0 }
 0x1ee   :  { %v684_v48 = vadd.f32 %v683_v37, %v578_v40  ;;  %v933_v53 = vadd.f32 %v886_v52, %v809_v44  ;;  %v685_v54 = vpop.f32.mrb[18].mxu1  ;;  %v888_v50 = vpop.f32.mrb[10].mxu0 }
 0x1ef   :  { %v686_v55 = vpop.f32.mrb[19].mxu1  ;;  %v889_v56 = vpop.f32.mrb[11].mxu0 }
 0x1f0   :  { %v3963_v55 = vld [vmem:[%s4829_s4 + $0x40] sm:$0xff]  }
 0x1f1   :  { %v3964_v56 = vld [vmem:[%s4829_s4] sm:$0xff]   ;;  %3641 = vmatprep.subr.bf16.mxu1 %v3963_v55 }
 0x1f2   :  { %3642 = vmatpush3.bf16.msra.mxu1 %v3964_v56 }
 0x1f4   :  { %v801_v49 = vpop.f32.mrb[20].mxu1  ;;  %v1010_v57 = vpop.f32.mrb[12].mxu0 }
 0x1f5   :  { %v810_v58 = vadd.f32 %v801_v49, %v682_v51  ;;  %v1058_v59 = vadd.f32 %v1010_v57, %v932_v36  ;;  %v803_v60 = vpop.f32.mrb[21].mxu1  ;;  %v1012_v61 = vpop.f32.mrb[13].mxu0  ;;  %v3965_v49 = vld [vmem:[%s4829_s4 + $0x48] sm:$0xff]  }
 0x1f6   :  { %v811_v62 = vadd.f32 %v803_v60, %v684_v48  ;;  %v1059_v63 = vadd.f32 %v1012_v61, %v933_v53  ;;  %v805_v0 = vpop.f32.mrb[22].mxu1  ;;  %v1014_v1 = vpop.f32.mrb[14].mxu0  ;;  %v3966_v57 = vld [vmem:[%s4829_s4 + $0x8] sm:$0xff]   ;;  %3643 = vmatprep.subr.bf16.mxu1 %v3965_v49 }
 0x1f7   :  { %v806_v2 = vpop.f32.mrb[23].mxu1  ;;  %v1015_v3 = vpop.f32.mrb[15].mxu0  ;;  %3644 = vmatpush3.bf16.msra.mxu1 %v3966_v57 }
 0x1fc   :  { %v925_v4 = vpop.f32.mrb[24].mxu1  ;;  %v1136_v5 = vpop.f32.mrb[16].mxu0 }
 0x1fd   :  { %v934_v7 = vadd.f32 %v925_v4, %v810_v58  ;;  %v1184_v8 = vadd.f32 %v1136_v5, %v1058_v59  ;;  %v927_v9 = vpop.f32.mrb[25].mxu1  ;;  %v1138_v10 = vpop.f32.mrb[17].mxu0  ;;  %v3967_v58 = vld [vmem:[%s4829_s4 + $0x50] sm:$0xff]  }
 0x1fe   :  { %v935_v11 = vadd.f32 %v927_v9, %v811_v62  ;;  %v1185_v12 = vadd.f32 %v1138_v10, %v1059_v63  ;;  %v929_v13 = vpop.f32.mrb[26].mxu1  ;;  %v1140_v14 = vpop.f32.mrb[18].mxu0  ;;  %v3968_v5 = vld [vmem:[%s4829_s4 + $0x10] sm:$0xff]   ;;  %3645 = vmatprep.subr.bf16.mxu1 %v3967_v58  ;;  %v3969_v9 = vld [vmem:[%s4829_s4 + $0x58] sm:$0xff]  }
 0x1ff   :  { %v930_v16 = vpop.f32.mrb[27].mxu1  ;;  %v1141_v18 = vpop.f32.mrb[19].mxu0  ;;  %3646 = vmatpush3.bf16.msra.mxu1 %v3968_v5  ;;  %v3970_v10 = vld [vmem:[%s4829_s4 + $0x18] sm:$0xff]  }
 0x200   :  { %3647 = vmatprep.subr.bf16.mxu1 %v3969_v9 }
 0x203   :  { %3648 = vmatpush3.bf16.msra.mxu1 %v3970_v10 }
 0x204   :  { %v1051_v19 = vpop.f32.mrb[28].mxu1  ;;  %v1262_v20 = vpop.f32.mrb[20].mxu0 }
 0x205   :  { %v1060_v21 = vadd.f32 %v1051_v19, %v934_v7  ;;  %v1310_v22 = vadd.f32 %v1262_v20, %v1184_v8  ;;  %v1053_v23 = vpop.f32.mrb[29].mxu1  ;;  %v1264_v24 = vpop.f32.mrb[21].mxu0 }
 0x206   :  { %v1061_v25 = vadd.f32 %v1053_v23, %v935_v11  ;;  %v1311_v26 = vadd.f32 %v1264_v24, %v1185_v12  ;;  %v1055_v27 = vpop.f32.mrb[30].mxu1  ;;  %v1266_v28 = vpop.f32.mrb[22].mxu0  ;;  %v3971_v11 = vld [vmem:[%s4829_s4 + $0x60] sm:$0xff]  }
 0x207   :  { %v1056_v29 = vpop.f32.mrb[31].mxu1  ;;  %v1267_v30 = vpop.f32.mrb[23].mxu0  ;;  %v3972_v24 = vld [vmem:[%s4829_s4 + $0x20] sm:$0xff]   ;;  %3649 = vmatprep.subr.bf16.mxu1 %v3971_v11  ;;  %v3973_v27 = vld [vmem:[%s4829_s4 + $0x68] sm:$0xff]  }
 0x208   :  { %3650 = vmatpush3.bf16.msra.mxu1 %v3972_v24  ;;  %v3974_v28 = vld [vmem:[%s4829_s4 + $0x28] sm:$0xff]  }
 0x209   :  { %3651 = vmatprep.subr.bf16.mxu1 %v3973_v27 }
 0x20c   :  { %v1177_v31 = vpop.f32.mrb[32].mxu1  ;;  %v1388_v32 = vpop.f32.mrb[24].mxu0  ;;  %3652 = vmatpush3.bf16.msra.mxu1 %v3974_v28 }
 0x20d   :  { %v1186_v33 = vadd.f32 %v1177_v31, %v1060_v21  ;;  %v1436_v34 = vadd.f32 %v1388_v32, %v1310_v22  ;;  %v1179_v38 = vpop.f32.mrb[33].mxu1  ;;  %v1390_v6 = vpop.f32.mrb[25].mxu0 }
 0x20e   :  { %v1187_v39 = vadd.f32 %v1179_v38, %v1061_v25  ;;  %v1437_v40 = vadd.f32 %v1390_v6, %v1311_v26  ;;  %v1181_v42 = vpop.f32.mrb[34].mxu1  ;;  %v1392_v44 = vpop.f32.mrb[26].mxu0 }
 0x20f   :  { %v1182_v35 = vpop.f32.mrb[35].mxu1  ;;  %v1393_v45 = vpop.f32.mrb[27].mxu0 }
 0x214   :  { %v1303_v41 = vpop.f32.mrb[36].mxu1  ;;  %v1515_v46 = vpop.f32.mrb[28].mxu0 }
 0x215   :  { %v1312_v47 = vadd.f32 %v1303_v41, %v1186_v33  ;;  %v1563_v43 = vadd.f32 %v1515_v46, %v1436_v34  ;;  %v1305_v51 = vpop.f32.mrb[37].mxu1  ;;  %v1517_v36 = vpop.f32.mrb[29].mxu0 }
 0x216   :  { %v1313_v37 = vadd.f32 %v1305_v51, %v1187_v39  ;;  %v1564_v52 = vadd.f32 %v1517_v36, %v1437_v40  ;;  %v1307_v48 = vpop.f32.mrb[38].mxu1  ;;  %v1519_v53 = vpop.f32.mrb[30].mxu0 }
 0x217   :  { %v1308_v54 = vpop.f32.mrb[39].mxu1  ;;  %v1520_v50 = vpop.f32.mrb[31].mxu0 }
 0x21c   :  { %v1429_v59 = vpop.f32.mrb[40].mxu1  ;;  %v1640_v60 = vpop.f32.mrb[32].mxu0 }
 0x21d   :  { %v1438_v61 = vadd.f32 %v1429_v59, %v1312_v47  ;;  %v1688_v62 = vadd.f32 %v1640_v60, %v1563_v43  ;;  %v1431_v63 = vpop.f32.mrb[41].mxu1  ;;  %v1642_v0 = vpop.f32.mrb[33].mxu0 }
 0x21e   :  { %v1439_v1 = vadd.f32 %v1431_v63, %v1313_v37  ;;  %v1689_v2 = vadd.f32 %v1642_v0, %v1564_v52  ;;  %v1433_v3 = vpop.f32.mrb[42].mxu1  ;;  %v1644_v4 = vpop.f32.mrb[34].mxu0 }
 0x21f   :  { %v1434_v7 = vpop.f32.mrb[43].mxu1  ;;  %v1645_v8 = vpop.f32.mrb[35].mxu0 }
 0x224   :  { %v1556_v12 = vpop.f32.mrb[44].mxu1  ;;  %v1764_v13 = vpop.f32.mrb[36].mxu0 }
 0x225   :  { %v1565_v14 = vadd.f32 %v1556_v12, %v1438_v61  ;;  %v1812_v16 = vadd.f32 %v1764_v13, %v1688_v62  ;;  %v1558_v18 = vpop.f32.mrb[45].mxu1  ;;  %v1766_v19 = vpop.f32.mrb[37].mxu0  ;;  %v2444_v13 = vld [vmem:[%s4832_s7] sm:$0xf] }
 0x226   :  { %v1566_v20 = vadd.f32 %v1558_v18, %v1439_v1  ;;  %v1813_v21 = vadd.f32 %v1766_v19, %v1689_v2  ;;  %v1560_v22 = vpop.f32.mrb[46].mxu1  ;;  %v1768_v23 = vpop.f32.mrb[38].mxu0 }
 0x227   :  { %v1561_v25 = vpop.f32.mrb[47].mxu1  ;;  %v1769_v26 = vpop.f32.mrb[39].mxu0 }
 0x22c   :  { %v1681_v29 = vpop.f32.mrb[48].mxu1  ;;  %v1888_v30 = vpop.f32.mrb[40].mxu0 }
 0x22d   :  { %v1690_v31 = vadd.f32 %v1681_v29, %v1565_v14  ;;  %v1936_v32 = vadd.f32 %v1888_v30, %v1812_v16  ;;  %v1683_v33 = vpop.f32.mrb[49].mxu1  ;;  %v1890_v34 = vpop.f32.mrb[41].mxu0  ;;  %v2452_v14 = vsub.s32 1, %v4108_v15  ;;  %v2449_v16 = vrot.slane %v2444_v13, %v4111_v17 }
 0x22e   :  { %v1691_v38 = vadd.f32 %v1683_v33, %v1566_v20  ;;  %v1937_v6 = vadd.f32 %v1890_v34, %v1813_v21  ;;  %v1685_v39 = vpop.f32.mrb[50].mxu1  ;;  %v1892_v40 = vpop.f32.mrb[42].mxu0 }
 0x22f   :  { %v1686_v42 = vpop.f32.mrb[51].mxu1  ;;  %v1893_v44 = vpop.f32.mrb[43].mxu0  ;;  %v2453_v20 = vrot.slane %v2444_v13, %v2452_v14  ;;  %v3915_v39 = vld [vmem:[%s4828_s3 + $0x100] ss:$8 sps:$4 sm:$0xff]  }
 0x234   :  { %v1805_v35 = vpop.f32.mrb[52].mxu1  ;;  %v2014_v45 = vpop.f32.mrb[44].mxu0 }
 0x235   :  { %v1814_v41 = vadd.f32 %v1805_v35, %v1690_v31  ;;  %v2062_v46 = vadd.f32 %v2014_v45, %v1936_v32  ;;  %v1807_v47 = vpop.f32.mrb[53].mxu1  ;;  %v2016_v43 = vpop.f32.mrb[45].mxu0  ;;  %v3920_v35 = vld [vmem:[%s4828_s3 + $0x114] ss:$8 sps:$4 sm:$0xff]  }
 0x236   :  { %v1815_v51 = vadd.f32 %v1807_v47, %v1691_v38  ;;  %v2063_v36 = vadd.f32 %v2016_v43, %v1937_v6  ;;  %v1809_v37 = vpop.f32.mrb[54].mxu1  ;;  %v2018_v52 = vpop.f32.mrb[46].mxu0  ;;  %v2456_v47 = vsub.s32 2, %v4108_v15  ;;  %v3918_v43 = vld [vmem:[%s4828_s3 + $0x110] ss:$8 sps:$4 sm:$0xff]  }
 0x237   :  { %v1810_v48 = vpop.f32.mrb[55].mxu1  ;;  %v2019_v53 = vpop.f32.mrb[47].mxu0 }
 0x238   :  { %v2457_v37 = vrot.slane %v2444_v13, %v2456_v47  ;;  %v3921_v53 = vld [vmem:[%s4828_s3 + $0x120] ss:$8 sps:$4 sm:$0xff]  }
 0x23c   :  { %v1929_v54 = vpop.f32.mrb[56].mxu1  ;;  %v2140_v50 = vpop.f32.mrb[48].mxu0 }
 0x23d   :  { %v1938_v55 = vadd.f32 %v1929_v54, %v1814_v41  ;;  %v2188_v56 = vadd.f32 %v2140_v50, %v2062_v46  ;;  %v1931_v49 = vpop.f32.mrb[57].mxu1  ;;  %v2142_v57 = vpop.f32.mrb[49].mxu0 }
 0x23e   :  { %v1939_v58 = vadd.f32 %v1931_v49, %v1815_v51  ;;  %v2189_v59 = vadd.f32 %v2142_v57, %v2063_v36  ;;  %v1933_v60 = vpop.f32.mrb[58].mxu1  ;;  %v2144_v61 = vpop.f32.mrb[50].mxu0  ;;  %v2460_v51 = vsub.s32 3, %v4108_v15  ;;  %v3923_v36 = vld [vmem:[%s4828_s3 + $0x124] ss:$8 sps:$4 sm:$0xff]  }
 0x23f   :  { %v1934_v62 = vpop.f32.mrb[59].mxu1  ;;  %v2145_v63 = vpop.f32.mrb[51].mxu0  ;;  %v3924_v60 = vld [vmem:[%s4828_s3 + $0x130] ss:$8 sps:$4 sm:$0xff]   ;;  %v3929_v61 = vld [vmem:[%s4828_s3 + $0x144] ss:$8 sps:$4 sm:$0xff]  }
 0x240   :  { %v2461_v48 = vrot.slane %v2444_v13, %v2460_v51  ;;  %v3945_v13 = vld [vmem:[%s4828_s3 + $0x1a0] ss:$8 sps:$4 sm:$0xff]  }
 0x241   :  { %v3980_v15 = vld [vmem:[%s4830_s5 + $0x8] sm:$0xff]  }
 0x244   :  { %v2055_v0 = vpop.f32.mrb[60].mxu1  ;;  %v2266_v1 = vpop.f32.mrb[52].mxu0 }
 0x245   :  { %v2064_v2 = vadd.f32 %v2055_v0, %v1938_v55  ;;  %v2314_v3 = vadd.f32 %v2266_v1, %v2188_v56  ;;  %v2057_v4 = vpop.f32.mrb[61].mxu1  ;;  %v2268_v5 = vpop.f32.mrb[53].mxu0  ;;  %v3926_v55 = vld [vmem:[%s4828_s3 + $0x134] ss:$8 sps:$4 sm:$0xff]   ;;  %v3927_v0 = vld [vmem:[%s4828_s3 + $0x140] ss:$8 sps:$4 sm:$0xff]  }
 0x246   :  { %v2065_v7 = vadd.f32 %v2057_v4, %v1939_v58  ;;  %v2315_v8 = vadd.f32 %v2268_v5, %v2189_v59  ;;  %v2059_v9 = vpop.f32.mrb[62].mxu1  ;;  %v2270_v10 = vpop.f32.mrb[54].mxu0  ;;  %v3932_v1 = vld [vmem:[%s4828_s3 + $0x154] ss:$8 sps:$4 sm:$0xff]   ;;  %v3933_v4 = vld [vmem:[%s4828_s3 + $0x160] ss:$8 sps:$4 sm:$0xff]  }
 0x247   :  { %v2060_v11 = vpop.f32.mrb[63].mxu1  ;;  %v2271_v12 = vpop.f32.mrb[55].mxu0  ;;  %v3938_v5 = vld [vmem:[%s4828_s3 + $0x174] ss:$8 sps:$4 sm:$0xff]   ;;  %v3939_v9 = vld [vmem:[%s4828_s3 + $0x180] ss:$8 sps:$4 sm:$0xff]  }
 0x248   :  { %v3944_v10 = vld [vmem:[%s4828_s3 + $0x194] ss:$8 sps:$4 sm:$0xff]   ;;  %v3942_v11 = vld [vmem:[%s4828_s3 + $0x190] ss:$8 sps:$4 sm:$0xff]   ;;  %v3947_v12 = vld [vmem:[%s4828_s3 + $0x1a4] ss:$8 sps:$4 sm:$0xff]  }
 0x24c   :  { %v2181_v18 = vpop.f32.mrb[64].mxu1  ;;  %v2392_v19 = vpop.f32.mrb[56].mxu0 }
 0x24d   :  { %v2190_v21 = vadd.f32 %v2181_v18, %v2064_v2  ;;  %v2440_v22 = vadd.f32 %v2392_v19, %v2314_v3  ;;  %v2183_v23 = vpop.f32.mrb[65].mxu1  ;;  %v2394_v24 = vpop.f32.mrb[57].mxu0  ;;  %v3930_v2 = vld [vmem:[%s4828_s3 + $0x150] ss:$8 sps:$4 sm:$0xff]   ;;  %v3935_v3 = vld [vmem:[%s4828_s3 + $0x164] ss:$8 sps:$4 sm:$0xff]  }
 0x24e   :  { %v2191_v25 = vadd.f32 %v2183_v23, %v2065_v7  ;;  %v2441_v26 = vadd.f32 %v2394_v24, %v2315_v8  ;;  %v2185_v27 = vpop.f32.mrb[66].mxu1  ;;  %v2396_v28 = vpop.f32.mrb[58].mxu0  ;;  %v3936_v7 = vld [vmem:[%s4828_s3 + $0x170] ss:$8 sps:$4 sm:$0xff]   ;;  %v3941_v8 = vld [vmem:[%s4828_s3 + $0x184] ss:$8 sps:$4 sm:$0xff]  }
 0x24f   :  { %v2466_v29 = vadd.f32 %v2449_v16, %v2440_v22  ;;  %v2186_v30 = vpop.f32.mrb[67].mxu1  ;;  %v2397_v31 = vpop.f32.mrb[59].mxu0  ;;  %v3950_v16 = vld [vmem:[%s4828_s3 + $0x1b4] ss:$8 sps:$4 sm:$0xff]   ;;  %v3948_v18 = vld [vmem:[%s4828_s3 + $0x1b0] ss:$8 sps:$4 sm:$0xff]  }
 0x250   :  { %v2467_v32 = vadd.f32 %v2453_v20, %v2441_v26  ;;  %v3953_v19 = vld [vmem:[%s4828_s3 + $0x1c4] ss:$8 sps:$4 sm:$0xff]   ;;  %v3951_v20 = vld [vmem:[%s4828_s3 + $0x1c0] ss:$8 sps:$4 sm:$0xff]   ;;  %v3954_v22 = vld [vmem:[%s4828_s3 + $0x1d0] ss:$8 sps:$4 sm:$0xff]  }
 0x251   :  { %v2470_v33 = vmax.f32 %v2466_v29, 0.0  ;;  %v3959_v23 = vld [vmem:[%s4828_s3 + $0x1e4] ss:$8 sps:$4 sm:$0xff]   ;;  %v3957_v24 = vld [vmem:[%s4828_s3 + $0x1e0] ss:$8 sps:$4 sm:$0xff]   ;;  %v3975_v29 = vld [vmem:[%s4829_s4 + $0x70] sm:$0xff]  }
 0x252   :  { %v2471_v34 = vmax.f32 %v2467_v32, 0.0  ;;  %v3960_v26 = vld [vmem:[%s4828_s3 + $0x1f0] ss:$8 sps:$4 sm:$0xff]   ;;  %3653 = vmatprep.subr.bf16.mxu1 %v3975_v29 }
 0x253   :  { %v2475_v40 = vpack.c.bf16 %v2470_v33, %v2470_v33  ;;  %v3976_v30 = vld [vmem:[%s4829_s4 + $0x30] sm:$0xff]   ;;  %v3977_v31 = vld [vmem:[%s4829_s4 + $0x78] sm:$0xff]   ;;  %v4024_v33 = vmov 0.0  }
 0x254   :  { %v2476_v38 = vpack.c.bf16 %v2471_v34, %v2471_v34  ;;  %v2307_v6 = vpop.f32.mrb[68].mxu1  ;;  %3654 = vmatpush3.bf16.msra.mxu1 %v3976_v30  ;;  %v3978_v32 = vld [vmem:[%s4829_s4 + $0x38] sm:$0xff]   ;;  %v2474_v34 = vld [vmem:[%s4832_s7 + $0x4] sm:$0x3] }
 0x255   :  { %v2316_v42 = vadd.f32 %v2307_v6, %v2190_v21  ;;  %v2309_v44 = vpop.f32.mrb[69].mxu1  ;;  %v3956_v21 = vld [vmem:[%s4828_s3 + $0x1d4] ss:$8 sps:$4 sm:$0xff]   ;;  %3655 = vmatprep.subr.bf16.mxu1 %v3977_v31  ;;  %v2551_v6 = vrot.slane %v2474_v34, %v2452_v14 }
 0x256   :  { %v2317_v45 = vadd.f32 %v2309_v44, %v2191_v25  ;;  %v2311_v41 = vpop.f32.mrb[70].mxu1  ;;  %2906 = vmatprep.mubr.bf16.mxu0 %v2476_v38  ;;  %v3962_v25 = vld [vmem:[%s4828_s3 + $0x1f4] ss:$8 sps:$4 sm:$0xff]   ;;  %v2547_v38 = vrot.slane %v2474_v34, %v4111_v17 }
 0x257   :  { %v2312_v46 = vpop.f32.mrb[71].mxu1  ;;  %2907 = vmatmul.mubr.bf16.vlgmr.msra.gmra.mrb[60].mxu0 %v2475_v40  ;;  %v3981_v17 = vld [vmem:[%s4830_s5 + $0x10] sm:$0xff]   ;;  %v3982_v14 = vld [vmem:[%s4830_s5 + $0x18] sm:$0xff]  }
 0x258   :  { %2916 = vmatpush1.bf16.msra.mxu0 %v3915_v39  ;;  %3656 = vmatpush3.bf16.msra.mxu1 %v3978_v32 }
 0x259   :  { %2917 = vmatprep.subr.bf16.mxu0 %v3920_v35  ;;  %3705 = vmatprep.subr.bf16.mxu1 %v4024_v33 }
 0x25c   :  { %2918 = vmatpush1.bf16.msra.mxu0 %v3918_v43  ;;  %v2433_v52 = vpop.f32.mrb[72].mxu1  ;;  %v3979_v43 = vld [vmem:[%s4830_s5] sm:$0xff]  }
 0x25d   :  { %v2442_v54 = vadd.f32 %v2433_v52, %v2316_v42  ;;  %v2435_v50 = vpop.f32.mrb[73].mxu1  ;;  %2919 = vmatprep.subr.bf16.mxu0 %v3923_v36  ;;  %v3983_v36 = vld [vmem:[%s4830_s5 + $0x20] sm:$0xff]   ;;  %v3985_v52 = vld [vmem:[%s4830_s5 + $0x30] sm:$0xff]  }
 0x25e   :  { %v2443_v56 = vadd.f32 %v2435_v50, %v2317_v45  ;;  %v2437_v49 = vpop.f32.mrb[74].mxu1 }
 0x25f   :  { %v2468_v57 = vadd.f32 %v2457_v37, %v2442_v54  ;;  %v2438_v58 = vpop.f32.mrb[75].mxu1  ;;  %v3984_v37 = vld [vmem:[%s4830_s5 + $0x28] sm:$0xff]   ;;  %v3593_v54 = vld [vmem:[%s4832_s7 + $0x6] ss:$0 sm:$0xff] }
 0x260   :  { %v2469_v59 = vadd.f32 %v2461_v48, %v2443_v56  ;;  %2920 = vmatpush1.bf16.msra.mxu0 %v3921_v53  ;;  %v3986_v48 = vld [vmem:[%s4830_s5 + $0x38] sm:$0xff]  }
 0x261   :  { %2921 = vmatprep.subr.bf16.mxu0 %v3926_v55  ;;  %v2472_v27 = vmax.f32 %v2468_v57, 0.0 }
 0x262   :  { %v2473_v62 = vmax.f32 %v2469_v59, 0.0  ;;  %v3987_v59 = vld [vmem:[%s4831_s6] sm:$0xff]  }
 0x263   :  { %v2477_v28 = vpack.c.bf16 %v2472_v27, %v2472_v27 }
 0x264   :  { %v2478_v63 = vpack.c.bf16 %v2473_v62, %v2473_v62  ;;  %2922 = vmatpush1.bf16.msra.mxu0 %v3924_v60  ;;  %v3989_v62 = vld [vmem:[%s4831_s6 + $0x10] sm:$0xff]  }
 0x265   :  { %2923 = vmatprep.subr.bf16.mxu0 %v3929_v61  ;;  %v3988_v61 = vld [vmem:[%s4831_s6 + $0x8] sm:$0xff]  }
 0x266   :  { %2947 = vmatprep.mubr.bf16.mxu0 %v2478_v63  ;;  %v3990_v63 = vld [vmem:[%s4831_s6 + $0x18] sm:$0xff]   ;;  %s4026_s6 = smov [#allocation2]  }
 0x267   :  { %s3340_s25 = sshll.u32 %s4026_s6, 4  ;;  %s3341_s25 = int_to_ptr.vmem [resolvable:$true] %s3340_s25 }
 0x268   :  { %2924 = vmatpush1.bf16.msra.mxu0 %v3927_v0  ;;  %v3610_v0 = vld [vmem:[%s4832_s7 + $0x7] ss:$0 sm:$0xff]  ;;  %s3999_s26 = scalar_lea.vmem %s3341_s25, 64  ;;  %p4004_p1 = scmp.lt.s32.totalorder %s3341_s25, %s3341_s25 }
 0x269   :  { %2925 = vmatprep.subr.bf16.mxu0 %v3932_v1  ;;  %p4000_p0 = scmp.ne.s32.totalorder %s3341_s25, %s3999_s26  ;;  %p4005_p2 = scmp.lt.s32.totalorder %s3999_s26, %s3999_s26 }
 0x26b   :  { %p4006_p3 = por %p4005_p2, %p4004_p1 }
 0x26c   :  { %2926 = vmatpush1.bf16.msra.mxu0 %v3930_v2 }
 0x26d   :  { %2927 = vmatprep.subr.bf16.mxu0 %v3935_v3  ;;  %p4007_p4 = pnand %p4006_p3, %p4000_p0 }
 0x270   :  { %2928 = vmatpush1.bf16.msra.mxu0 %v3933_v4 }
 0x271   :  { %2929 = vmatprep.subr.bf16.mxu0 %v3938_v5 }
 0x274   :  { %2930 = vmatpush1.bf16.msra.mxu0 %v3936_v7 }
 0x275   :  { %2931 = vmatprep.subr.bf16.mxu0 %v3941_v8 }
 0x278   :  { %2932 = vmatpush1.bf16.msra.mxu0 %v3939_v9  ;;  %v3619_v9 = vld [vmem:[%s4832_s7 + $0x8] ss:$0 sm:$0xff] }
 0x279   :  { %2933 = vmatprep.subr.bf16.mxu0 %v3944_v10 }
 0x27c   :  { %2934 = vmatpush1.bf16.msra.mxu0 %v3942_v11 }
 0x27d   :  { %2935 = vmatprep.subr.bf16.mxu0 %v3947_v12 }
 0x280   :  { %2936 = vmatpush1.bf16.msra.mxu0 %v3945_v13 }
 0x281   :  { %2937 = vmatprep.subr.bf16.mxu0 %v3950_v16 }
 0x284   :  { %2938 = vmatpush1.bf16.msra.mxu0 %v3948_v18 }
 0x285   :  { %2939 = vmatprep.subr.bf16.mxu0 %v3953_v19 }
 0x288   :  { %2940 = vmatpush1.bf16.msra.mxu0 %v3951_v20 }
 0x289   :  { %2941 = vmatprep.subr.bf16.mxu0 %v3956_v21 }
 0x28c   :  { %2942 = vmatpush1.bf16.msra.mxu0 %v3954_v22 }
 0x28d   :  { %2943 = vmatprep.subr.bf16.mxu0 %v3959_v23 }
 0x290   :  { %2944 = vmatpush1.bf16.msra.mxu0 %v3957_v24 }
 0x291   :  { %2945 = vmatprep.subr.bf16.mxu0 %v3962_v25 }
 0x294   :  { %2946 = vmatpush1.bf16.msra.mxu0 %v3960_v26 }
 0x297   :  { %2948 = vmatmul.mubr.bf16.vlgmr.msra.gmra.mrb[60].mxu0 %v2477_v28 }
 0x36a   :  { %v2949_v39 = vpop.f32.mrb[60].mxu0 }
 0x36b   :  { %v3761_v40 = vadd.f32 %v2949_v39, %v2547_v38  ;;  %v2951_v42 = vpop.f32.mrb[61].mxu0 }
 0x36c   :  { %v3762_v44 = vadd.f32 %v2951_v42, %v2551_v6  ;;  %v2953_v35 = vpop.f32.mrb[62].mxu0 }
 0x36d   :  { %v2956_v45 = vmax.f32 %v3761_v40, 0.0  ;;  %v2954_v41 = vpop.f32.mrb[63].mxu0 }
 0x36e   :  { %v2957_v46 = vmax.f32 %v3762_v44, 0.0 }
 0x36f   :  { %v2959_v51 = vpack.c.bf16 %v2956_v45, %v2956_v45 }
 0x370   :  { %v2960_v47 = vpack.c.bf16 %v2957_v46, %v2957_v46 }
 0x372   :  { %3127 = vmatprep.mubr.bf16.mxu1 %v2960_v47 }
 0x373   :  { %3128 = vmatmul.mubr.bf16.vlgmr.msra.gmra.mrb[76].mxu1 %v2959_v51 }
 0x374   :  { %3706 = vmatpush3.bf16.msra.mxu1 %v3979_v43  ;;  %3721 = vmatprep.mubr.msk.bf16.mxu1 %vm4025_vm5, %v4024_v33 }
 0x375   :  { %3707 = vmatprep.subr.bf16.mxu1 %v4024_v33 }
 0x378   :  { %3708 = vmatpush3.bf16.msra.mxu1 %v3980_v15 }
 0x379   :  { %3709 = vmatprep.subr.bf16.mxu1 %v4024_v33 }
 0x37c   :  { %3710 = vmatpush3.bf16.msra.mxu1 %v3981_v17 }
 0x37d   :  { %3711 = vmatprep.subr.bf16.mxu1 %v4024_v33 }
 0x380   :  { %3712 = vmatpush3.bf16.msra.mxu1 %v3982_v14 }
 0x381   :  { %3713 = vmatprep.subr.bf16.mxu1 %v4024_v33 }
 0x384   :  { %3714 = vmatpush3.bf16.msra.mxu1 %v3983_v36 }
 0x385   :  { %3715 = vmatprep.subr.bf16.mxu1 %v4024_v33 }
 0x388   :  { %3716 = vmatpush3.bf16.msra.mxu1 %v3984_v37 }
 0x389   :  { %3717 = vmatprep.subr.bf16.mxu1 %v4024_v33 }
 0x38c   :  { %3718 = vmatpush3.bf16.msra.mxu1 %v3985_v52 }
 0x38d   :  { %3719 = vmatprep.subr.bf16.mxu1 %v4024_v33 }
 0x390   :  { %3720 = vmatpush3.bf16.msra.mxu1 %v3986_v48 }
 0x391   :  { %3725 = vmatprep.subr.bf16.mxu1 %v4024_v33 }
 0x446   :  { %v3657_v53 = vpop.f32.mrb[76].mxu1 }
 0x447   :  { %v3658_v50 = vpop.f32.mrb[77].mxu1 }
 0x448   :  { %v3659_v55 = vadd.f32 %v3658_v50, %v3657_v53  ;;  %v3660_v56 = vpop.f32.mrb[78].mxu1 }
 0x449   :  { %v3661_v49 = vpop.f32.mrb[79].mxu1 }
 0x44a   :  { %v3130_v57 = vadd.f32 %v3659_v55, %v3593_v54 }
 0x44c   :  { %v3135_v58 = vmax.f32 %v3130_v57, 0.0 }
 0x44e   :  { %v3137_v60 = vpack.c.bf16 %v3135_v58, %v3135_v58 }
 0x450   :  { %3722 = vmatmul.mubr.bf16.vlgmr.msra.gmra.mrb[80].mxu1 %v3137_v60 }
 0x451   :  { %3726 = vmatpush3.bf16.msra.mxu1 %v3987_v59  ;;  %3733 = vmatprep.mubr.msk.bf16.mxu1 %vm4025_vm5, %v4024_v33 }
 0x452   :  { %3727 = vmatprep.subr.bf16.mxu1 %v4024_v33 }
 0x455   :  { %3728 = vmatpush3.bf16.msra.mxu1 %v3988_v61 }
 0x456   :  { %3729 = vmatprep.subr.bf16.mxu1 %v4024_v33 }
 0x459   :  { %3730 = vmatpush3.bf16.msra.mxu1 %v3989_v62 }
 0x45a   :  { %3731 = vmatprep.subr.bf16.mxu1 %v4024_v33 }
 0x45d   :  { %3732 = vmatpush3.bf16.msra.mxu1 %v3990_v63 }
 0x523   :  { %v3242_v1 = vpop.f32.mrb[80].mxu1 }
 0x524   :  { %v3243_v2 = vadd.f32 %v3610_v0, %v3242_v1  ;;  %v3723_v3 = vpop.f32.mrb[81].mxu1 }
 0x525   :  { %v3245_v4 = vpop.f32.mrb[82].mxu1 }
 0x526   :  { %v3248_v5 = vmax.f32 %v3243_v2, 0.0  ;;  %v3724_v7 = vpop.f32.mrb[83].mxu1 }
 0x528   :  { %v3250_v8 = vpack.c.bf16 %v3248_v5, %v3248_v5 }
 0x52a   :  { %3734 = vmatmul.mubr.msk.bf16.vlgmr.msra.gmra.mrb[84].mxu1 %vm3289_vm6, %v3250_v8 }
 0x5fd   :  { %v3327_v10 = vpop.f32.mrb[84].mxu1 }
 0x5fe   :  { %v3328_v11 = vadd.f32 %v3619_v9, %v3327_v10  ;;  %v3735_v12 = vpop.f32.mrb[85].mxu1 }
 0x5ff   :  { %v3330_v13 = vpop.f32.mrb[86].mxu1 }
 0x600   :  { %3333 = vst [vmem:[#allocation2] sm:$0xf] %v3328_v11  ;;  %v3736_v16 = vpop.f32.mrb[87].mxu1 }
 0x601   :  { %4010 = shalt.err (!%p4007_p4)
}
 0x602   :  { %s4011_s7 = scalar_lea.hbm %s4833_s8, 64 }
 0x603   :  { %p4012_p5 = scmp.ne.s32.totalorder %s4833_s8, %s4011_s7  ;;  %p4015_p6 = scmp.lt.u32.totalorder %s4011_s7, %s4833_s8 }
 0x605   :  { %p4017_p7 = pnand %p4015_p6, %p4012_p5 }
 0x607   :  { %4020 = shalt.err (!%p4017_p7)
}
 0x608   :  { %3343 = dma.vmem_to_hbm [thread:$0]  %s3341_s25, 64, %s4833_s8, [#allocation3]  }
 0x609   :  { %4021 = dma.done.wait [#allocation3], 64  }
 0x60a   :  { %4022 = vsyncadd [#allocation3], 4294967232 }
 0x60b   :  { %3347 = vsyncpa [#allocation3], 1 }

</bundles_post_ra>
